<compile_context>
chip_gen: v6e
topology: v6e:2x2x1
jax: 0.10.0
libtpu: 0.0.40
codegen_flags: <defaults>
</compile_context>

<pallas_src>
import functools

import jax
import jax.numpy as jnp
from jax.experimental import pallas as pl
from jax.experimental.pallas import tpu as pltpu


def _bilstmn_kernel(S, TD, L, H, I,
                    xs_ref,        # (S, 2I)        [xs_fwd | xs_reversed] in lanes
                    wih0_ref,      # (2I, 8H)       layer-0 input->gates, block-diag dirs
                    whh0_ref,      # (2H, 8H)       layer-0 hidden->gates, block-diag dirs
                    wrec_ref,      # (L-1, 4H, 8H)  layers>=1: [wihr;whh] stacked, block-diag dirs
                    b_ref,         # (L, 8H)        [b_f | b_b]  (b_ih + b_hh)
                    wh_diag_ref,   # (2L, 1, H)     diag(attn_wh), dir-major index d*L + l
                    wx_ref,        # (2I, 2L*H)     attn_wx[l].T layer-flattened, block-diag dirs
                    wht_diag_ref,  # (2L, 1, H)     diag(attn_wht)
                    v_ref,         # (2L, 1, H)     attn_v
                    out_ref,       # (S, 2H)        hidden_state_cum, [fwd | bwd] in lanes
                    htape,         # (2L, TD, H)    VMEM scratch: hidden_state_tape
                    ctape):        # (2L, TD, H)    VMEM scratch: cell_state_tape
    f32 = jnp.float32
    DL = 2 * L
    n2 = S - TD
    G = 4 * H                                       # per-direction gate width

    def gates(g, d, c_prev=None):
        """One LSTM cell update for direction d from fused gate rows g (., 8H)."""
        base = d * G
        i_g = jax.nn.sigmoid(g[:, base:base + H])
        g_g = jnp.tanh(g[:, base + 2 * H:base + 3 * H])
        o_g = jax.nn.sigmoid(g[:, base + 3 * H:base + 4 * H])
        c = i_g * g_g
        if c_prev is not None:                      # phase 1: prev cell == 0 -> forget gate vanishes
            c = c + jax.nn.sigmoid(g[:, base + H:base + 2 * H]) * c_prev
        return o_g * jnp.tanh(c), c

    xs = xs_ref[...]                                # (S, 2I)

    # ---- hoisted x-only matmuls (outside the serial recurrence) ------------------
    xg0 = jnp.dot(xs, wih0_ref[...], preferred_element_type=f32) + b_ref[0:1, :]   # (S, 8H)
    if n2 > 0:
        xat_flat = jnp.dot(xs[TD:, :], wx_ref[...], preferred_element_type=f32)    # (n2, 2L*H)
        xat = jnp.stack([xat_flat[:, dl * H:(dl + 1) * H] for dl in range(DL)],
                        axis=0)                                                      # (DL, n2, H)

    b_rows = [b_ref[l:l + 1, :] for l in range(L)]  # hoisted (1, 8H) bias rows

    # ---- phase 1 (batched over TD): state is always zero here --------------------
    # TODO(synk): nn.LSTM inter-layer dropout (train-mode only) omitted; eval-mode forward.
    g = xg0[:TD, :]                                 # (TD, 8H) layer-0 gates
    zpad = jnp.zeros((TD, 2 * H), f32)              # zero prev-hidden rows for the stacked RHS
    h = None
    for l in range(L):
        if l > 0:
            g = jnp.dot(jnp.concatenate([h, zpad], axis=1), wrec_ref[l - 1],
                        preferred_element_type=f32) + b_rows[l]
        hs = []
        for d in range(2):
            h_d, c_d = gates(g, d)
            htape[d * L + l] = h_d
            ctape[d * L + l] = c_d
            hs.append(h_d)
        h = jnp.concatenate(hs, axis=1)             # (TD, 2H) = [h_f | h_b]
    h1 = h                                          # last-layer hidden, phase-1 steps 0..TD-1

    # ---- phase 2: tape attention + fused LSTM step + circular tape overwrite -----
    wh_b = jnp.broadcast_to(wh_diag_ref[...], (DL, TD, H))      # hoisted broadcasts
    v_b = jnp.broadcast_to(v_ref[...], (DL, TD, H))
    wht_d = wht_diag_ref[...]                                   # (DL, 1, H)

    ph = jnp.zeros((DL, 1, H), f32)                 # prev_hidden_tape carry
    rows2 = []
    for j in range(n2):                             # tiny static trip count -> full unroll
        row = TD + j
        slot = j % TD                               # circular slot holding the oldest entry
        ht = htape[...]                             # (DL, TD, H)
        ct = ctape[...]

        xb = xat[:, j:j + 1, :] + wht_d * ph                     # (DL, 1, H)
        a = jnp.tanh(wh_b * ht + xb)                             # (DL, TD, H)
        score = jnp.sum(a * v_b, axis=-1, keepdims=True)         # (DL, TD, 1)
        score = score - jnp.max(score, axis=1, keepdims=True)    # stable softmax over tape dim
        e = jnp.exp(score)
        alpha = e * pl.reciprocal(jnp.sum(e, axis=1, keepdims=True), approx=False)
        ph = jnp.sum(alpha * ht, axis=1, keepdims=True)          # (DL, 1, H)
        pc = jnp.sum(alpha * ct, axis=1, keepdims=True)          # (DL, 1, H)

        # LSTM stack: one fused dot per layer covering both directions AND both the
        # input and recurrent contributions (layer-0 x-part/bias precomputed in xg0).
        hcat = None
        for l in range(L):
            if l == 0:
                lhs = jnp.concatenate([ph[0], ph[L]], axis=-1)               # (1, 2H)
                g = xg0[row:row + 1, :] + jnp.dot(lhs, whh0_ref[...],
                                                  preferred_element_type=f32)
            else:
                lhs = jnp.concatenate([hcat, ph[l], ph[L + l]], axis=-1)     # (1, 4H)
                g = jnp.dot(lhs, wrec_ref[l - 1],
                            preferred_element_type=f32) + b_rows[l]
            hs = []
            for d in range(2):
                h_d, c_d = gates(g, d, pc[d * L + l])
                htape[d * L + l, pl.ds(slot, 1), :] = h_d        # overwrite oldest tape entry
                ctape[d * L + l, pl.ds(slot, 1), :] = c_d
                hs.append(h_d)
            hcat = jnp.concatenate(hs, axis=-1)                  # (1, 2H)
        rows2.append(hcat)

    # ---- single batched output store ----------------------------------------------
    # Reference quirk: phase 2 writes hidden_state_cum[j] (not [TD+j]).  Final rows:
    #   [0, n2)          phase-2 results
    #   [n2, TD)         surviving phase-1 results
    #   [max(TD,n2), S)  never written -> zero
    pieces = []
    if n2 > 0:
        pieces.append(jnp.concatenate(rows2, axis=0))
    if n2 < TD:
        pieces.append(h1[n2:TD, :])
    tail = S - max(TD, n2)
    if tail > 0:
        pieces.append(jnp.zeros((tail, 2 * H), f32))
    out_ref[...] = pieces[0] if len(pieces) == 1 else jnp.concatenate(pieces, axis=0)


def _blockdiag2(a, b):
    """[[a, 0], [0, b]] for 2-D a, b."""
    za = jnp.zeros((a.shape[0], b.shape[1]), a.dtype)
    zb = jnp.zeros((b.shape[0], a.shape[1]), b.dtype)
    return jnp.concatenate([jnp.concatenate([a, za], axis=1),
                            jnp.concatenate([zb, b], axis=1)], axis=0)


@functools.partial(jax.jit, static_argnums=(3,))
def bilstmn_forward(xs, params_f, params_b, tape_depth):
    """BiLSTMN forward. xs: (S, 1, I) float32 -> (S, 2H) float32 ([fwd | bwd])."""
    S, B, I = xs.shape
    assert B == 1, "reference module implicitly requires batch_size == 1"
    L, H = params_f["whh"].shape[0], params_f["whh"].shape[1]
    TD = tape_depth
    assert L >= 2 and S >= TD

    pf, pb = params_f, params_b
    # Directions fused in lanes: dir 0 = forward, dir 1 = reversed sequence.
    xs_f = xs[:, 0, :]
    xs_cat = jnp.concatenate([xs_f, jnp.flip(xs_f, axis=0)], axis=1)          # (S, 2I)

    wih0_bd = _blockdiag2(pf["wih0"], pb["wih0"])                             # (2I, 8H)
    whh0_bd = _blockdiag2(pf["whh"][0], pb["whh"][0])                         # (2H, 8H)
    wrec_bd = jnp.stack(                                                      # (L-1, 4H, 8H)
        [jnp.concatenate([_blockdiag2(pf["wihr"][l - 1], pb["wihr"][l - 1]),
                          _blockdiag2(pf["whh"][l], pb["whh"][l])], axis=0)
         for l in range(1, L)], axis=0)
    b_cat = jnp.concatenate([pf["b"], pb["b"]], axis=1)                       # (L, 8H)

    # Attention params, dir-major (index d*L + l).
    wh_diag2 = jnp.concatenate([pf["wh_diag"], pb["wh_diag"]], axis=0)        # (2L, 1, H)
    wht_diag2 = jnp.concatenate([pf["wht_diag"], pb["wht_diag"]], axis=0)     # (2L, 1, H)
    v2 = jnp.concatenate([pf["v"], pb["v"]], axis=0)                          # (2L, 1, H)
    wx_bd = _blockdiag2(jnp.concatenate(list(pf["wx"]), axis=1),              # (2I, 2L*H)
                        jnp.concatenate(list(pb["wx"]), axis=1))

    kernel = functools.partial(_bilstmn_kernel, S, TD, L, H, I)
    vmem_spec = pl.BlockSpec(memory_space=pltpu.MemorySpace.VMEM)
    # Everything here is a few hundred KiB, far under the default scoped-VMEM limit
    # on v5e/v6e/v7x, so no vmem_limit_bytes override is needed at these sizes.
    return pl.pallas_call(
        kernel,
        out_shape=jax.ShapeDtypeStruct((S, 2 * H), jnp.float32),
        in_specs=[vmem_spec] * 9,
        out_specs=vmem_spec,
        scratch_shapes=[pltpu.VMEM((2 * L, TD, H), jnp.float32),              # hidden_state_tape
                        pltpu.VMEM((2 * L, TD, H), jnp.float32)],             # cell_state_tape
    )(xs_cat, wih0_bd, whh0_bd, wrec_bd, b_cat,
      wh_diag2, wx_bd, wht_diag2, v2)


def init_lstmn_params(key, input_size, hidden_size, num_layers):
    """Deterministic synthetic parameters matching the module's shapes."""
    I, H, L = input_size, hidden_size, num_layers
    ks = jax.random.split(key, 9)
    bound = 1.0 / (H ** 0.5)
    u = lambda k, shape: jax.random.uniform(k, shape, jnp.float32, -bound, bound)
    wih0 = u(ks[0], (I, 4 * H))                        # layer 0 (input, 4H), pre-transposed
    wihr = u(ks[1], (L - 1, H, 4 * H))                 # layers 1.. (H, 4H), pre-transposed
    whh = u(ks[2], (L, H, 4 * H))                      # recurrent, pre-transposed
    b = u(ks[3], (L, 4 * H)) + u(ks[4], (L, 4 * H))    # b_ih + b_hh
    attn_wh = jax.random.normal(ks[5], (L, H, H), jnp.float32)
    attn_wx = jax.random.normal(ks[6], (L, H, I), jnp.float32)
    attn_wht = jax.random.normal(ks[7], (L, H, H), jnp.float32)
    attn_v = jax.random.normal(ks[8], (L, H), jnp.float32)
    return dict(
        wih0=wih0, wihr=wihr, whh=whh, b=b,
        wh_diag=jnp.diagonal(attn_wh, axis1=1, axis2=2)[:, None, :],    # (L,1,H)
        wx=jnp.transpose(attn_wx, (0, 2, 1)),                           # (L,I,H)
        wht_diag=jnp.diagonal(attn_wht, axis1=1, axis2=2)[:, None, :],  # (L,1,H)
        v=attn_v[:, None, :],                                           # (L,1,H)
    )


if __name__ == "__main__":
    input_size, hidden_size, num_layers, tape_depth = 16, 32, 2, 8
    seq_len, batch = 12, 1

    key = jax.random.PRNGKey(0)
    kx, kf, kb = jax.random.split(key, 3)
    xs = jax.random.normal(kx, (seq_len, batch, input_size), jnp.float32)
    params_f = init_lstmn_params(kf, input_size, hidden_size, num_layers)
    params_b = init_lstmn_params(kb, input_size, hidden_size, num_layers)

    out = bilstmn_forward(xs, params_f, params_b, tape_depth)
    out = jax.block_until_ready(out)

    assert out.shape == (seq_len, 2 * hidden_size), out.shape
    assert bool(jnp.all(jnp.isfinite(out)))
    print("KERNEL_OK")
</pallas_src>

<mosaic_0001>
module attributes {stable_mosaic.version = 11 : i64} {
  func.func @_bilstmn_kernel(%arg0: memref<12x32xf32, #tpu.memory_space<vmem>>, %arg1: memref<32x256xf32, #tpu.memory_space<vmem>>, %arg2: memref<64x256xf32, #tpu.memory_space<vmem>>, %arg3: memref<1x128x256xf32, #tpu.memory_space<vmem>>, %arg4: memref<2x256xf32, #tpu.memory_space<vmem>>, %arg5: memref<4x1x32xf32, #tpu.memory_space<vmem>>, %arg6: memref<32x128xf32, #tpu.memory_space<vmem>>, %arg7: memref<4x1x32xf32, #tpu.memory_space<vmem>>, %arg8: memref<4x1x32xf32, #tpu.memory_space<vmem>>, %arg9: memref<12x64xf32, #tpu.memory_space<vmem>>, %arg10: memref<4x8x32xf32, #tpu.memory_space<vmem>>, %arg11: memref<4x8x32xf32, #tpu.memory_space<vmem>>) attributes {dimension_semantics = [], scalar_prefetch = 0 : i64, scratch_operands = 2 : i64, tpu.core_type = #tpu.core_type<tc>} {
    %c0 = arith.constant 0 : index
    %c0_0 = arith.constant 0 : index
    %0 = vector.load %arg0[%c0, %c0_0] : memref<12x32xf32, #tpu.memory_space<vmem>>, vector<12x32xf32>
    %c0_1 = arith.constant 0 : index
    %c0_2 = arith.constant 0 : index
    %1 = vector.load %arg1[%c0_1, %c0_2] : memref<32x256xf32, #tpu.memory_space<vmem>>, vector<32x256xf32>
    %cst = arith.constant dense<0.000000e+00> : vector<12x256xf32>
    %2 = tpu.matmul %0, %1, %cst {dimension_numbers = #tpu.dot_dimension_numbers<[1], [0], [0], [1], [0, 0, 1, 1], [], []>} : vector<12x32xf32>, vector<32x256xf32>, vector<12x256xf32> -> vector<12x256xf32>
    %c0_3 = arith.constant 0 : index
    %c0_4 = arith.constant 0 : index
    %3 = vector.load %arg4[%c0_3, %c0_4] : memref<2x256xf32, #tpu.memory_space<vmem>>, vector<1x256xf32>
    %4 = vector.broadcast %3 : vector<1x256xf32> to vector<12x256xf32>
    %5 = arith.addf %2, %4 : vector<12x256xf32>
    %6 = vector.extract_strided_slice %0 {offsets = [8, 0], sizes = [4, 32], strides = [1, 1]} : vector<12x32xf32> to vector<4x32xf32>
    %c0_5 = arith.constant 0 : index
    %c0_6 = arith.constant 0 : index
    %7 = vector.load %arg6[%c0_5, %c0_6] : memref<32x128xf32, #tpu.memory_space<vmem>>, vector<32x128xf32>
    %cst_7 = arith.constant dense<0.000000e+00> : vector<4x128xf32>
    %8 = tpu.matmul %6, %7, %cst_7 {dimension_numbers = #tpu.dot_dimension_numbers<[1], [0], [0], [1], [0, 0, 1, 1], [], []>} : vector<4x32xf32>, vector<32x128xf32>, vector<4x128xf32> -> vector<4x128xf32>
    %9 = vector.extract_strided_slice %8 {offsets = [0, 0], sizes = [4, 32], strides = [1, 1]} : vector<4x128xf32> to vector<4x32xf32>
    %10 = vector.extract_strided_slice %8 {offsets = [0, 32], sizes = [4, 32], strides = [1, 1]} : vector<4x128xf32> to vector<4x32xf32>
    %11 = vector.extract_strided_slice %8 {offsets = [0, 64], sizes = [4, 32], strides = [1, 1]} : vector<4x128xf32> to vector<4x32xf32>
    %12 = vector.extract_strided_slice %8 {offsets = [0, 96], sizes = [4, 32], strides = [1, 1]} : vector<4x128xf32> to vector<4x32xf32>
    %13 = vector.shape_cast %9 : vector<4x32xf32> to vector<1x4x32xf32>
    %14 = vector.shape_cast %10 : vector<4x32xf32> to vector<1x4x32xf32>
    %15 = vector.shape_cast %11 : vector<4x32xf32> to vector<1x4x32xf32>
    %16 = vector.shape_cast %12 : vector<4x32xf32> to vector<1x4x32xf32>
    %17 = tpu.concatenate %13, %14, %15, %16 in 0 : vector<1x4x32xf32>, vector<1x4x32xf32>, vector<1x4x32xf32>, vector<1x4x32xf32> -> vector<4x4x32xf32>
    %c1 = arith.constant 1 : index
    %c0_8 = arith.constant 0 : index
    %18 = vector.load %arg4[%c1, %c0_8] : memref<2x256xf32, #tpu.memory_space<vmem>>, vector<1x256xf32>
    %19 = vector.extract_strided_slice %5 {offsets = [0, 0], sizes = [8, 256], strides = [1, 1]} : vector<12x256xf32> to vector<8x256xf32>
    %cst_9 = arith.constant 0.000000e+00 : f32
    %20 = vector.broadcast %cst_9 : f32 to vector<8x64xf32>
    %21 = vector.extract_strided_slice %19 {offsets = [0, 0], sizes = [8, 32], strides = [1, 1]} : vector<8x256xf32> to vector<8x32xf32>
    %22 = arith.negf %21 : vector<8x32xf32>
    %23 = math.exp %22 : vector<8x32xf32>
    %cst_10 = arith.constant 1.000000e+00 : f32
    %24 = vector.broadcast %cst_10 : f32 to vector<8x32xf32>
    %25 = arith.addf %24, %23 : vector<8x32xf32>
    %26 = arith.divf %24, %25 : vector<8x32xf32>
    %27 = vector.extract_strided_slice %19 {offsets = [0, 64], sizes = [8, 32], strides = [1, 1]} : vector<8x256xf32> to vector<8x32xf32>
    %28 = math.tanh %27 : vector<8x32xf32>
    %29 = vector.extract_strided_slice %19 {offsets = [0, 96], sizes = [8, 32], strides = [1, 1]} : vector<8x256xf32> to vector<8x32xf32>
    %30 = arith.negf %29 : vector<8x32xf32>
    %31 = math.exp %30 : vector<8x32xf32>
    %cst_11 = arith.constant 1.000000e+00 : f32
    %32 = vector.broadcast %cst_11 : f32 to vector<8x32xf32>
    %33 = arith.addf %32, %31 : vector<8x32xf32>
    %34 = arith.divf %32, %33 : vector<8x32xf32>
    %35 = arith.mulf %26, %28 : vector<8x32xf32>
    %36 = math.tanh %35 : vector<8x32xf32>
    %37 = arith.mulf %34, %36 : vector<8x32xf32>
    %c0_12 = arith.constant 0 : index
    %c0_13 = arith.constant 0 : index
    %c0_14 = arith.constant 0 : index
    %38 = vector.load %arg10[%c0_12, %c0_13, %c0_14] : memref<4x8x32xf32, #tpu.memory_space<vmem>>, vector<1x8x32xf32>
    %39 = vector.shape_cast %38 : vector<1x8x32xf32> to vector<8x32xf32>
    %40 = vector.shape_cast %37 : vector<8x32xf32> to vector<1x8x32xf32>
    tpu.vector_store %arg10[%c0_12, %c0_13, %c0_14], %40 {strides = array<i32>} : memref<4x8x32xf32, #tpu.memory_space<vmem>>, vector<1x8x32xf32>,
    %c0_15 = arith.constant 0 : index
    %c0_16 = arith.constant 0 : index
    %c0_17 = arith.constant 0 : index
    %41 = vector.load %arg11[%c0_15, %c0_16, %c0_17] : memref<4x8x32xf32, #tpu.memory_space<vmem>>, vector<1x8x32xf32>
    %42 = vector.shape_cast %41 : vector<1x8x32xf32> to vector<8x32xf32>
    %43 = vector.shape_cast %35 : vector<8x32xf32> to vector<1x8x32xf32>
    tpu.vector_store %arg11[%c0_15, %c0_16, %c0_17], %43 {strides = array<i32>} : memref<4x8x32xf32, #tpu.memory_space<vmem>>, vector<1x8x32xf32>,
    %44 = vector.extract_strided_slice %19 {offsets = [0, 128], sizes = [8, 32], strides = [1, 1]} : vector<8x256xf32> to vector<8x32xf32>
    %45 = arith.negf %44 : vector<8x32xf32>
    %46 = math.exp %45 : vector<8x32xf32>
    %cst_18 = arith.constant 1.000000e+00 : f32
    %47 = vector.broadcast %cst_18 : f32 to vector<8x32xf32>
    %48 = arith.addf %47, %46 : vector<8x32xf32>
    %49 = arith.divf %47, %48 : vector<8x32xf32>
    %50 = vector.extract_strided_slice %19 {offsets = [0, 192], sizes = [8, 32], strides = [1, 1]} : vector<8x256xf32> to vector<8x32xf32>
    %51 = math.tanh %50 : vector<8x32xf32>
    %52 = vector.extract_strided_slice %19 {offsets = [0, 224], sizes = [8, 32], strides = [1, 1]} : vector<8x256xf32> to vector<8x32xf32>
    %53 = arith.negf %52 : vector<8x32xf32>
    %54 = math.exp %53 : vector<8x32xf32>
    %cst_19 = arith.constant 1.000000e+00 : f32
    %55 = vector.broadcast %cst_19 : f32 to vector<8x32xf32>
    %56 = arith.addf %55, %54 : vector<8x32xf32>
    %57 = arith.divf %55, %56 : vector<8x32xf32>
    %58 = arith.mulf %49, %51 : vector<8x32xf32>
    %59 = math.tanh %58 : vector<8x32xf32>
    %60 = arith.mulf %57, %59 : vector<8x32xf32>
    %c2 = arith.constant 2 : index
    %c0_20 = arith.constant 0 : index
    %c0_21 = arith.constant 0 : index
    %61 = vector.load %arg10[%c2, %c0_20, %c0_21] : memref<4x8x32xf32, #tpu.memory_space<vmem>>, vector<1x8x32xf32>
    %62 = vector.shape_cast %61 : vector<1x8x32xf32> to vector<8x32xf32>
    %63 = vector.shape_cast %60 : vector<8x32xf32> to vector<1x8x32xf32>
    tpu.vector_store %arg10[%c2, %c0_20, %c0_21], %63 {strides = array<i32>} : memref<4x8x32xf32, #tpu.memory_space<vmem>>, vector<1x8x32xf32>,
    %c2_22 = arith.constant 2 : index
    %c0_23 = arith.constant 0 : index
    %c0_24 = arith.constant 0 : index
    %64 = vector.load %arg11[%c2_22, %c0_23, %c0_24] : memref<4x8x32xf32, #tpu.memory_space<vmem>>, vector<1x8x32xf32>
    %65 = vector.shape_cast %64 : vector<1x8x32xf32> to vector<8x32xf32>
    %66 = vector.shape_cast %58 : vector<8x32xf32> to vector<1x8x32xf32>
    tpu.vector_store %arg11[%c2_22, %c0_23, %c0_24], %66 {strides = array<i32>} : memref<4x8x32xf32, #tpu.memory_space<vmem>>, vector<1x8x32xf32>,
    %67 = tpu.concatenate %37, %60 in 1 : vector<8x32xf32>, vector<8x32xf32> -> vector<8x64xf32>
    %68 = tpu.concatenate %67, %20 in 1 : vector<8x64xf32>, vector<8x64xf32> -> vector<8x128xf32>
    %c0_25 = arith.constant 0 : index
    %c0_26 = arith.constant 0 : index
    %c0_27 = arith.constant 0 : index
    %69 = vector.load %arg3[%c0_25, %c0_26, %c0_27] : memref<1x128x256xf32, #tpu.memory_space<vmem>>, vector<1x128x256xf32>
    %70 = vector.shape_cast %69 : vector<1x128x256xf32> to vector<128x256xf32>
    %cst_28 = arith.constant dense<0.000000e+00> : vector<8x256xf32>
    %71 = tpu.matmul %68, %70, %cst_28 {dimension_numbers = #tpu.dot_dimension_numbers<[1], [0], [0], [1], [0, 0, 1, 1], [], []>} : vector<8x128xf32>, vector<128x256xf32>, vector<8x256xf32> -> vector<8x256xf32>
    %72 = vector.broadcast %18 : vector<1x256xf32> to vector<8x256xf32>
    %73 = arith.addf %71, %72 : vector<8x256xf32>
    %74 = vector.extract_strided_slice %73 {offsets = [0, 0], sizes = [8, 32], strides = [1, 1]} : vector<8x256xf32> to vector<8x32xf32>
    %75 = arith.negf %74 : vector<8x32xf32>
    %76 = math.exp %75 : vector<8x32xf32>
    %cst_29 = arith.constant 1.000000e+00 : f32
    %77 = vector.broadcast %cst_29 : f32 to vector<8x32xf32>
    %78 = arith.addf %77, %76 : vector<8x32xf32>
    %79 = arith.divf %77, %78 : vector<8x32xf32>
    %80 = vector.extract_strided_slice %73 {offsets = [0, 64], sizes = [8, 32], strides = [1, 1]} : vector<8x256xf32> to vector<8x32xf32>
    %81 = math.tanh %80 : vector<8x32xf32>
    %82 = vector.extract_strided_slice %73 {offsets = [0, 96], sizes = [8, 32], strides = [1, 1]} : vector<8x256xf32> to vector<8x32xf32>
    %83 = arith.negf %82 : vector<8x32xf32>
    %84 = math.exp %83 : vector<8x32xf32>
    %cst_30 = arith.constant 1.000000e+00 : f32
    %85 = vector.broadcast %cst_30 : f32 to vector<8x32xf32>
    %86 = arith.addf %85, %84 : vector<8x32xf32>
    %87 = arith.divf %85, %86 : vector<8x32xf32>
    %88 = arith.mulf %79, %81 : vector<8x32xf32>
    %89 = math.tanh %88 : vector<8x32xf32>
    %90 = arith.mulf %87, %89 : vector<8x32xf32>
    %c1_31 = arith.constant 1 : index
    %c0_32 = arith.constant 0 : index
    %c0_33 = arith.constant 0 : index
    %91 = vector.load %arg10[%c1_31, %c0_32, %c0_33] : memref<4x8x32xf32, #tpu.memory_space<vmem>>, vector<1x8x32xf32>
    %92 = vector.shape_cast %91 : vector<1x8x32xf32> to vector<8x32xf32>
    %93 = vector.shape_cast %90 : vector<8x32xf32> to vector<1x8x32xf32>
    tpu.vector_store %arg10[%c1_31, %c0_32, %c0_33], %93 {strides = array<i32>} : memref<4x8x32xf32, #tpu.memory_space<vmem>>, vector<1x8x32xf32>,
    %c1_34 = arith.constant 1 : index
    %c0_35 = arith.constant 0 : index
    %c0_36 = arith.constant 0 : index
    %94 = vector.load %arg11[%c1_34, %c0_35, %c0_36] : memref<4x8x32xf32, #tpu.memory_space<vmem>>, vector<1x8x32xf32>
    %95 = vector.shape_cast %94 : vector<1x8x32xf32> to vector<8x32xf32>
    %96 = vector.shape_cast %88 : vector<8x32xf32> to vector<1x8x32xf32>
    tpu.vector_store %arg11[%c1_34, %c0_35, %c0_36], %96 {strides = array<i32>} : memref<4x8x32xf32, #tpu.memory_space<vmem>>, vector<1x8x32xf32>,
    %97 = vector.extract_strided_slice %73 {offsets = [0, 128], sizes = [8, 32], strides = [1, 1]} : vector<8x256xf32> to vector<8x32xf32>
    %98 = arith.negf %97 : vector<8x32xf32>
    %99 = math.exp %98 : vector<8x32xf32>
    %cst_37 = arith.constant 1.000000e+00 : f32
    %100 = vector.broadcast %cst_37 : f32 to vector<8x32xf32>
    %101 = arith.addf %100, %99 : vector<8x32xf32>
    %102 = arith.divf %100, %101 : vector<8x32xf32>
    %103 = vector.extract_strided_slice %73 {offsets = [0, 192], sizes = [8, 32], strides = [1, 1]} : vector<8x256xf32> to vector<8x32xf32>
    %104 = math.tanh %103 : vector<8x32xf32>
    %105 = vector.extract_strided_slice %73 {offsets = [0, 224], sizes = [8, 32], strides = [1, 1]} : vector<8x256xf32> to vector<8x32xf32>
    %106 = arith.negf %105 : vector<8x32xf32>
    %107 = math.exp %106 : vector<8x32xf32>
    %cst_38 = arith.constant 1.000000e+00 : f32
    %108 = vector.broadcast %cst_38 : f32 to vector<8x32xf32>
    %109 = arith.addf %108, %107 : vector<8x32xf32>
    %110 = arith.divf %108, %109 : vector<8x32xf32>
    %111 = arith.mulf %102, %104 : vector<8x32xf32>
    %112 = math.tanh %111 : vector<8x32xf32>
    %113 = arith.mulf %110, %112 : vector<8x32xf32>
    %c3 = arith.constant 3 : index
    %c0_39 = arith.constant 0 : index
    %c0_40 = arith.constant 0 : index
    %114 = vector.load %arg10[%c3, %c0_39, %c0_40] : memref<4x8x32xf32, #tpu.memory_space<vmem>>, vector<1x8x32xf32>
    %115 = vector.shape_cast %114 : vector<1x8x32xf32> to vector<8x32xf32>
    %116 = vector.shape_cast %113 : vector<8x32xf32> to vector<1x8x32xf32>
    tpu.vector_store %arg10[%c3, %c0_39, %c0_40], %116 {strides = array<i32>} : memref<4x8x32xf32, #tpu.memory_space<vmem>>, vector<1x8x32xf32>,
    %c3_41 = arith.constant 3 : index
    %c0_42 = arith.constant 0 : index
    %c0_43 = arith.constant 0 : index
    %117 = vector.load %arg11[%c3_41, %c0_42, %c0_43] : memref<4x8x32xf32, #tpu.memory_space<vmem>>, vector<1x8x32xf32>
    %118 = vector.shape_cast %117 : vector<1x8x32xf32> to vector<8x32xf32>
    %119 = vector.shape_cast %111 : vector<8x32xf32> to vector<1x8x32xf32>
    tpu.vector_store %arg11[%c3_41, %c0_42, %c0_43], %119 {strides = array<i32>} : memref<4x8x32xf32, #tpu.memory_space<vmem>>, vector<1x8x32xf32>,
    %120 = tpu.concatenate %90, %113 in 1 : vector<8x32xf32>, vector<8x32xf32> -> vector<8x64xf32>
    %c0_44 = arith.constant 0 : index
    %c0_45 = arith.constant 0 : index
    %c0_46 = arith.constant 0 : index
    %121 = vector.load %arg5[%c0_44, %c0_45, %c0_46] : memref<4x1x32xf32, #tpu.memory_space<vmem>>, vector<4x1x32xf32>
    %122 = vector.shape_cast %121 : vector<4x1x32xf32> to vector<4x1x32xf32>
    %123 = vector.broadcast %122 : vector<4x1x32xf32> to vector<4x8x32xf32>
    %c0_47 = arith.constant 0 : index
    %c0_48 = arith.constant 0 : index
    %c0_49 = arith.constant 0 : index
    %124 = vector.load %arg8[%c0_47, %c0_48, %c0_49] : memref<4x1x32xf32, #tpu.memory_space<vmem>>, vector<4x1x32xf32>
    %125 = vector.shape_cast %124 : vector<4x1x32xf32> to vector<4x1x32xf32>
    %126 = vector.broadcast %125 : vector<4x1x32xf32> to vector<4x8x32xf32>
    %c0_50 = arith.constant 0 : index
    %c0_51 = arith.constant 0 : index
    %c0_52 = arith.constant 0 : index
    %127 = vector.load %arg7[%c0_50, %c0_51, %c0_52] : memref<4x1x32xf32, #tpu.memory_space<vmem>>, vector<4x1x32xf32>
    %cst_53 = arith.constant 0.000000e+00 : f32
    %128 = vector.broadcast %cst_53 : f32 to vector<4x1x32xf32>
    %c0_54 = arith.constant 0 : index
    %c0_55 = arith.constant 0 : index
    %c0_56 = arith.constant 0 : index
    %129 = vector.load %arg10[%c0_54, %c0_55, %c0_56] : memref<4x8x32xf32, #tpu.memory_space<vmem>>, vector<4x8x32xf32>
    %c0_57 = arith.constant 0 : index
    %c0_58 = arith.constant 0 : index
    %c0_59 = arith.constant 0 : index
    %130 = vector.load %arg11[%c0_57, %c0_58, %c0_59] : memref<4x8x32xf32, #tpu.memory_space<vmem>>, vector<4x8x32xf32>
    %131 = vector.extract_strided_slice %17 {offsets = [0, 0, 0], sizes = [4, 1, 32], strides = [1, 1, 1]} : vector<4x4x32xf32> to vector<4x1x32xf32>
    %132 = arith.mulf %127, %128 : vector<4x1x32xf32>
    %133 = arith.addf %131, %132 : vector<4x1x32xf32>
    %134 = arith.mulf %123, %129 : vector<4x8x32xf32>
    %135 = vector.broadcast %133 : vector<4x1x32xf32> to vector<4x8x32xf32>
    %136 = arith.addf %134, %135 : vector<4x8x32xf32>
    %137 = math.tanh %136 : vector<4x8x32xf32>
    %138 = arith.mulf %137, %126 : vector<4x8x32xf32>
    %cst_60 = arith.constant dense<0.000000e+00> : vector<4x8xf32>
    %139 = vector.multi_reduction <add>, %138, %cst_60 [2] : vector<4x8x32xf32> to vector<4x8xf32>
    %140 = vector.shape_cast %139 : vector<4x8xf32> to vector<4x8x1xf32>
    %cst_61 = arith.constant dense<0xFF800000> : vector<4x1xf32>
    %141 = vector.multi_reduction <maximumf>, %140, %cst_61 [1] : vector<4x8x1xf32> to vector<4x1xf32>
    %142 = vector.shape_cast %141 : vector<4x1xf32> to vector<4x1x1xf32>
    %143 = vector.broadcast %142 : vector<4x1x1xf32> to vector<4x8x1xf32>
    %144 = arith.subf %140, %143 : vector<4x8x1xf32>
    %145 = math.exp %144 : vector<4x8x1xf32>
    %cst_62 = arith.constant dense<0.000000e+00> : vector<4x1xf32>
    %146 = vector.multi_reduction <add>, %145, %cst_62 [1] : vector<4x8x1xf32> to vector<4x1xf32>
    %147 = vector.shape_cast %146 : vector<4x1xf32> to vector<4x1x1xf32>
    %148 = tpu.reciprocal %147 : vector<4x1x1xf32> -> vector<4x1x1xf32>
    %149 = vector.broadcast %148 : vector<4x1x1xf32> to vector<4x8x1xf32>
    %150 = arith.mulf %145, %149 : vector<4x8x1xf32>
    %151 = vector.broadcast %150 : vector<4x8x1xf32> to vector<4x8x32xf32>
    %152 = arith.mulf %151, %129 : vector<4x8x32xf32>
    %cst_63 = arith.constant dense<0.000000e+00> : vector<4x32xf32>
    %153 = vector.multi_reduction <add>, %152, %cst_63 [1] : vector<4x8x32xf32> to vector<4x32xf32>
    %154 = vector.shape_cast %153 : vector<4x32xf32> to vector<4x1x32xf32>
    %155 = vector.broadcast %150 : vector<4x8x1xf32> to vector<4x8x32xf32>
    %156 = arith.mulf %155, %130 : vector<4x8x32xf32>
    %cst_64 = arith.constant dense<0.000000e+00> : vector<4x32xf32>
    %157 = vector.multi_reduction <add>, %156, %cst_64 [1] : vector<4x8x32xf32> to vector<4x32xf32>
    %158 = vector.shape_cast %157 : vector<4x32xf32> to vector<4x1x32xf32>
    %159 = vector.extract_strided_slice %154 {offsets = [0, 0, 0], sizes = [1, 1, 32], strides = [1, 1, 1]} : vector<4x1x32xf32> to vector<1x1x32xf32>
    %160 = vector.shape_cast %159 : vector<1x1x32xf32> to vector<1x32xf32>
    %161 = vector.extract_strided_slice %154 {offsets = [2, 0, 0], sizes = [1, 1, 32], strides = [1, 1, 1]} : vector<4x1x32xf32> to vector<1x1x32xf32>
    %162 = vector.shape_cast %161 : vector<1x1x32xf32> to vector<1x32xf32>
    %163 = tpu.concatenate %160, %162 in 1 : vector<1x32xf32>, vector<1x32xf32> -> vector<1x64xf32>
    %164 = vector.extract_strided_slice %5 {offsets = [8, 0], sizes = [1, 256], strides = [1, 1]} : vector<12x256xf32> to vector<1x256xf32>
    %c0_65 = arith.constant 0 : index
    %c0_66 = arith.constant 0 : index
    %165 = vector.load %arg2[%c0_65, %c0_66] : memref<64x256xf32, #tpu.memory_space<vmem>>, vector<64x256xf32>
    %cst_67 = arith.constant dense<0.000000e+00> : vector<1x256xf32>
    %166 = tpu.matmul %163, %165, %cst_67 {dimension_numbers = #tpu.dot_dimension_numbers<[1], [0], [0], [1], [0, 0, 1, 1], [], []>} : vector<1x64xf32>, vector<64x256xf32>, vector<1x256xf32> -> vector<1x256xf32>
    %167 = arith.addf %164, %166 : vector<1x256xf32>
    %168 = vector.extract_strided_slice %158 {offsets = [0, 0, 0], sizes = [1, 1, 32], strides = [1, 1, 1]} : vector<4x1x32xf32> to vector<1x1x32xf32>
    %169 = vector.shape_cast %168 : vector<1x1x32xf32> to vector<1x32xf32>
    %170 = vector.extract_strided_slice %167 {offsets = [0, 0], sizes = [1, 32], strides = [1, 1]} : vector<1x256xf32> to vector<1x32xf32>
    %171 = arith.negf %170 : vector<1x32xf32>
    %172 = math.exp %171 : vector<1x32xf32>
    %cst_68 = arith.constant 1.000000e+00 : f32
    %173 = vector.broadcast %cst_68 : f32 to vector<1x32xf32>
    %174 = arith.addf %173, %172 : vector<1x32xf32>
    %175 = arith.divf %173, %174 : vector<1x32xf32>
    %176 = vector.extract_strided_slice %167 {offsets = [0, 64], sizes = [1, 32], strides = [1, 1]} : vector<1x256xf32> to vector<1x32xf32>
    %177 = math.tanh %176 : vector<1x32xf32>
    %178 = vector.extract_strided_slice %167 {offsets = [0, 96], sizes = [1, 32], strides = [1, 1]} : vector<1x256xf32> to vector<1x32xf32>
    %179 = arith.negf %178 : vector<1x32xf32>
    %180 = math.exp %179 : vector<1x32xf32>
    %cst_69 = arith.constant 1.000000e+00 : f32
    %181 = vector.broadcast %cst_69 : f32 to vector<1x32xf32>
    %182 = arith.addf %181, %180 : vector<1x32xf32>
    %183 = arith.divf %181, %182 : vector<1x32xf32>
    %184 = arith.mulf %175, %177 : vector<1x32xf32>
    %185 = vector.extract_strided_slice %167 {offsets = [0, 32], sizes = [1, 32], strides = [1, 1]} : vector<1x256xf32> to vector<1x32xf32>
    %186 = arith.negf %185 : vector<1x32xf32>
    %187 = math.exp %186 : vector<1x32xf32>
    %cst_70 = arith.constant 1.000000e+00 : f32
    %188 = vector.broadcast %cst_70 : f32 to vector<1x32xf32>
    %189 = arith.addf %188, %187 : vector<1x32xf32>
    %190 = arith.divf %188, %189 : vector<1x32xf32>
    %191 = arith.mulf %190, %169 : vector<1x32xf32>
    %192 = arith.addf %184, %191 : vector<1x32xf32>
    %193 = math.tanh %192 : vector<1x32xf32>
    %194 = arith.mulf %183, %193 : vector<1x32xf32>
    %c0_71 = arith.constant 0 : index
    %c0_72 = arith.constant 0 : index
    %c0_73 = arith.constant 0 : index
    %195 = vector.load %arg10[%c0_71, %c0_72, %c0_73] : memref<4x8x32xf32, #tpu.memory_space<vmem>>, vector<1x1x32xf32>
    %196 = vector.shape_cast %195 : vector<1x1x32xf32> to vector<1x32xf32>
    %197 = vector.shape_cast %194 : vector<1x32xf32> to vector<1x1x32xf32>
    tpu.vector_store %arg10[%c0_71, %c0_72, %c0_73], %197 {strides = array<i32>} : memref<4x8x32xf32, #tpu.memory_space<vmem>>, vector<1x1x32xf32>,
    %c0_74 = arith.constant 0 : index
    %c0_75 = arith.constant 0 : index
    %c0_76 = arith.constant 0 : index
    %198 = vector.load %arg11[%c0_74, %c0_75, %c0_76] : memref<4x8x32xf32, #tpu.memory_space<vmem>>, vector<1x1x32xf32>
    %199 = vector.shape_cast %198 : vector<1x1x32xf32> to vector<1x32xf32>
    %200 = vector.shape_cast %192 : vector<1x32xf32> to vector<1x1x32xf32>
    tpu.vector_store %arg11[%c0_74, %c0_75, %c0_76], %200 {strides = array<i32>} : memref<4x8x32xf32, #tpu.memory_space<vmem>>, vector<1x1x32xf32>,
    %201 = vector.extract_strided_slice %158 {offsets = [2, 0, 0], sizes = [1, 1, 32], strides = [1, 1, 1]} : vector<4x1x32xf32> to vector<1x1x32xf32>
    %202 = vector.shape_cast %201 : vector<1x1x32xf32> to vector<1x32xf32>
    %203 = vector.extract_strided_slice %167 {offsets = [0, 128], sizes = [1, 32], strides = [1, 1]} : vector<1x256xf32> to vector<1x32xf32>
    %204 = arith.negf %203 : vector<1x32xf32>
    %205 = math.exp %204 : vector<1x32xf32>
    %cst_77 = arith.constant 1.000000e+00 : f32
    %206 = vector.broadcast %cst_77 : f32 to vector<1x32xf32>
    %207 = arith.addf %206, %205 : vector<1x32xf32>
    %208 = arith.divf %206, %207 : vector<1x32xf32>
    %209 = vector.extract_strided_slice %167 {offsets = [0, 192], sizes = [1, 32], strides = [1, 1]} : vector<1x256xf32> to vector<1x32xf32>
    %210 = math.tanh %209 : vector<1x32xf32>
    %211 = vector.extract_strided_slice %167 {offsets = [0, 224], sizes = [1, 32], strides = [1, 1]} : vector<1x256xf32> to vector<1x32xf32>
    %212 = arith.negf %211 : vector<1x32xf32>
    %213 = math.exp %212 : vector<1x32xf32>
    %cst_78 = arith.constant 1.000000e+00 : f32
    %214 = vector.broadcast %cst_78 : f32 to vector<1x32xf32>
    %215 = arith.addf %214, %213 : vector<1x32xf32>
    %216 = arith.divf %214, %215 : vector<1x32xf32>
    %217 = arith.mulf %208, %210 : vector<1x32xf32>
    %218 = vector.extract_strided_slice %167 {offsets = [0, 160], sizes = [1, 32], strides = [1, 1]} : vector<1x256xf32> to vector<1x32xf32>
    %219 = arith.negf %218 : vector<1x32xf32>
    %220 = math.exp %219 : vector<1x32xf32>
    %cst_79 = arith.constant 1.000000e+00 : f32
    %221 = vector.broadcast %cst_79 : f32 to vector<1x32xf32>
    %222 = arith.addf %221, %220 : vector<1x32xf32>
    %223 = arith.divf %221, %222 : vector<1x32xf32>
    %224 = arith.mulf %223, %202 : vector<1x32xf32>
    %225 = arith.addf %217, %224 : vector<1x32xf32>
    %226 = math.tanh %225 : vector<1x32xf32>
    %227 = arith.mulf %216, %226 : vector<1x32xf32>
    %c2_80 = arith.constant 2 : index
    %c0_81 = arith.constant 0 : index
    %c0_82 = arith.constant 0 : index
    %228 = vector.load %arg10[%c2_80, %c0_81, %c0_82] : memref<4x8x32xf32, #tpu.memory_space<vmem>>, vector<1x1x32xf32>
    %229 = vector.shape_cast %228 : vector<1x1x32xf32> to vector<1x32xf32>
    %230 = vector.shape_cast %227 : vector<1x32xf32> to vector<1x1x32xf32>
    tpu.vector_store %arg10[%c2_80, %c0_81, %c0_82], %230 {strides = array<i32>} : memref<4x8x32xf32, #tpu.memory_space<vmem>>, vector<1x1x32xf32>,
    %c2_83 = arith.constant 2 : index
    %c0_84 = arith.constant 0 : index
    %c0_85 = arith.constant 0 : index
    %231 = vector.load %arg11[%c2_83, %c0_84, %c0_85] : memref<4x8x32xf32, #tpu.memory_space<vmem>>, vector<1x1x32xf32>
    %232 = vector.shape_cast %231 : vector<1x1x32xf32> to vector<1x32xf32>
    %233 = vector.shape_cast %225 : vector<1x32xf32> to vector<1x1x32xf32>
    tpu.vector_store %arg11[%c2_83, %c0_84, %c0_85], %233 {strides = array<i32>} : memref<4x8x32xf32, #tpu.memory_space<vmem>>, vector<1x1x32xf32>,
    %234 = tpu.concatenate %194, %227 in 1 : vector<1x32xf32>, vector<1x32xf32> -> vector<1x64xf32>
    %235 = vector.extract_strided_slice %154 {offsets = [1, 0, 0], sizes = [1, 1, 32], strides = [1, 1, 1]} : vector<4x1x32xf32> to vector<1x1x32xf32>
    %236 = vector.shape_cast %235 : vector<1x1x32xf32> to vector<1x32xf32>
    %237 = vector.extract_strided_slice %154 {offsets = [3, 0, 0], sizes = [1, 1, 32], strides = [1, 1, 1]} : vector<4x1x32xf32> to vector<1x1x32xf32>
    %238 = vector.shape_cast %237 : vector<1x1x32xf32> to vector<1x32xf32>
    %239 = tpu.concatenate %234, %236, %238 in 1 : vector<1x64xf32>, vector<1x32xf32>, vector<1x32xf32> -> vector<1x128xf32>
    %c0_86 = arith.constant 0 : index
    %c0_87 = arith.constant 0 : index
    %c0_88 = arith.constant 0 : index
    %240 = vector.load %arg3[%c0_86, %c0_87, %c0_88] : memref<1x128x256xf32, #tpu.memory_space<vmem>>, vector<1x128x256xf32>
    %241 = vector.shape_cast %240 : vector<1x128x256xf32> to vector<128x256xf32>
    %cst_89 = arith.constant dense<0.000000e+00> : vector<1x256xf32>
    %242 = tpu.matmul %239, %241, %cst_89 {dimension_numbers = #tpu.dot_dimension_numbers<[1], [0], [0], [1], [0, 0, 1, 1], [], []>} : vector<1x128xf32>, vector<128x256xf32>, vector<1x256xf32> -> vector<1x256xf32>
    %243 = arith.addf %242, %18 : vector<1x256xf32>
    %244 = vector.extract_strided_slice %158 {offsets = [1, 0, 0], sizes = [1, 1, 32], strides = [1, 1, 1]} : vector<4x1x32xf32> to vector<1x1x32xf32>
    %245 = vector.shape_cast %244 : vector<1x1x32xf32> to vector<1x32xf32>
    %246 = vector.extract_strided_slice %243 {offsets = [0, 0], sizes = [1, 32], strides = [1, 1]} : vector<1x256xf32> to vector<1x32xf32>
    %247 = arith.negf %246 : vector<1x32xf32>
    %248 = math.exp %247 : vector<1x32xf32>
    %cst_90 = arith.constant 1.000000e+00 : f32
    %249 = vector.broadcast %cst_90 : f32 to vector<1x32xf32>
    %250 = arith.addf %249, %248 : vector<1x32xf32>
    %251 = arith.divf %249, %250 : vector<1x32xf32>
    %252 = vector.extract_strided_slice %243 {offsets = [0, 64], sizes = [1, 32], strides = [1, 1]} : vector<1x256xf32> to vector<1x32xf32>
    %253 = math.tanh %252 : vector<1x32xf32>
    %254 = vector.extract_strided_slice %243 {offsets = [0, 96], sizes = [1, 32], strides = [1, 1]} : vector<1x256xf32> to vector<1x32xf32>
    %255 = arith.negf %254 : vector<1x32xf32>
    %256 = math.exp %255 : vector<1x32xf32>
    %cst_91 = arith.constant 1.000000e+00 : f32
    %257 = vector.broadcast %cst_91 : f32 to vector<1x32xf32>
    %258 = arith.addf %257, %256 : vector<1x32xf32>
    %259 = arith.divf %257, %258 : vector<1x32xf32>
    %260 = arith.mulf %251, %253 : vector<1x32xf32>
    %261 = vector.extract_strided_slice %243 {offsets = [0, 32], sizes = [1, 32], strides = [1, 1]} : vector<1x256xf32> to vector<1x32xf32>
    %262 = arith.negf %261 : vector<1x32xf32>
    %263 = math.exp %262 : vector<1x32xf32>
    %cst_92 = arith.constant 1.000000e+00 : f32
    %264 = vector.broadcast %cst_92 : f32 to vector<1x32xf32>
    %265 = arith.addf %264, %263 : vector<1x32xf32>
    %266 = arith.divf %264, %265 : vector<1x32xf32>
    %267 = arith.mulf %266, %245 : vector<1x32xf32>
    %268 = arith.addf %260, %267 : vector<1x32xf32>
    %269 = math.tanh %268 : vector<1x32xf32>
    %270 = arith.mulf %259, %269 : vector<1x32xf32>
    %c1_93 = arith.constant 1 : index
    %c0_94 = arith.constant 0 : index
    %c0_95 = arith.constant 0 : index
    %271 = vector.load %arg10[%c1_93, %c0_94, %c0_95] : memref<4x8x32xf32, #tpu.memory_space<vmem>>, vector<1x1x32xf32>
    %272 = vector.shape_cast %271 : vector<1x1x32xf32> to vector<1x32xf32>
    %273 = vector.shape_cast %270 : vector<1x32xf32> to vector<1x1x32xf32>
    tpu.vector_store %arg10[%c1_93, %c0_94, %c0_95], %273 {strides = array<i32>} : memref<4x8x32xf32, #tpu.memory_space<vmem>>, vector<1x1x32xf32>,
    %c1_96 = arith.constant 1 : index
    %c0_97 = arith.constant 0 : index
    %c0_98 = arith.constant 0 : index
    %274 = vector.load %arg11[%c1_96, %c0_97, %c0_98] : memref<4x8x32xf32, #tpu.memory_space<vmem>>, vector<1x1x32xf32>
    %275 = vector.shape_cast %274 : vector<1x1x32xf32> to vector<1x32xf32>
    %276 = vector.shape_cast %268 : vector<1x32xf32> to vector<1x1x32xf32>
    tpu.vector_store %arg11[%c1_96, %c0_97, %c0_98], %276 {strides = array<i32>} : memref<4x8x32xf32, #tpu.memory_space<vmem>>, vector<1x1x32xf32>,
    %277 = vector.extract_strided_slice %158 {offsets = [3, 0, 0], sizes = [1, 1, 32], strides = [1, 1, 1]} : vector<4x1x32xf32> to vector<1x1x32xf32>
    %278 = vector.shape_cast %277 : vector<1x1x32xf32> to vector<1x32xf32>
    %279 = vector.extract_strided_slice %243 {offsets = [0, 128], sizes = [1, 32], strides = [1, 1]} : vector<1x256xf32> to vector<1x32xf32>
    %280 = arith.negf %279 : vector<1x32xf32>
    %281 = math.exp %280 : vector<1x32xf32>
    %cst_99 = arith.constant 1.000000e+00 : f32
    %282 = vector.broadcast %cst_99 : f32 to vector<1x32xf32>
    %283 = arith.addf %282, %281 : vector<1x32xf32>
    %284 = arith.divf %282, %283 : vector<1x32xf32>
    %285 = vector.extract_strided_slice %243 {offsets = [0, 192], sizes = [1, 32], strides = [1, 1]} : vector<1x256xf32> to vector<1x32xf32>
    %286 = math.tanh %285 : vector<1x32xf32>
    %287 = vector.extract_strided_slice %243 {offsets = [0, 224], sizes = [1, 32], strides = [1, 1]} : vector<1x256xf32> to vector<1x32xf32>
    %288 = arith.negf %287 : vector<1x32xf32>
    %289 = math.exp %288 : vector<1x32xf32>
    %cst_100 = arith.constant 1.000000e+00 : f32
    %290 = vector.broadcast %cst_100 : f32 to vector<1x32xf32>
    %291 = arith.addf %290, %289 : vector<1x32xf32>
    %292 = arith.divf %290, %291 : vector<1x32xf32>
    %293 = arith.mulf %284, %286 : vector<1x32xf32>
    %294 = vector.extract_strided_slice %243 {offsets = [0, 160], sizes = [1, 32], strides = [1, 1]} : vector<1x256xf32> to vector<1x32xf32>
    %295 = arith.negf %294 : vector<1x32xf32>
    %296 = math.exp %295 : vector<1x32xf32>
    %cst_101 = arith.constant 1.000000e+00 : f32
    %297 = vector.broadcast %cst_101 : f32 to vector<1x32xf32>
    %298 = arith.addf %297, %296 : vector<1x32xf32>
    %299 = arith.divf %297, %298 : vector<1x32xf32>
    %300 = arith.mulf %299, %278 : vector<1x32xf32>
    %301 = arith.addf %293, %300 : vector<1x32xf32>
    %302 = math.tanh %301 : vector<1x32xf32>
    %303 = arith.mulf %292, %302 : vector<1x32xf32>
    %c3_102 = arith.constant 3 : index
    %c0_103 = arith.constant 0 : index
    %c0_104 = arith.constant 0 : index
    %304 = vector.load %arg10[%c3_102, %c0_103, %c0_104] : memref<4x8x32xf32, #tpu.memory_space<vmem>>, vector<1x1x32xf32>
    %305 = vector.shape_cast %304 : vector<1x1x32xf32> to vector<1x32xf32>
    %306 = vector.shape_cast %303 : vector<1x32xf32> to vector<1x1x32xf32>
    tpu.vector_store %arg10[%c3_102, %c0_103, %c0_104], %306 {strides = array<i32>} : memref<4x8x32xf32, #tpu.memory_space<vmem>>, vector<1x1x32xf32>,
    %c3_105 = arith.constant 3 : index
    %c0_106 = arith.constant 0 : index
    %c0_107 = arith.constant 0 : index
    %307 = vector.load %arg11[%c3_105, %c0_106, %c0_107] : memref<4x8x32xf32, #tpu.memory_space<vmem>>, vector<1x1x32xf32>
    %308 = vector.shape_cast %307 : vector<1x1x32xf32> to vector<1x32xf32>
    %309 = vector.shape_cast %301 : vector<1x32xf32> to vector<1x1x32xf32>
    tpu.vector_store %arg11[%c3_105, %c0_106, %c0_107], %309 {strides = array<i32>} : memref<4x8x32xf32, #tpu.memory_space<vmem>>, vector<1x1x32xf32>,
    %310 = tpu.concatenate %270, %303 in 1 : vector<1x32xf32>, vector<1x32xf32> -> vector<1x64xf32>
    %c0_108 = arith.constant 0 : index
    %c0_109 = arith.constant 0 : index
    %c0_110 = arith.constant 0 : index
    %311 = vector.load %arg10[%c0_108, %c0_109, %c0_110] : memref<4x8x32xf32, #tpu.memory_space<vmem>>, vector<4x8x32xf32>
    %c0_111 = arith.constant 0 : index
    %c0_112 = arith.constant 0 : index
    %c0_113 = arith.constant 0 : index
    %312 = vector.load %arg11[%c0_111, %c0_112, %c0_113] : memref<4x8x32xf32, #tpu.memory_space<vmem>>, vector<4x8x32xf32>
    %313 = vector.extract_strided_slice %17 {offsets = [0, 1, 0], sizes = [4, 1, 32], strides = [1, 1, 1]} : vector<4x4x32xf32> to vector<4x1x32xf32>
    %314 = arith.mulf %127, %154 : vector<4x1x32xf32>
    %315 = arith.addf %313, %314 : vector<4x1x32xf32>
    %316 = arith.mulf %123, %311 : vector<4x8x32xf32>
    %317 = vector.broadcast %315 : vector<4x1x32xf32> to vector<4x8x32xf32>
    %318 = arith.addf %316, %317 : vector<4x8x32xf32>
    %319 = math.tanh %318 : vector<4x8x32xf32>
    %320 = arith.mulf %319, %126 : vector<4x8x32xf32>
    %cst_114 = arith.constant dense<0.000000e+00> : vector<4x8xf32>
    %321 = vector.multi_reduction <add>, %320, %cst_114 [2] : vector<4x8x32xf32> to vector<4x8xf32>
    %322 = vector.shape_cast %321 : vector<4x8xf32> to vector<4x8x1xf32>
    %cst_115 = arith.constant dense<0xFF800000> : vector<4x1xf32>
    %323 = vector.multi_reduction <maximumf>, %322, %cst_115 [1] : vector<4x8x1xf32> to vector<4x1xf32>
    %324 = vector.shape_cast %323 : vector<4x1xf32> to vector<4x1x1xf32>
    %325 = vector.broadcast %324 : vector<4x1x1xf32> to vector<4x8x1xf32>
    %326 = arith.subf %322, %325 : vector<4x8x1xf32>
    %327 = math.exp %326 : vector<4x8x1xf32>
    %cst_116 = arith.constant dense<0.000000e+00> : vector<4x1xf32>
    %328 = vector.multi_reduction <add>, %327, %cst_116 [1] : vector<4x8x1xf32> to vector<4x1xf32>
    %329 = vector.shape_cast %328 : vector<4x1xf32> to vector<4x1x1xf32>
    %330 = tpu.reciprocal %329 : vector<4x1x1xf32> -> vector<4x1x1xf32>
    %331 = vector.broadcast %330 : vector<4x1x1xf32> to vector<4x8x1xf32>
    %332 = arith.mulf %327, %331 : vector<4x8x1xf32>
    %333 = vector.broadcast %332 : vector<4x8x1xf32> to vector<4x8x32xf32>
    %334 = arith.mulf %333, %311 : vector<4x8x32xf32>
    %cst_117 = arith.constant dense<0.000000e+00> : vector<4x32xf32>
    %335 = vector.multi_reduction <add>, %334, %cst_117 [1] : vector<4x8x32xf32> to vector<4x32xf32>
    %336 = vector.shape_cast %335 : vector<4x32xf32> to vector<4x1x32xf32>
    %337 = vector.broadcast %332 : vector<4x8x1xf32> to vector<4x8x32xf32>
    %338 = arith.mulf %337, %312 : vector<4x8x32xf32>
    %cst_118 = arith.constant dense<0.000000e+00> : vector<4x32xf32>
    %339 = vector.multi_reduction <add>, %338, %cst_118 [1] : vector<4x8x32xf32> to vector<4x32xf32>
    %340 = vector.shape_cast %339 : vector<4x32xf32> to vector<4x1x32xf32>
    %341 = vector.extract_strided_slice %336 {offsets = [0, 0, 0], sizes = [1, 1, 32], strides = [1, 1, 1]} : vector<4x1x32xf32> to vector<1x1x32xf32>
    %342 = vector.shape_cast %341 : vector<1x1x32xf32> to vector<1x32xf32>
    %343 = vector.extract_strided_slice %336 {offsets = [2, 0, 0], sizes = [1, 1, 32], strides = [1, 1, 1]} : vector<4x1x32xf32> to vector<1x1x32xf32>
    %344 = vector.shape_cast %343 : vector<1x1x32xf32> to vector<1x32xf32>
    %345 = tpu.concatenate %342, %344 in 1 : vector<1x32xf32>, vector<1x32xf32> -> vector<1x64xf32>
    %346 = vector.extract_strided_slice %5 {offsets = [9, 0], sizes = [1, 256], strides = [1, 1]} : vector<12x256xf32> to vector<1x256xf32>
    %c0_119 = arith.constant 0 : index
    %c0_120 = arith.constant 0 : index
    %347 = vector.load %arg2[%c0_119, %c0_120] : memref<64x256xf32, #tpu.memory_space<vmem>>, vector<64x256xf32>
    %cst_121 = arith.constant dense<0.000000e+00> : vector<1x256xf32>
    %348 = tpu.matmul %345, %347, %cst_121 {dimension_numbers = #tpu.dot_dimension_numbers<[1], [0], [0], [1], [0, 0, 1, 1], [], []>} : vector<1x64xf32>, vector<64x256xf32>, vector<1x256xf32> -> vector<1x256xf32>
    %349 = arith.addf %346, %348 : vector<1x256xf32>
    %350 = vector.extract_strided_slice %340 {offsets = [0, 0, 0], sizes = [1, 1, 32], strides = [1, 1, 1]} : vector<4x1x32xf32> to vector<1x1x32xf32>
    %351 = vector.shape_cast %350 : vector<1x1x32xf32> to vector<1x32xf32>
    %352 = vector.extract_strided_slice %349 {offsets = [0, 0], sizes = [1, 32], strides = [1, 1]} : vector<1x256xf32> to vector<1x32xf32>
    %353 = arith.negf %352 : vector<1x32xf32>
    %354 = math.exp %353 : vector<1x32xf32>
    %cst_122 = arith.constant 1.000000e+00 : f32
    %355 = vector.broadcast %cst_122 : f32 to vector<1x32xf32>
    %356 = arith.addf %355, %354 : vector<1x32xf32>
    %357 = arith.divf %355, %356 : vector<1x32xf32>
    %358 = vector.extract_strided_slice %349 {offsets = [0, 64], sizes = [1, 32], strides = [1, 1]} : vector<1x256xf32> to vector<1x32xf32>
    %359 = math.tanh %358 : vector<1x32xf32>
    %360 = vector.extract_strided_slice %349 {offsets = [0, 96], sizes = [1, 32], strides = [1, 1]} : vector<1x256xf32> to vector<1x32xf32>
    %361 = arith.negf %360 : vector<1x32xf32>
    %362 = math.exp %361 : vector<1x32xf32>
    %cst_123 = arith.constant 1.000000e+00 : f32
    %363 = vector.broadcast %cst_123 : f32 to vector<1x32xf32>
    %364 = arith.addf %363, %362 : vector<1x32xf32>
    %365 = arith.divf %363, %364 : vector<1x32xf32>
    %366 = arith.mulf %357, %359 : vector<1x32xf32>
    %367 = vector.extract_strided_slice %349 {offsets = [0, 32], sizes = [1, 32], strides = [1, 1]} : vector<1x256xf32> to vector<1x32xf32>
    %368 = arith.negf %367 : vector<1x32xf32>
    %369 = math.exp %368 : vector<1x32xf32>
    %cst_124 = arith.constant 1.000000e+00 : f32
    %370 = vector.broadcast %cst_124 : f32 to vector<1x32xf32>
    %371 = arith.addf %370, %369 : vector<1x32xf32>
    %372 = arith.divf %370, %371 : vector<1x32xf32>
    %373 = arith.mulf %372, %351 : vector<1x32xf32>
    %374 = arith.addf %366, %373 : vector<1x32xf32>
    %375 = math.tanh %374 : vector<1x32xf32>
    %376 = arith.mulf %365, %375 : vector<1x32xf32>
    %c0_125 = arith.constant 0 : index
    %c1_126 = arith.constant 1 : index
    %c0_127 = arith.constant 0 : index
    %377 = vector.load %arg10[%c0_125, %c1_126, %c0_127] : memref<4x8x32xf32, #tpu.memory_space<vmem>>, vector<1x1x32xf32>
    %378 = vector.shape_cast %377 : vector<1x1x32xf32> to vector<1x32xf32>
    %379 = vector.shape_cast %376 : vector<1x32xf32> to vector<1x1x32xf32>
    tpu.vector_store %arg10[%c0_125, %c1_126, %c0_127], %379 {strides = array<i32>} : memref<4x8x32xf32, #tpu.memory_space<vmem>>, vector<1x1x32xf32>,
    %c0_128 = arith.constant 0 : index
    %c1_129 = arith.constant 1 : index
    %c0_130 = arith.constant 0 : index
    %380 = vector.load %arg11[%c0_128, %c1_129, %c0_130] : memref<4x8x32xf32, #tpu.memory_space<vmem>>, vector<1x1x32xf32>
    %381 = vector.shape_cast %380 : vector<1x1x32xf32> to vector<1x32xf32>
    %382 = vector.shape_cast %374 : vector<1x32xf32> to vector<1x1x32xf32>
    tpu.vector_store %arg11[%c0_128, %c1_129, %c0_130], %382 {strides = array<i32>} : memref<4x8x32xf32, #tpu.memory_space<vmem>>, vector<1x1x32xf32>,
    %383 = vector.extract_strided_slice %340 {offsets = [2, 0, 0], sizes = [1, 1, 32], strides = [1, 1, 1]} : vector<4x1x32xf32> to vector<1x1x32xf32>
    %384 = vector.shape_cast %383 : vector<1x1x32xf32> to vector<1x32xf32>
    %385 = vector.extract_strided_slice %349 {offsets = [0, 128], sizes = [1, 32], strides = [1, 1]} : vector<1x256xf32> to vector<1x32xf32>
    %386 = arith.negf %385 : vector<1x32xf32>
    %387 = math.exp %386 : vector<1x32xf32>
    %cst_131 = arith.constant 1.000000e+00 : f32
    %388 = vector.broadcast %cst_131 : f32 to vector<1x32xf32>
    %389 = arith.addf %388, %387 : vector<1x32xf32>
    %390 = arith.divf %388, %389 : vector<1x32xf32>
    %391 = vector.extract_strided_slice %349 {offsets = [0, 192], sizes = [1, 32], strides = [1, 1]} : vector<1x256xf32> to vector<1x32xf32>
    %392 = math.tanh %391 : vector<1x32xf32>
    %393 = vector.extract_strided_slice %349 {offsets = [0, 224], sizes = [1, 32], strides = [1, 1]} : vector<1x256xf32> to vector<1x32xf32>
    %394 = arith.negf %393 : vector<1x32xf32>
    %395 = math.exp %394 : vector<1x32xf32>
    %cst_132 = arith.constant 1.000000e+00 : f32
    %396 = vector.broadcast %cst_132 : f32 to vector<1x32xf32>
    %397 = arith.addf %396, %395 : vector<1x32xf32>
    %398 = arith.divf %396, %397 : vector<1x32xf32>
    %399 = arith.mulf %390, %392 : vector<1x32xf32>
    %400 = vector.extract_strided_slice %349 {offsets = [0, 160], sizes = [1, 32], strides = [1, 1]} : vector<1x256xf32> to vector<1x32xf32>
    %401 = arith.negf %400 : vector<1x32xf32>
    %402 = math.exp %401 : vector<1x32xf32>
    %cst_133 = arith.constant 1.000000e+00 : f32
    %403 = vector.broadcast %cst_133 : f32 to vector<1x32xf32>
    %404 = arith.addf %403, %402 : vector<1x32xf32>
    %405 = arith.divf %403, %404 : vector<1x32xf32>
    %406 = arith.mulf %405, %384 : vector<1x32xf32>
    %407 = arith.addf %399, %406 : vector<1x32xf32>
    %408 = math.tanh %407 : vector<1x32xf32>
    %409 = arith.mulf %398, %408 : vector<1x32xf32>
    %c2_134 = arith.constant 2 : index
    %c1_135 = arith.constant 1 : index
    %c0_136 = arith.constant 0 : index
    %410 = vector.load %arg10[%c2_134, %c1_135, %c0_136] : memref<4x8x32xf32, #tpu.memory_space<vmem>>, vector<1x1x32xf32>
    %411 = vector.shape_cast %410 : vector<1x1x32xf32> to vector<1x32xf32>
    %412 = vector.shape_cast %409 : vector<1x32xf32> to vector<1x1x32xf32>
    tpu.vector_store %arg10[%c2_134, %c1_135, %c0_136], %412 {strides = array<i32>} : memref<4x8x32xf32, #tpu.memory_space<vmem>>, vector<1x1x32xf32>,
    %c2_137 = arith.constant 2 : index
    %c1_138 = arith.constant 1 : index
    %c0_139 = arith.constant 0 : index
    %413 = vector.load %arg11[%c2_137, %c1_138, %c0_139] : memref<4x8x32xf32, #tpu.memory_space<vmem>>, vector<1x1x32xf32>
    %414 = vector.shape_cast %413 : vector<1x1x32xf32> to vector<1x32xf32>
    %415 = vector.shape_cast %407 : vector<1x32xf32> to vector<1x1x32xf32>
    tpu.vector_store %arg11[%c2_137, %c1_138, %c0_139], %415 {strides = array<i32>} : memref<4x8x32xf32, #tpu.memory_space<vmem>>, vector<1x1x32xf32>,
    %416 = tpu.concatenate %376, %409 in 1 : vector<1x32xf32>, vector<1x32xf32> -> vector<1x64xf32>
    %417 = vector.extract_strided_slice %336 {offsets = [1, 0, 0], sizes = [1, 1, 32], strides = [1, 1, 1]} : vector<4x1x32xf32> to vector<1x1x32xf32>
    %418 = vector.shape_cast %417 : vector<1x1x32xf32> to vector<1x32xf32>
    %419 = vector.extract_strided_slice %336 {offsets = [3, 0, 0], sizes = [1, 1, 32], strides = [1, 1, 1]} : vector<4x1x32xf32> to vector<1x1x32xf32>
    %420 = vector.shape_cast %419 : vector<1x1x32xf32> to vector<1x32xf32>
    %421 = tpu.concatenate %416, %418, %420 in 1 : vector<1x64xf32>, vector<1x32xf32>, vector<1x32xf32> -> vector<1x128xf32>
    %c0_140 = arith.constant 0 : index
    %c0_141 = arith.constant 0 : index
    %c0_142 = arith.constant 0 : index
    %422 = vector.load %arg3[%c0_140, %c0_141, %c0_142] : memref<1x128x256xf32, #tpu.memory_space<vmem>>, vector<1x128x256xf32>
    %423 = vector.shape_cast %422 : vector<1x128x256xf32> to vector<128x256xf32>
    %cst_143 = arith.constant dense<0.000000e+00> : vector<1x256xf32>
    %424 = tpu.matmul %421, %423, %cst_143 {dimension_numbers = #tpu.dot_dimension_numbers<[1], [0], [0], [1], [0, 0, 1, 1], [], []>} : vector<1x128xf32>, vector<128x256xf32>, vector<1x256xf32> -> vector<1x256xf32>
    %425 = arith.addf %424, %18 : vector<1x256xf32>
    %426 = vector.extract_strided_slice %340 {offsets = [1, 0, 0], sizes = [1, 1, 32], strides = [1, 1, 1]} : vector<4x1x32xf32> to vector<1x1x32xf32>
    %427 = vector.shape_cast %426 : vector<1x1x32xf32> to vector<1x32xf32>
    %428 = vector.extract_strided_slice %425 {offsets = [0, 0], sizes = [1, 32], strides = [1, 1]} : vector<1x256xf32> to vector<1x32xf32>
    %429 = arith.negf %428 : vector<1x32xf32>
    %430 = math.exp %429 : vector<1x32xf32>
    %cst_144 = arith.constant 1.000000e+00 : f32
    %431 = vector.broadcast %cst_144 : f32 to vector<1x32xf32>
    %432 = arith.addf %431, %430 : vector<1x32xf32>
    %433 = arith.divf %431, %432 : vector<1x32xf32>
    %434 = vector.extract_strided_slice %425 {offsets = [0, 64], sizes = [1, 32], strides = [1, 1]} : vector<1x256xf32> to vector<1x32xf32>
    %435 = math.tanh %434 : vector<1x32xf32>
    %436 = vector.extract_strided_slice %425 {offsets = [0, 96], sizes = [1, 32], strides = [1, 1]} : vector<1x256xf32> to vector<1x32xf32>
    %437 = arith.negf %436 : vector<1x32xf32>
    %438 = math.exp %437 : vector<1x32xf32>
    %cst_145 = arith.constant 1.000000e+00 : f32
    %439 = vector.broadcast %cst_145 : f32 to vector<1x32xf32>
    %440 = arith.addf %439, %438 : vector<1x32xf32>
    %441 = arith.divf %439, %440 : vector<1x32xf32>
    %442 = arith.mulf %433, %435 : vector<1x32xf32>
    %443 = vector.extract_strided_slice %425 {offsets = [0, 32], sizes = [1, 32], strides = [1, 1]} : vector<1x256xf32> to vector<1x32xf32>
    %444 = arith.negf %443 : vector<1x32xf32>
    %445 = math.exp %444 : vector<1x32xf32>
    %cst_146 = arith.constant 1.000000e+00 : f32
    %446 = vector.broadcast %cst_146 : f32 to vector<1x32xf32>
    %447 = arith.addf %446, %445 : vector<1x32xf32>
    %448 = arith.divf %446, %447 : vector<1x32xf32>
    %449 = arith.mulf %448, %427 : vector<1x32xf32>
    %450 = arith.addf %442, %449 : vector<1x32xf32>
    %451 = math.tanh %450 : vector<1x32xf32>
    %452 = arith.mulf %441, %451 : vector<1x32xf32>
    %c1_147 = arith.constant 1 : index
    %c1_148 = arith.constant 1 : index
    %c0_149 = arith.constant 0 : index
    %453 = vector.load %arg10[%c1_147, %c1_148, %c0_149] : memref<4x8x32xf32, #tpu.memory_space<vmem>>, vector<1x1x32xf32>
    %454 = vector.shape_cast %453 : vector<1x1x32xf32> to vector<1x32xf32>
    %455 = vector.shape_cast %452 : vector<1x32xf32> to vector<1x1x32xf32>
    tpu.vector_store %arg10[%c1_147, %c1_148, %c0_149], %455 {strides = array<i32>} : memref<4x8x32xf32, #tpu.memory_space<vmem>>, vector<1x1x32xf32>,
    %c1_150 = arith.constant 1 : index
    %c1_151 = arith.constant 1 : index
    %c0_152 = arith.constant 0 : index
    %456 = vector.load %arg11[%c1_150, %c1_151, %c0_152] : memref<4x8x32xf32, #tpu.memory_space<vmem>>, vector<1x1x32xf32>
    %457 = vector.shape_cast %456 : vector<1x1x32xf32> to vector<1x32xf32>
    %458 = vector.shape_cast %450 : vector<1x32xf32> to vector<1x1x32xf32>
    tpu.vector_store %arg11[%c1_150, %c1_151, %c0_152], %458 {strides = array<i32>} : memref<4x8x32xf32, #tpu.memory_space<vmem>>, vector<1x1x32xf32>,
    %459 = vector.extract_strided_slice %340 {offsets = [3, 0, 0], sizes = [1, 1, 32], strides = [1, 1, 1]} : vector<4x1x32xf32> to vector<1x1x32xf32>
    %460 = vector.shape_cast %459 : vector<1x1x32xf32> to vector<1x32xf32>
    %461 = vector.extract_strided_slice %425 {offsets = [0, 128], sizes = [1, 32], strides = [1, 1]} : vector<1x256xf32> to vector<1x32xf32>
    %462 = arith.negf %461 : vector<1x32xf32>
    %463 = math.exp %462 : vector<1x32xf32>
    %cst_153 = arith.constant 1.000000e+00 : f32
    %464 = vector.broadcast %cst_153 : f32 to vector<1x32xf32>
    %465 = arith.addf %464, %463 : vector<1x32xf32>
    %466 = arith.divf %464, %465 : vector<1x32xf32>
    %467 = vector.extract_strided_slice %425 {offsets = [0, 192], sizes = [1, 32], strides = [1, 1]} : vector<1x256xf32> to vector<1x32xf32>
    %468 = math.tanh %467 : vector<1x32xf32>
    %469 = vector.extract_strided_slice %425 {offsets = [0, 224], sizes = [1, 32], strides = [1, 1]} : vector<1x256xf32> to vector<1x32xf32>
    %470 = arith.negf %469 : vector<1x32xf32>
    %471 = math.exp %470 : vector<1x32xf32>
    %cst_154 = arith.constant 1.000000e+00 : f32
    %472 = vector.broadcast %cst_154 : f32 to vector<1x32xf32>
    %473 = arith.addf %472, %471 : vector<1x32xf32>
    %474 = arith.divf %472, %473 : vector<1x32xf32>
    %475 = arith.mulf %466, %468 : vector<1x32xf32>
    %476 = vector.extract_strided_slice %425 {offsets = [0, 160], sizes = [1, 32], strides = [1, 1]} : vector<1x256xf32> to vector<1x32xf32>
    %477 = arith.negf %476 : vector<1x32xf32>
    %478 = math.exp %477 : vector<1x32xf32>
    %cst_155 = arith.constant 1.000000e+00 : f32
    %479 = vector.broadcast %cst_155 : f32 to vector<1x32xf32>
    %480 = arith.addf %479, %478 : vector<1x32xf32>
    %481 = arith.divf %479, %480 : vector<1x32xf32>
    %482 = arith.mulf %481, %460 : vector<1x32xf32>
    %483 = arith.addf %475, %482 : vector<1x32xf32>
    %484 = math.tanh %483 : vector<1x32xf32>
    %485 = arith.mulf %474, %484 : vector<1x32xf32>
    %c3_156 = arith.constant 3 : index
    %c1_157 = arith.constant 1 : index
    %c0_158 = arith.constant 0 : index
    %486 = vector.load %arg10[%c3_156, %c1_157, %c0_158] : memref<4x8x32xf32, #tpu.memory_space<vmem>>, vector<1x1x32xf32>
    %487 = vector.shape_cast %486 : vector<1x1x32xf32> to vector<1x32xf32>
    %488 = vector.shape_cast %485 : vector<1x32xf32> to vector<1x1x32xf32>
    tpu.vector_store %arg10[%c3_156, %c1_157, %c0_158], %488 {strides = array<i32>} : memref<4x8x32xf32, #tpu.memory_space<vmem>>, vector<1x1x32xf32>,
    %c3_159 = arith.constant 3 : index
    %c1_160 = arith.constant 1 : index
    %c0_161 = arith.constant 0 : index
    %489 = vector.load %arg11[%c3_159, %c1_160, %c0_161] : memref<4x8x32xf32, #tpu.memory_space<vmem>>, vector<1x1x32xf32>
    %490 = vector.shape_cast %489 : vector<1x1x32xf32> to vector<1x32xf32>
    %491 = vector.shape_cast %483 : vector<1x32xf32> to vector<1x1x32xf32>
    tpu.vector_store %arg11[%c3_159, %c1_160, %c0_161], %491 {strides = array<i32>} : memref<4x8x32xf32, #tpu.memory_space<vmem>>, vector<1x1x32xf32>,
    %492 = tpu.concatenate %452, %485 in 1 : vector<1x32xf32>, vector<1x32xf32> -> vector<1x64xf32>
    %c0_162 = arith.constant 0 : index
    %c0_163 = arith.constant 0 : index
    %c0_164 = arith.constant 0 : index
    %493 = vector.load %arg10[%c0_162, %c0_163, %c0_164] : memref<4x8x32xf32, #tpu.memory_space<vmem>>, vector<4x8x32xf32>
    %c0_165 = arith.constant 0 : index
    %c0_166 = arith.constant 0 : index
    %c0_167 = arith.constant 0 : index
    %494 = vector.load %arg11[%c0_165, %c0_166, %c0_167] : memref<4x8x32xf32, #tpu.memory_space<vmem>>, vector<4x8x32xf32>
    %495 = vector.extract_strided_slice %17 {offsets = [0, 2, 0], sizes = [4, 1, 32], strides = [1, 1, 1]} : vector<4x4x32xf32> to vector<4x1x32xf32>
    %496 = arith.mulf %127, %336 : vector<4x1x32xf32>
    %497 = arith.addf %495, %496 : vector<4x1x32xf32>
    %498 = arith.mulf %123, %493 : vector<4x8x32xf32>
    %499 = vector.broadcast %497 : vector<4x1x32xf32> to vector<4x8x32xf32>
    %500 = arith.addf %498, %499 : vector<4x8x32xf32>
    %501 = math.tanh %500 : vector<4x8x32xf32>
    %502 = arith.mulf %501, %126 : vector<4x8x32xf32>
    %cst_168 = arith.constant dense<0.000000e+00> : vector<4x8xf32>
    %503 = vector.multi_reduction <add>, %502, %cst_168 [2] : vector<4x8x32xf32> to vector<4x8xf32>
    %504 = vector.shape_cast %503 : vector<4x8xf32> to vector<4x8x1xf32>
    %cst_169 = arith.constant dense<0xFF800000> : vector<4x1xf32>
    %505 = vector.multi_reduction <maximumf>, %504, %cst_169 [1] : vector<4x8x1xf32> to vector<4x1xf32>
    %506 = vector.shape_cast %505 : vector<4x1xf32> to vector<4x1x1xf32>
    %507 = vector.broadcast %506 : vector<4x1x1xf32> to vector<4x8x1xf32>
    %508 = arith.subf %504, %507 : vector<4x8x1xf32>
    %509 = math.exp %508 : vector<4x8x1xf32>
    %cst_170 = arith.constant dense<0.000000e+00> : vector<4x1xf32>
    %510 = vector.multi_reduction <add>, %509, %cst_170 [1] : vector<4x8x1xf32> to vector<4x1xf32>
    %511 = vector.shape_cast %510 : vector<4x1xf32> to vector<4x1x1xf32>
    %512 = tpu.reciprocal %511 : vector<4x1x1xf32> -> vector<4x1x1xf32>
    %513 = vector.broadcast %512 : vector<4x1x1xf32> to vector<4x8x1xf32>
    %514 = arith.mulf %509, %513 : vector<4x8x1xf32>
    %515 = vector.broadcast %514 : vector<4x8x1xf32> to vector<4x8x32xf32>
    %516 = arith.mulf %515, %493 : vector<4x8x32xf32>
    %cst_171 = arith.constant dense<0.000000e+00> : vector<4x32xf32>
    %517 = vector.multi_reduction <add>, %516, %cst_171 [1] : vector<4x8x32xf32> to vector<4x32xf32>
    %518 = vector.shape_cast %517 : vector<4x32xf32> to vector<4x1x32xf32>
    %519 = vector.broadcast %514 : vector<4x8x1xf32> to vector<4x8x32xf32>
    %520 = arith.mulf %519, %494 : vector<4x8x32xf32>
    %cst_172 = arith.constant dense<0.000000e+00> : vector<4x32xf32>
    %521 = vector.multi_reduction <add>, %520, %cst_172 [1] : vector<4x8x32xf32> to vector<4x32xf32>
    %522 = vector.shape_cast %521 : vector<4x32xf32> to vector<4x1x32xf32>
    %523 = vector.extract_strided_slice %518 {offsets = [0, 0, 0], sizes = [1, 1, 32], strides = [1, 1, 1]} : vector<4x1x32xf32> to vector<1x1x32xf32>
    %524 = vector.shape_cast %523 : vector<1x1x32xf32> to vector<1x32xf32>
    %525 = vector.extract_strided_slice %518 {offsets = [2, 0, 0], sizes = [1, 1, 32], strides = [1, 1, 1]} : vector<4x1x32xf32> to vector<1x1x32xf32>
    %526 = vector.shape_cast %525 : vector<1x1x32xf32> to vector<1x32xf32>
    %527 = tpu.concatenate %524, %526 in 1 : vector<1x32xf32>, vector<1x32xf32> -> vector<1x64xf32>
    %528 = vector.extract_strided_slice %5 {offsets = [10, 0], sizes = [1, 256], strides = [1, 1]} : vector<12x256xf32> to vector<1x256xf32>
    %c0_173 = arith.constant 0 : index
    %c0_174 = arith.constant 0 : index
    %529 = vector.load %arg2[%c0_173, %c0_174] : memref<64x256xf32, #tpu.memory_space<vmem>>, vector<64x256xf32>
    %cst_175 = arith.constant dense<0.000000e+00> : vector<1x256xf32>
    %530 = tpu.matmul %527, %529, %cst_175 {dimension_numbers = #tpu.dot_dimension_numbers<[1], [0], [0], [1], [0, 0, 1, 1], [], []>} : vector<1x64xf32>, vector<64x256xf32>, vector<1x256xf32> -> vector<1x256xf32>
    %531 = arith.addf %528, %530 : vector<1x256xf32>
    %532 = vector.extract_strided_slice %522 {offsets = [0, 0, 0], sizes = [1, 1, 32], strides = [1, 1, 1]} : vector<4x1x32xf32> to vector<1x1x32xf32>
    %533 = vector.shape_cast %532 : vector<1x1x32xf32> to vector<1x32xf32>
    %534 = vector.extract_strided_slice %531 {offsets = [0, 0], sizes = [1, 32], strides = [1, 1]} : vector<1x256xf32> to vector<1x32xf32>
    %535 = arith.negf %534 : vector<1x32xf32>
    %536 = math.exp %535 : vector<1x32xf32>
    %cst_176 = arith.constant 1.000000e+00 : f32
    %537 = vector.broadcast %cst_176 : f32 to vector<1x32xf32>
    %538 = arith.addf %537, %536 : vector<1x32xf32>
    %539 = arith.divf %537, %538 : vector<1x32xf32>
    %540 = vector.extract_strided_slice %531 {offsets = [0, 64], sizes = [1, 32], strides = [1, 1]} : vector<1x256xf32> to vector<1x32xf32>
    %541 = math.tanh %540 : vector<1x32xf32>
    %542 = vector.extract_strided_slice %531 {offsets = [0, 96], sizes = [1, 32], strides = [1, 1]} : vector<1x256xf32> to vector<1x32xf32>
    %543 = arith.negf %542 : vector<1x32xf32>
    %544 = math.exp %543 : vector<1x32xf32>
    %cst_177 = arith.constant 1.000000e+00 : f32
    %545 = vector.broadcast %cst_177 : f32 to vector<1x32xf32>
    %546 = arith.addf %545, %544 : vector<1x32xf32>
    %547 = arith.divf %545, %546 : vector<1x32xf32>
    %548 = arith.mulf %539, %541 : vector<1x32xf32>
    %549 = vector.extract_strided_slice %531 {offsets = [0, 32], sizes = [1, 32], strides = [1, 1]} : vector<1x256xf32> to vector<1x32xf32>
    %550 = arith.negf %549 : vector<1x32xf32>
    %551 = math.exp %550 : vector<1x32xf32>
    %cst_178 = arith.constant 1.000000e+00 : f32
    %552 = vector.broadcast %cst_178 : f32 to vector<1x32xf32>
    %553 = arith.addf %552, %551 : vector<1x32xf32>
    %554 = arith.divf %552, %553 : vector<1x32xf32>
    %555 = arith.mulf %554, %533 : vector<1x32xf32>
    %556 = arith.addf %548, %555 : vector<1x32xf32>
    %557 = math.tanh %556 : vector<1x32xf32>
    %558 = arith.mulf %547, %557 : vector<1x32xf32>
    %c0_179 = arith.constant 0 : index
    %c2_180 = arith.constant 2 : index
    %c0_181 = arith.constant 0 : index
    %559 = vector.load %arg10[%c0_179, %c2_180, %c0_181] : memref<4x8x32xf32, #tpu.memory_space<vmem>>, vector<1x1x32xf32>
    %560 = vector.shape_cast %559 : vector<1x1x32xf32> to vector<1x32xf32>
    %561 = vector.shape_cast %558 : vector<1x32xf32> to vector<1x1x32xf32>
    tpu.vector_store %arg10[%c0_179, %c2_180, %c0_181], %561 {strides = array<i32>} : memref<4x8x32xf32, #tpu.memory_space<vmem>>, vector<1x1x32xf32>,
    %c0_182 = arith.constant 0 : index
    %c2_183 = arith.constant 2 : index
    %c0_184 = arith.constant 0 : index
    %562 = vector.load %arg11[%c0_182, %c2_183, %c0_184] : memref<4x8x32xf32, #tpu.memory_space<vmem>>, vector<1x1x32xf32>
    %563 = vector.shape_cast %562 : vector<1x1x32xf32> to vector<1x32xf32>
    %564 = vector.shape_cast %556 : vector<1x32xf32> to vector<1x1x32xf32>
    tpu.vector_store %arg11[%c0_182, %c2_183, %c0_184], %564 {strides = array<i32>} : memref<4x8x32xf32, #tpu.memory_space<vmem>>, vector<1x1x32xf32>,
    %565 = vector.extract_strided_slice %522 {offsets = [2, 0, 0], sizes = [1, 1, 32], strides = [1, 1, 1]} : vector<4x1x32xf32> to vector<1x1x32xf32>
    %566 = vector.shape_cast %565 : vector<1x1x32xf32> to vector<1x32xf32>
    %567 = vector.extract_strided_slice %531 {offsets = [0, 128], sizes = [1, 32], strides = [1, 1]} : vector<1x256xf32> to vector<1x32xf32>
    %568 = arith.negf %567 : vector<1x32xf32>
    %569 = math.exp %568 : vector<1x32xf32>
    %cst_185 = arith.constant 1.000000e+00 : f32
    %570 = vector.broadcast %cst_185 : f32 to vector<1x32xf32>
    %571 = arith.addf %570, %569 : vector<1x32xf32>
    %572 = arith.divf %570, %571 : vector<1x32xf32>
    %573 = vector.extract_strided_slice %531 {offsets = [0, 192], sizes = [1, 32], strides = [1, 1]} : vector<1x256xf32> to vector<1x32xf32>
    %574 = math.tanh %573 : vector<1x32xf32>
    %575 = vector.extract_strided_slice %531 {offsets = [0, 224], sizes = [1, 32], strides = [1, 1]} : vector<1x256xf32> to vector<1x32xf32>
    %576 = arith.negf %575 : vector<1x32xf32>
    %577 = math.exp %576 : vector<1x32xf32>
    %cst_186 = arith.constant 1.000000e+00 : f32
    %578 = vector.broadcast %cst_186 : f32 to vector<1x32xf32>
    %579 = arith.addf %578, %577 : vector<1x32xf32>
    %580 = arith.divf %578, %579 : vector<1x32xf32>
    %581 = arith.mulf %572, %574 : vector<1x32xf32>
    %582 = vector.extract_strided_slice %531 {offsets = [0, 160], sizes = [1, 32], strides = [1, 1]} : vector<1x256xf32> to vector<1x32xf32>
    %583 = arith.negf %582 : vector<1x32xf32>
    %584 = math.exp %583 : vector<1x32xf32>
    %cst_187 = arith.constant 1.000000e+00 : f32
    %585 = vector.broadcast %cst_187 : f32 to vector<1x32xf32>
    %586 = arith.addf %585, %584 : vector<1x32xf32>
    %587 = arith.divf %585, %586 : vector<1x32xf32>
    %588 = arith.mulf %587, %566 : vector<1x32xf32>
    %589 = arith.addf %581, %588 : vector<1x32xf32>
    %590 = math.tanh %589 : vector<1x32xf32>
    %591 = arith.mulf %580, %590 : vector<1x32xf32>
    %c2_188 = arith.constant 2 : index
    %c2_189 = arith.constant 2 : index
    %c0_190 = arith.constant 0 : index
    %592 = vector.load %arg10[%c2_188, %c2_189, %c0_190] : memref<4x8x32xf32, #tpu.memory_space<vmem>>, vector<1x1x32xf32>
    %593 = vector.shape_cast %592 : vector<1x1x32xf32> to vector<1x32xf32>
    %594 = vector.shape_cast %591 : vector<1x32xf32> to vector<1x1x32xf32>
    tpu.vector_store %arg10[%c2_188, %c2_189, %c0_190], %594 {strides = array<i32>} : memref<4x8x32xf32, #tpu.memory_space<vmem>>, vector<1x1x32xf32>,
    %c2_191 = arith.constant 2 : index
    %c2_192 = arith.constant 2 : index
    %c0_193 = arith.constant 0 : index
    %595 = vector.load %arg11[%c2_191, %c2_192, %c0_193] : memref<4x8x32xf32, #tpu.memory_space<vmem>>, vector<1x1x32xf32>
    %596 = vector.shape_cast %595 : vector<1x1x32xf32> to vector<1x32xf32>
    %597 = vector.shape_cast %589 : vector<1x32xf32> to vector<1x1x32xf32>
    tpu.vector_store %arg11[%c2_191, %c2_192, %c0_193], %597 {strides = array<i32>} : memref<4x8x32xf32, #tpu.memory_space<vmem>>, vector<1x1x32xf32>,
    %598 = tpu.concatenate %558, %591 in 1 : vector<1x32xf32>, vector<1x32xf32> -> vector<1x64xf32>
    %599 = vector.extract_strided_slice %518 {offsets = [1, 0, 0], sizes = [1, 1, 32], strides = [1, 1, 1]} : vector<4x1x32xf32> to vector<1x1x32xf32>
    %600 = vector.shape_cast %599 : vector<1x1x32xf32> to vector<1x32xf32>
    %601 = vector.extract_strided_slice %518 {offsets = [3, 0, 0], sizes = [1, 1, 32], strides = [1, 1, 1]} : vector<4x1x32xf32> to vector<1x1x32xf32>
    %602 = vector.shape_cast %601 : vector<1x1x32xf32> to vector<1x32xf32>
    %603 = tpu.concatenate %598, %600, %602 in 1 : vector<1x64xf32>, vector<1x32xf32>, vector<1x32xf32> -> vector<1x128xf32>
    %c0_194 = arith.constant 0 : index
    %c0_195 = arith.constant 0 : index
    %c0_196 = arith.constant 0 : index
    %604 = vector.load %arg3[%c0_194, %c0_195, %c0_196] : memref<1x128x256xf32, #tpu.memory_space<vmem>>, vector<1x128x256xf32>
    %605 = vector.shape_cast %604 : vector<1x128x256xf32> to vector<128x256xf32>
    %cst_197 = arith.constant dense<0.000000e+00> : vector<1x256xf32>
    %606 = tpu.matmul %603, %605, %cst_197 {dimension_numbers = #tpu.dot_dimension_numbers<[1], [0], [0], [1], [0, 0, 1, 1], [], []>} : vector<1x128xf32>, vector<128x256xf32>, vector<1x256xf32> -> vector<1x256xf32>
    %607 = arith.addf %606, %18 : vector<1x256xf32>
    %608 = vector.extract_strided_slice %522 {offsets = [1, 0, 0], sizes = [1, 1, 32], strides = [1, 1, 1]} : vector<4x1x32xf32> to vector<1x1x32xf32>
    %609 = vector.shape_cast %608 : vector<1x1x32xf32> to vector<1x32xf32>
    %610 = vector.extract_strided_slice %607 {offsets = [0, 0], sizes = [1, 32], strides = [1, 1]} : vector<1x256xf32> to vector<1x32xf32>
    %611 = arith.negf %610 : vector<1x32xf32>
    %612 = math.exp %611 : vector<1x32xf32>
    %cst_198 = arith.constant 1.000000e+00 : f32
    %613 = vector.broadcast %cst_198 : f32 to vector<1x32xf32>
    %614 = arith.addf %613, %612 : vector<1x32xf32>
    %615 = arith.divf %613, %614 : vector<1x32xf32>
    %616 = vector.extract_strided_slice %607 {offsets = [0, 64], sizes = [1, 32], strides = [1, 1]} : vector<1x256xf32> to vector<1x32xf32>
    %617 = math.tanh %616 : vector<1x32xf32>
    %618 = vector.extract_strided_slice %607 {offsets = [0, 96], sizes = [1, 32], strides = [1, 1]} : vector<1x256xf32> to vector<1x32xf32>
    %619 = arith.negf %618 : vector<1x32xf32>
    %620 = math.exp %619 : vector<1x32xf32>
    %cst_199 = arith.constant 1.000000e+00 : f32
    %621 = vector.broadcast %cst_199 : f32 to vector<1x32xf32>
    %622 = arith.addf %621, %620 : vector<1x32xf32>
    %623 = arith.divf %621, %622 : vector<1x32xf32>
    %624 = arith.mulf %615, %617 : vector<1x32xf32>
    %625 = vector.extract_strided_slice %607 {offsets = [0, 32], sizes = [1, 32], strides = [1, 1]} : vector<1x256xf32> to vector<1x32xf32>
    %626 = arith.negf %625 : vector<1x32xf32>
    %627 = math.exp %626 : vector<1x32xf32>
    %cst_200 = arith.constant 1.000000e+00 : f32
    %628 = vector.broadcast %cst_200 : f32 to vector<1x32xf32>
    %629 = arith.addf %628, %627 : vector<1x32xf32>
    %630 = arith.divf %628, %629 : vector<1x32xf32>
    %631 = arith.mulf %630, %609 : vector<1x32xf32>
    %632 = arith.addf %624, %631 : vector<1x32xf32>
    %633 = math.tanh %632 : vector<1x32xf32>
    %634 = arith.mulf %623, %633 : vector<1x32xf32>
    %c1_201 = arith.constant 1 : index
    %c2_202 = arith.constant 2 : index
    %c0_203 = arith.constant 0 : index
    %635 = vector.load %arg10[%c1_201, %c2_202, %c0_203] : memref<4x8x32xf32, #tpu.memory_space<vmem>>, vector<1x1x32xf32>
    %636 = vector.shape_cast %635 : vector<1x1x32xf32> to vector<1x32xf32>
    %637 = vector.shape_cast %634 : vector<1x32xf32> to vector<1x1x32xf32>
    tpu.vector_store %arg10[%c1_201, %c2_202, %c0_203], %637 {strides = array<i32>} : memref<4x8x32xf32, #tpu.memory_space<vmem>>, vector<1x1x32xf32>,
    %c1_204 = arith.constant 1 : index
    %c2_205 = arith.constant 2 : index
    %c0_206 = arith.constant 0 : index
    %638 = vector.load %arg11[%c1_204, %c2_205, %c0_206] : memref<4x8x32xf32, #tpu.memory_space<vmem>>, vector<1x1x32xf32>
    %639 = vector.shape_cast %638 : vector<1x1x32xf32> to vector<1x32xf32>
    %640 = vector.shape_cast %632 : vector<1x32xf32> to vector<1x1x32xf32>
    tpu.vector_store %arg11[%c1_204, %c2_205, %c0_206], %640 {strides = array<i32>} : memref<4x8x32xf32, #tpu.memory_space<vmem>>, vector<1x1x32xf32>,
    %641 = vector.extract_strided_slice %522 {offsets = [3, 0, 0], sizes = [1, 1, 32], strides = [1, 1, 1]} : vector<4x1x32xf32> to vector<1x1x32xf32>
    %642 = vector.shape_cast %641 : vector<1x1x32xf32> to vector<1x32xf32>
    %643 = vector.extract_strided_slice %607 {offsets = [0, 128], sizes = [1, 32], strides = [1, 1]} : vector<1x256xf32> to vector<1x32xf32>
    %644 = arith.negf %643 : vector<1x32xf32>
    %645 = math.exp %644 : vector<1x32xf32>
    %cst_207 = arith.constant 1.000000e+00 : f32
    %646 = vector.broadcast %cst_207 : f32 to vector<1x32xf32>
    %647 = arith.addf %646, %645 : vector<1x32xf32>
    %648 = arith.divf %646, %647 : vector<1x32xf32>
    %649 = vector.extract_strided_slice %607 {offsets = [0, 192], sizes = [1, 32], strides = [1, 1]} : vector<1x256xf32> to vector<1x32xf32>
    %650 = math.tanh %649 : vector<1x32xf32>
    %651 = vector.extract_strided_slice %607 {offsets = [0, 224], sizes = [1, 32], strides = [1, 1]} : vector<1x256xf32> to vector<1x32xf32>
    %652 = arith.negf %651 : vector<1x32xf32>
    %653 = math.exp %652 : vector<1x32xf32>
    %cst_208 = arith.constant 1.000000e+00 : f32
    %654 = vector.broadcast %cst_208 : f32 to vector<1x32xf32>
    %655 = arith.addf %654, %653 : vector<1x32xf32>
    %656 = arith.divf %654, %655 : vector<1x32xf32>
    %657 = arith.mulf %648, %650 : vector<1x32xf32>
    %658 = vector.extract_strided_slice %607 {offsets = [0, 160], sizes = [1, 32], strides = [1, 1]} : vector<1x256xf32> to vector<1x32xf32>
    %659 = arith.negf %658 : vector<1x32xf32>
    %660 = math.exp %659 : vector<1x32xf32>
    %cst_209 = arith.constant 1.000000e+00 : f32
    %661 = vector.broadcast %cst_209 : f32 to vector<1x32xf32>
    %662 = arith.addf %661, %660 : vector<1x32xf32>
    %663 = arith.divf %661, %662 : vector<1x32xf32>
    %664 = arith.mulf %663, %642 : vector<1x32xf32>
    %665 = arith.addf %657, %664 : vector<1x32xf32>
    %666 = math.tanh %665 : vector<1x32xf32>
    %667 = arith.mulf %656, %666 : vector<1x32xf32>
    %c3_210 = arith.constant 3 : index
    %c2_211 = arith.constant 2 : index
    %c0_212 = arith.constant 0 : index
    %668 = vector.load %arg10[%c3_210, %c2_211, %c0_212] : memref<4x8x32xf32, #tpu.memory_space<vmem>>, vector<1x1x32xf32>
    %669 = vector.shape_cast %668 : vector<1x1x32xf32> to vector<1x32xf32>
    %670 = vector.shape_cast %667 : vector<1x32xf32> to vector<1x1x32xf32>
    tpu.vector_store %arg10[%c3_210, %c2_211, %c0_212], %670 {strides = array<i32>} : memref<4x8x32xf32, #tpu.memory_space<vmem>>, vector<1x1x32xf32>,
    %c3_213 = arith.constant 3 : index
    %c2_214 = arith.constant 2 : index
    %c0_215 = arith.constant 0 : index
    %671 = vector.load %arg11[%c3_213, %c2_214, %c0_215] : memref<4x8x32xf32, #tpu.memory_space<vmem>>, vector<1x1x32xf32>
    %672 = vector.shape_cast %671 : vector<1x1x32xf32> to vector<1x32xf32>
    %673 = vector.shape_cast %665 : vector<1x32xf32> to vector<1x1x32xf32>
    tpu.vector_store %arg11[%c3_213, %c2_214, %c0_215], %673 {strides = array<i32>} : memref<4x8x32xf32, #tpu.memory_space<vmem>>, vector<1x1x32xf32>,
    %674 = tpu.concatenate %634, %667 in 1 : vector<1x32xf32>, vector<1x32xf32> -> vector<1x64xf32>
    %c0_216 = arith.constant 0 : index
    %c0_217 = arith.constant 0 : index
    %c0_218 = arith.constant 0 : index
    %675 = vector.load %arg10[%c0_216, %c0_217, %c0_218] : memref<4x8x32xf32, #tpu.memory_space<vmem>>, vector<4x8x32xf32>
    %c0_219 = arith.constant 0 : index
    %c0_220 = arith.constant 0 : index
    %c0_221 = arith.constant 0 : index
    %676 = vector.load %arg11[%c0_219, %c0_220, %c0_221] : memref<4x8x32xf32, #tpu.memory_space<vmem>>, vector<4x8x32xf32>
    %677 = vector.extract_strided_slice %17 {offsets = [0, 3, 0], sizes = [4, 1, 32], strides = [1, 1, 1]} : vector<4x4x32xf32> to vector<4x1x32xf32>
    %678 = arith.mulf %127, %518 : vector<4x1x32xf32>
    %679 = arith.addf %677, %678 : vector<4x1x32xf32>
    %680 = arith.mulf %123, %675 : vector<4x8x32xf32>
    %681 = vector.broadcast %679 : vector<4x1x32xf32> to vector<4x8x32xf32>
    %682 = arith.addf %680, %681 : vector<4x8x32xf32>
    %683 = math.tanh %682 : vector<4x8x32xf32>
    %684 = arith.mulf %683, %126 : vector<4x8x32xf32>
    %cst_222 = arith.constant dense<0.000000e+00> : vector<4x8xf32>
    %685 = vector.multi_reduction <add>, %684, %cst_222 [2] : vector<4x8x32xf32> to vector<4x8xf32>
    %686 = vector.shape_cast %685 : vector<4x8xf32> to vector<4x8x1xf32>
    %cst_223 = arith.constant dense<0xFF800000> : vector<4x1xf32>
    %687 = vector.multi_reduction <maximumf>, %686, %cst_223 [1] : vector<4x8x1xf32> to vector<4x1xf32>
    %688 = vector.shape_cast %687 : vector<4x1xf32> to vector<4x1x1xf32>
    %689 = vector.broadcast %688 : vector<4x1x1xf32> to vector<4x8x1xf32>
    %690 = arith.subf %686, %689 : vector<4x8x1xf32>
    %691 = math.exp %690 : vector<4x8x1xf32>
    %cst_224 = arith.constant dense<0.000000e+00> : vector<4x1xf32>
    %692 = vector.multi_reduction <add>, %691, %cst_224 [1] : vector<4x8x1xf32> to vector<4x1xf32>
    %693 = vector.shape_cast %692 : vector<4x1xf32> to vector<4x1x1xf32>
    %694 = tpu.reciprocal %693 : vector<4x1x1xf32> -> vector<4x1x1xf32>
    %695 = vector.broadcast %694 : vector<4x1x1xf32> to vector<4x8x1xf32>
    %696 = arith.mulf %691, %695 : vector<4x8x1xf32>
    %697 = vector.broadcast %696 : vector<4x8x1xf32> to vector<4x8x32xf32>
    %698 = arith.mulf %697, %675 : vector<4x8x32xf32>
    %cst_225 = arith.constant dense<0.000000e+00> : vector<4x32xf32>
    %699 = vector.multi_reduction <add>, %698, %cst_225 [1] : vector<4x8x32xf32> to vector<4x32xf32>
    %700 = vector.shape_cast %699 : vector<4x32xf32> to vector<4x1x32xf32>
    %701 = vector.broadcast %696 : vector<4x8x1xf32> to vector<4x8x32xf32>
    %702 = arith.mulf %701, %676 : vector<4x8x32xf32>
    %cst_226 = arith.constant dense<0.000000e+00> : vector<4x32xf32>
    %703 = vector.multi_reduction <add>, %702, %cst_226 [1] : vector<4x8x32xf32> to vector<4x32xf32>
    %704 = vector.shape_cast %703 : vector<4x32xf32> to vector<4x1x32xf32>
    %705 = vector.extract_strided_slice %700 {offsets = [0, 0, 0], sizes = [1, 1, 32], strides = [1, 1, 1]} : vector<4x1x32xf32> to vector<1x1x32xf32>
    %706 = vector.shape_cast %705 : vector<1x1x32xf32> to vector<1x32xf32>
    %707 = vector.extract_strided_slice %700 {offsets = [2, 0, 0], sizes = [1, 1, 32], strides = [1, 1, 1]} : vector<4x1x32xf32> to vector<1x1x32xf32>
    %708 = vector.shape_cast %707 : vector<1x1x32xf32> to vector<1x32xf32>
    %709 = tpu.concatenate %706, %708 in 1 : vector<1x32xf32>, vector<1x32xf32> -> vector<1x64xf32>
    %710 = vector.extract_strided_slice %5 {offsets = [11, 0], sizes = [1, 256], strides = [1, 1]} : vector<12x256xf32> to vector<1x256xf32>
    %c0_227 = arith.constant 0 : index
    %c0_228 = arith.constant 0 : index
    %711 = vector.load %arg2[%c0_227, %c0_228] : memref<64x256xf32, #tpu.memory_space<vmem>>, vector<64x256xf32>
    %cst_229 = arith.constant dense<0.000000e+00> : vector<1x256xf32>
    %712 = tpu.matmul %709, %711, %cst_229 {dimension_numbers = #tpu.dot_dimension_numbers<[1], [0], [0], [1], [0, 0, 1, 1], [], []>} : vector<1x64xf32>, vector<64x256xf32>, vector<1x256xf32> -> vector<1x256xf32>
    %713 = arith.addf %710, %712 : vector<1x256xf32>
    %714 = vector.extract_strided_slice %704 {offsets = [0, 0, 0], sizes = [1, 1, 32], strides = [1, 1, 1]} : vector<4x1x32xf32> to vector<1x1x32xf32>
    %715 = vector.shape_cast %714 : vector<1x1x32xf32> to vector<1x32xf32>
    %716 = vector.extract_strided_slice %713 {offsets = [0, 0], sizes = [1, 32], strides = [1, 1]} : vector<1x256xf32> to vector<1x32xf32>
    %717 = arith.negf %716 : vector<1x32xf32>
    %718 = math.exp %717 : vector<1x32xf32>
    %cst_230 = arith.constant 1.000000e+00 : f32
    %719 = vector.broadcast %cst_230 : f32 to vector<1x32xf32>
    %720 = arith.addf %719, %718 : vector<1x32xf32>
    %721 = arith.divf %719, %720 : vector<1x32xf32>
    %722 = vector.extract_strided_slice %713 {offsets = [0, 64], sizes = [1, 32], strides = [1, 1]} : vector<1x256xf32> to vector<1x32xf32>
    %723 = math.tanh %722 : vector<1x32xf32>
    %724 = vector.extract_strided_slice %713 {offsets = [0, 96], sizes = [1, 32], strides = [1, 1]} : vector<1x256xf32> to vector<1x32xf32>
    %725 = arith.negf %724 : vector<1x32xf32>
    %726 = math.exp %725 : vector<1x32xf32>
    %cst_231 = arith.constant 1.000000e+00 : f32
    %727 = vector.broadcast %cst_231 : f32 to vector<1x32xf32>
    %728 = arith.addf %727, %726 : vector<1x32xf32>
    %729 = arith.divf %727, %728 : vector<1x32xf32>
    %730 = arith.mulf %721, %723 : vector<1x32xf32>
    %731 = vector.extract_strided_slice %713 {offsets = [0, 32], sizes = [1, 32], strides = [1, 1]} : vector<1x256xf32> to vector<1x32xf32>
    %732 = arith.negf %731 : vector<1x32xf32>
    %733 = math.exp %732 : vector<1x32xf32>
    %cst_232 = arith.constant 1.000000e+00 : f32
    %734 = vector.broadcast %cst_232 : f32 to vector<1x32xf32>
    %735 = arith.addf %734, %733 : vector<1x32xf32>
    %736 = arith.divf %734, %735 : vector<1x32xf32>
    %737 = arith.mulf %736, %715 : vector<1x32xf32>
    %738 = arith.addf %730, %737 : vector<1x32xf32>
    %739 = math.tanh %738 : vector<1x32xf32>
    %740 = arith.mulf %729, %739 : vector<1x32xf32>
    %c0_233 = arith.constant 0 : index
    %c3_234 = arith.constant 3 : index
    %c0_235 = arith.constant 0 : index
    %741 = vector.load %arg10[%c0_233, %c3_234, %c0_235] : memref<4x8x32xf32, #tpu.memory_space<vmem>>, vector<1x1x32xf32>
    %742 = vector.shape_cast %741 : vector<1x1x32xf32> to vector<1x32xf32>
    %743 = vector.shape_cast %740 : vector<1x32xf32> to vector<1x1x32xf32>
    tpu.vector_store %arg10[%c0_233, %c3_234, %c0_235], %743 {strides = array<i32>} : memref<4x8x32xf32, #tpu.memory_space<vmem>>, vector<1x1x32xf32>,
    %c0_236 = arith.constant 0 : index
    %c3_237 = arith.constant 3 : index
    %c0_238 = arith.constant 0 : index
    %744 = vector.load %arg11[%c0_236, %c3_237, %c0_238] : memref<4x8x32xf32, #tpu.memory_space<vmem>>, vector<1x1x32xf32>
    %745 = vector.shape_cast %744 : vector<1x1x32xf32> to vector<1x32xf32>
    %746 = vector.shape_cast %738 : vector<1x32xf32> to vector<1x1x32xf32>
    tpu.vector_store %arg11[%c0_236, %c3_237, %c0_238], %746 {strides = array<i32>} : memref<4x8x32xf32, #tpu.memory_space<vmem>>, vector<1x1x32xf32>,
    %747 = vector.extract_strided_slice %704 {offsets = [2, 0, 0], sizes = [1, 1, 32], strides = [1, 1, 1]} : vector<4x1x32xf32> to vector<1x1x32xf32>
    %748 = vector.shape_cast %747 : vector<1x1x32xf32> to vector<1x32xf32>
    %749 = vector.extract_strided_slice %713 {offsets = [0, 128], sizes = [1, 32], strides = [1, 1]} : vector<1x256xf32> to vector<1x32xf32>
    %750 = arith.negf %749 : vector<1x32xf32>
    %751 = math.exp %750 : vector<1x32xf32>
    %cst_239 = arith.constant 1.000000e+00 : f32
    %752 = vector.broadcast %cst_239 : f32 to vector<1x32xf32>
    %753 = arith.addf %752, %751 : vector<1x32xf32>
    %754 = arith.divf %752, %753 : vector<1x32xf32>
    %755 = vector.extract_strided_slice %713 {offsets = [0, 192], sizes = [1, 32], strides = [1, 1]} : vector<1x256xf32> to vector<1x32xf32>
    %756 = math.tanh %755 : vector<1x32xf32>
    %757 = vector.extract_strided_slice %713 {offsets = [0, 224], sizes = [1, 32], strides = [1, 1]} : vector<1x256xf32> to vector<1x32xf32>
    %758 = arith.negf %757 : vector<1x32xf32>
    %759 = math.exp %758 : vector<1x32xf32>
    %cst_240 = arith.constant 1.000000e+00 : f32
    %760 = vector.broadcast %cst_240 : f32 to vector<1x32xf32>
    %761 = arith.addf %760, %759 : vector<1x32xf32>
    %762 = arith.divf %760, %761 : vector<1x32xf32>
    %763 = arith.mulf %754, %756 : vector<1x32xf32>
    %764 = vector.extract_strided_slice %713 {offsets = [0, 160], sizes = [1, 32], strides = [1, 1]} : vector<1x256xf32> to vector<1x32xf32>
    %765 = arith.negf %764 : vector<1x32xf32>
    %766 = math.exp %765 : vector<1x32xf32>
    %cst_241 = arith.constant 1.000000e+00 : f32
    %767 = vector.broadcast %cst_241 : f32 to vector<1x32xf32>
    %768 = arith.addf %767, %766 : vector<1x32xf32>
    %769 = arith.divf %767, %768 : vector<1x32xf32>
    %770 = arith.mulf %769, %748 : vector<1x32xf32>
    %771 = arith.addf %763, %770 : vector<1x32xf32>
    %772 = math.tanh %771 : vector<1x32xf32>
    %773 = arith.mulf %762, %772 : vector<1x32xf32>
    %c2_242 = arith.constant 2 : index
    %c3_243 = arith.constant 3 : index
    %c0_244 = arith.constant 0 : index
    %774 = vector.load %arg10[%c2_242, %c3_243, %c0_244] : memref<4x8x32xf32, #tpu.memory_space<vmem>>, vector<1x1x32xf32>
    %775 = vector.shape_cast %774 : vector<1x1x32xf32> to vector<1x32xf32>
    %776 = vector.shape_cast %773 : vector<1x32xf32> to vector<1x1x32xf32>
    tpu.vector_store %arg10[%c2_242, %c3_243, %c0_244], %776 {strides = array<i32>} : memref<4x8x32xf32, #tpu.memory_space<vmem>>, vector<1x1x32xf32>,
    %c2_245 = arith.constant 2 : index
    %c3_246 = arith.constant 3 : index
    %c0_247 = arith.constant 0 : index
    %777 = vector.load %arg11[%c2_245, %c3_246, %c0_247] : memref<4x8x32xf32, #tpu.memory_space<vmem>>, vector<1x1x32xf32>
    %778 = vector.shape_cast %777 : vector<1x1x32xf32> to vector<1x32xf32>
    %779 = vector.shape_cast %771 : vector<1x32xf32> to vector<1x1x32xf32>
    tpu.vector_store %arg11[%c2_245, %c3_246, %c0_247], %779 {strides = array<i32>} : memref<4x8x32xf32, #tpu.memory_space<vmem>>, vector<1x1x32xf32>,
    %780 = tpu.concatenate %740, %773 in 1 : vector<1x32xf32>, vector<1x32xf32> -> vector<1x64xf32>
    %781 = vector.extract_strided_slice %700 {offsets = [1, 0, 0], sizes = [1, 1, 32], strides = [1, 1, 1]} : vector<4x1x32xf32> to vector<1x1x32xf32>
    %782 = vector.shape_cast %781 : vector<1x1x32xf32> to vector<1x32xf32>
    %783 = vector.extract_strided_slice %700 {offsets = [3, 0, 0], sizes = [1, 1, 32], strides = [1, 1, 1]} : vector<4x1x32xf32> to vector<1x1x32xf32>
    %784 = vector.shape_cast %783 : vector<1x1x32xf32> to vector<1x32xf32>
    %785 = tpu.concatenate %780, %782, %784 in 1 : vector<1x64xf32>, vector<1x32xf32>, vector<1x32xf32> -> vector<1x128xf32>
    %c0_248 = arith.constant 0 : index
    %c0_249 = arith.constant 0 : index
    %c0_250 = arith.constant 0 : index
    %786 = vector.load %arg3[%c0_248, %c0_249, %c0_250] : memref<1x128x256xf32, #tpu.memory_space<vmem>>, vector<1x128x256xf32>
    %787 = vector.shape_cast %786 : vector<1x128x256xf32> to vector<128x256xf32>
    %cst_251 = arith.constant dense<0.000000e+00> : vector<1x256xf32>
    %788 = tpu.matmul %785, %787, %cst_251 {dimension_numbers = #tpu.dot_dimension_numbers<[1], [0], [0], [1], [0, 0, 1, 1], [], []>} : vector<1x128xf32>, vector<128x256xf32>, vector<1x256xf32> -> vector<1x256xf32>
    %789 = arith.addf %788, %18 : vector<1x256xf32>
    %790 = vector.extract_strided_slice %704 {offsets = [1, 0, 0], sizes = [1, 1, 32], strides = [1, 1, 1]} : vector<4x1x32xf32> to vector<1x1x32xf32>
    %791 = vector.shape_cast %790 : vector<1x1x32xf32> to vector<1x32xf32>
    %792 = vector.extract_strided_slice %789 {offsets = [0, 0], sizes = [1, 32], strides = [1, 1]} : vector<1x256xf32> to vector<1x32xf32>
    %793 = arith.negf %792 : vector<1x32xf32>
    %794 = math.exp %793 : vector<1x32xf32>
    %cst_252 = arith.constant 1.000000e+00 : f32
    %795 = vector.broadcast %cst_252 : f32 to vector<1x32xf32>
    %796 = arith.addf %795, %794 : vector<1x32xf32>
    %797 = arith.divf %795, %796 : vector<1x32xf32>
    %798 = vector.extract_strided_slice %789 {offsets = [0, 64], sizes = [1, 32], strides = [1, 1]} : vector<1x256xf32> to vector<1x32xf32>
    %799 = math.tanh %798 : vector<1x32xf32>
    %800 = vector.extract_strided_slice %789 {offsets = [0, 96], sizes = [1, 32], strides = [1, 1]} : vector<1x256xf32> to vector<1x32xf32>
    %801 = arith.negf %800 : vector<1x32xf32>
    %802 = math.exp %801 : vector<1x32xf32>
    %cst_253 = arith.constant 1.000000e+00 : f32
    %803 = vector.broadcast %cst_253 : f32 to vector<1x32xf32>
    %804 = arith.addf %803, %802 : vector<1x32xf32>
    %805 = arith.divf %803, %804 : vector<1x32xf32>
    %806 = arith.mulf %797, %799 : vector<1x32xf32>
    %807 = vector.extract_strided_slice %789 {offsets = [0, 32], sizes = [1, 32], strides = [1, 1]} : vector<1x256xf32> to vector<1x32xf32>
    %808 = arith.negf %807 : vector<1x32xf32>
    %809 = math.exp %808 : vector<1x32xf32>
    %cst_254 = arith.constant 1.000000e+00 : f32
    %810 = vector.broadcast %cst_254 : f32 to vector<1x32xf32>
    %811 = arith.addf %810, %809 : vector<1x32xf32>
    %812 = arith.divf %810, %811 : vector<1x32xf32>
    %813 = arith.mulf %812, %791 : vector<1x32xf32>
    %814 = arith.addf %806, %813 : vector<1x32xf32>
    %815 = math.tanh %814 : vector<1x32xf32>
    %816 = arith.mulf %805, %815 : vector<1x32xf32>
    %c1_255 = arith.constant 1 : index
    %c3_256 = arith.constant 3 : index
    %c0_257 = arith.constant 0 : index
    %817 = vector.load %arg10[%c1_255, %c3_256, %c0_257] : memref<4x8x32xf32, #tpu.memory_space<vmem>>, vector<1x1x32xf32>
    %818 = vector.shape_cast %817 : vector<1x1x32xf32> to vector<1x32xf32>
    %819 = vector.shape_cast %816 : vector<1x32xf32> to vector<1x1x32xf32>
    tpu.vector_store %arg10[%c1_255, %c3_256, %c0_257], %819 {strides = array<i32>} : memref<4x8x32xf32, #tpu.memory_space<vmem>>, vector<1x1x32xf32>,
    %c1_258 = arith.constant 1 : index
    %c3_259 = arith.constant 3 : index
    %c0_260 = arith.constant 0 : index
    %820 = vector.load %arg11[%c1_258, %c3_259, %c0_260] : memref<4x8x32xf32, #tpu.memory_space<vmem>>, vector<1x1x32xf32>
    %821 = vector.shape_cast %820 : vector<1x1x32xf32> to vector<1x32xf32>
    %822 = vector.shape_cast %814 : vector<1x32xf32> to vector<1x1x32xf32>
    tpu.vector_store %arg11[%c1_258, %c3_259, %c0_260], %822 {strides = array<i32>} : memref<4x8x32xf32, #tpu.memory_space<vmem>>, vector<1x1x32xf32>,
    %823 = vector.extract_strided_slice %704 {offsets = [3, 0, 0], sizes = [1, 1, 32], strides = [1, 1, 1]} : vector<4x1x32xf32> to vector<1x1x32xf32>
    %824 = vector.shape_cast %823 : vector<1x1x32xf32> to vector<1x32xf32>
    %825 = vector.extract_strided_slice %789 {offsets = [0, 128], sizes = [1, 32], strides = [1, 1]} : vector<1x256xf32> to vector<1x32xf32>
    %826 = arith.negf %825 : vector<1x32xf32>
    %827 = math.exp %826 : vector<1x32xf32>
    %cst_261 = arith.constant 1.000000e+00 : f32
    %828 = vector.broadcast %cst_261 : f32 to vector<1x32xf32>
    %829 = arith.addf %828, %827 : vector<1x32xf32>
    %830 = arith.divf %828, %829 : vector<1x32xf32>
    %831 = vector.extract_strided_slice %789 {offsets = [0, 192], sizes = [1, 32], strides = [1, 1]} : vector<1x256xf32> to vector<1x32xf32>
    %832 = math.tanh %831 : vector<1x32xf32>
    %833 = vector.extract_strided_slice %789 {offsets = [0, 224], sizes = [1, 32], strides = [1, 1]} : vector<1x256xf32> to vector<1x32xf32>
    %834 = arith.negf %833 : vector<1x32xf32>
    %835 = math.exp %834 : vector<1x32xf32>
    %cst_262 = arith.constant 1.000000e+00 : f32
    %836 = vector.broadcast %cst_262 : f32 to vector<1x32xf32>
    %837 = arith.addf %836, %835 : vector<1x32xf32>
    %838 = arith.divf %836, %837 : vector<1x32xf32>
    %839 = arith.mulf %830, %832 : vector<1x32xf32>
    %840 = vector.extract_strided_slice %789 {offsets = [0, 160], sizes = [1, 32], strides = [1, 1]} : vector<1x256xf32> to vector<1x32xf32>
    %841 = arith.negf %840 : vector<1x32xf32>
    %842 = math.exp %841 : vector<1x32xf32>
    %cst_263 = arith.constant 1.000000e+00 : f32
    %843 = vector.broadcast %cst_263 : f32 to vector<1x32xf32>
    %844 = arith.addf %843, %842 : vector<1x32xf32>
    %845 = arith.divf %843, %844 : vector<1x32xf32>
    %846 = arith.mulf %845, %824 : vector<1x32xf32>
    %847 = arith.addf %839, %846 : vector<1x32xf32>
    %848 = math.tanh %847 : vector<1x32xf32>
    %849 = arith.mulf %838, %848 : vector<1x32xf32>
    %c3_264 = arith.constant 3 : index
    %c3_265 = arith.constant 3 : index
    %c0_266 = arith.constant 0 : index
    %850 = vector.load %arg10[%c3_264, %c3_265, %c0_266] : memref<4x8x32xf32, #tpu.memory_space<vmem>>, vector<1x1x32xf32>
    %851 = vector.shape_cast %850 : vector<1x1x32xf32> to vector<1x32xf32>
    %852 = vector.shape_cast %849 : vector<1x32xf32> to vector<1x1x32xf32>
    tpu.vector_store %arg10[%c3_264, %c3_265, %c0_266], %852 {strides = array<i32>} : memref<4x8x32xf32, #tpu.memory_space<vmem>>, vector<1x1x32xf32>,
    %c3_267 = arith.constant 3 : index
    %c3_268 = arith.constant 3 : index
    %c0_269 = arith.constant 0 : index
    %853 = vector.load %arg11[%c3_267, %c3_268, %c0_269] : memref<4x8x32xf32, #tpu.memory_space<vmem>>, vector<1x1x32xf32>
    %854 = vector.shape_cast %853 : vector<1x1x32xf32> to vector<1x32xf32>
    %855 = vector.shape_cast %847 : vector<1x32xf32> to vector<1x1x32xf32>
    tpu.vector_store %arg11[%c3_267, %c3_268, %c0_269], %855 {strides = array<i32>} : memref<4x8x32xf32, #tpu.memory_space<vmem>>, vector<1x1x32xf32>,
    %856 = tpu.concatenate %816, %849 in 1 : vector<1x32xf32>, vector<1x32xf32> -> vector<1x64xf32>
    %857 = tpu.concatenate %310, %492, %674, %856 in 0 : vector<1x64xf32>, vector<1x64xf32>, vector<1x64xf32>, vector<1x64xf32> -> vector<4x64xf32>
    %858 = vector.extract_strided_slice %120 {offsets = [4, 0], sizes = [4, 64], strides = [1, 1]} : vector<8x64xf32> to vector<4x64xf32>
    %cst_270 = arith.constant 0.000000e+00 : f32
    %859 = vector.broadcast %cst_270 : f32 to vector<4x64xf32>
    %860 = tpu.concatenate %857, %858, %859 in 0 : vector<4x64xf32>, vector<4x64xf32>, vector<4x64xf32> -> vector<12x64xf32>
    %c0_271 = arith.constant 0 : index
    %c0_272 = arith.constant 0 : index
    %861 = vector.load %arg9[%c0_271, %c0_272] : memref<12x64xf32, #tpu.memory_space<vmem>>, vector<12x64xf32>
    tpu.vector_store %arg9[%c0_271, %c0_272], %860 {strides = array<i32>} : memref<12x64xf32, #tpu.memory_space<vmem>>, vector<12x64xf32>,
    return
  }
}

</mosaic_0001>

<bundles_post_ra>
// kernel: bilstmn_forward.1
= control target key start
LH: loop header
LB: loop body
LE: loop exit
PB: predicated region body
PF: predicated region fallthrough
CT: control target
= control target key end

     0   :  { %v4821_v4 = vmov 0.0   ;;  %s4811_s0 = inlined_call_operand.vmem [shape: f32[12,32], index: 0, kind: input, shape index: {}]   ;;  %s4812_s1 = inlined_call_operand.vmem [shape: f32[32,256], index: 1, kind: input, shape index: {}]   ;;  %s4813_s2 = inlined_call_operand.vmem [shape: f32[64,256], index: 2, kind: input, shape index: {}]   ;;  %s4814_s3 = inlined_call_operand.vmem [shape: f32[1,128,256], index: 3, kind: input, shape index: {}]   ;;  %s4815_s4 = inlined_call_operand.vmem [shape: f32[2,256], index: 4, kind: input, shape index: {}]   ;;  %s4816_s5 = inlined_call_operand.vmem [shape: f32[4,1,32], index: 5, kind: input, shape index: {}]   ;;  %s4817_s6 = inlined_call_operand.vmem [shape: f32[32,128], index: 6, kind: input, shape index: {}]   ;;  %s4818_s7 = inlined_call_operand.vmem [shape: f32[4,1,32], index: 7, kind: input, shape index: {}]   ;;  %s4819_s8 = inlined_call_operand.vmem [shape: f32[4,1,32], index: 8, kind: input, shape index: {}]   ;;  %s4820_s9 = inlined_call_operand.hbm [shape: f32[12,64], index: 9, kind: output, shape index: {}]  }
   0x1   :  { %v42_v0 = vld [vmem:[%s4812_s1 + $0x38] sm:$0xff]  ;;  %v41_v1 = vld [vmem:[%s4812_s1 + $0x30] sm:$0xff]  ;;  %v40_v2 = vld [vmem:[%s4812_s1 + $0x28] sm:$0xff]  ;;  %126 = vmatprep.mubr.f32.mxu0 %v4821_v4  ;;  %2877 = vmatprep.subr.mxu1 %v4821_v4 }
   0x2   :  { %86 = vmatprep.subr.mxu0 %v42_v0  ;;  %v39_v3 = vld [vmem:[%s4812_s1 + $0x20] sm:$0xff]  ;;  %v38_v5 = vld [vmem:[%s4812_s1 + $0x18] sm:$0xff]  ;;  %v37_v6 = vld [vmem:[%s4812_s1 + $0x10] sm:$0xff] }
   0x3   :  { %87 = vmatpush1.msra.mxu0 %v41_v1 }
   0x4   :  { %88 = vmatprep.subr.mxu0 %v40_v2 }
   0x5   :  { %14 = vsyncpa [#allocation5], 0  ;;  %89 = vmatpush1.msra.mxu0 %v39_v3  ;;  %v36_v7 = vld [vmem:[%s4812_s1 + $0x8] sm:$0xff]  ;;  %v35_v8 = vld [vmem:[%s4812_s1] sm:$0xff]  ;;  %vm55_vm0 = vcmask 261120   ;;  %vm3207_vm1 = vmmov 0   ;;  %v45_v15 = vlaneseq }
   0x6   :  { %90 = vmatprep.subr.mxu0 %v38_v5  ;;  %v33_v9 = vld [vmem:[%s4811_s0] sm:$0xff]  ;;  %v142_v10 = vld [vmem:[%s4817_s6 + $0x18] sm:$0xff]  ;;  %v141_v11 = vld [vmem:[%s4817_s6 + $0x10] sm:$0xff]  ;;  %2885 = vmatprep.mubr.msk.f32.mxu1 %vm3207_vm1, %v4821_v4  ;;  %s3209_s12 = smov 96   ;;  %vm279_vm2 = vcmask 523264   ;;  %vm832_vm3 = vcmask 253952  }
   0x7   :  { %91 = vmatpush1.msra.mxu0 %v37_v6  ;;  %2878 = vmatpush3.msra.mxu1 %v142_v10  ;;  %v34_v12 = vld [vmem:[%s4811_s0 + $0x8] sm:$0xf]  ;;  %v139_v14 = vld [vmem:[%s4817_s6] sm:$0xff]  ;;  %v3318_v16 = vshrl.u32 %v45_v15, 7  ;;  %v3352_v42 = vld [vmem:[%s4814_s3 + $0xf8] sm:$0xff]  ;;  %s3210_s0 = smov 32  }
   0x8   :  { %92 = vmatprep.subr.mxu0 %v36_v7  ;;  %2879 = vmatprep.subr.mxu1 %v4821_v4  ;;  %v140_v13 = vld [vmem:[%s4817_s6 + $0x8] sm:$0xff]  ;;  %v43_v18 = vld [vmem:[%s4815_s4] ss:$2 sm:$0x3]  ;;  %s3208_s6 = smov 64   ;;  %v3357_v43 = vld [vmem:[%s4814_s3 + $0xf0] sm:$0xff] }
   0x9   :  { %93 = vmatpush1.msra.mxu0 %v35_v8  ;;  %2880 = vmatpush3.msra.mxu1 %v141_v11  ;;  %4866 = vst [vmem:[#allocation7_spill] sm:$0xff] %v3318_v16  ;;  %v3321_v17 = vsub.s32 1, %v3318_v16  ;;  %v3327_v19 = vsub.s32 0, %v3318_v16  ;;  %v3362_v44 = vld [vmem:[%s4814_s3 + $0xe8] sm:$0xff]  ;;  %v3368_v45 = vld [vmem:[%s4814_s3 + $0xe0] sm:$0xff]  ;;  %v3374_v46 = vld [vmem:[%s4814_s3 + $0xd8] sm:$0xff] }
   0xa   :  { %2835 = vmatmul.mubr.msk.f32.vlgmr.msra.gmra.mxu0 %vm55_vm0, %v33_v9  ;;  %2881 = vmatprep.subr.mxu1 %v4821_v4  ;;  %v3380_v47 = vld [vmem:[%s4814_s3 + $0xd0] sm:$0xff]  ;;  %v3386_v48 = vld [vmem:[%s4814_s3 + $0xc8] sm:$0xff]  ;;  %v3392_v49 = vld [vmem:[%s4814_s3 + $0xc0] sm:$0xff]  ;;  %vm882_vm4 = vcmask 785408   ;;  %vm1410_vm5 = vcmask 254977   ;;  %vm1990_vm6 = vcmask 256002  }
   0xb   :  { %132 = vmatprep.mubr.f32.mxu0 %v4821_v4  ;;  %2882 = vmatpush3.msra.mxu1 %v140_v13  ;;  %4867 = vst [vmem:[#allocation8_spill] sm:$0xff] %v3321_v17  ;;  %v3330_v20 = vrot.slane %v43_v18, %v3321_v17  ;;  %v3333_v22 = vrot.slane %v43_v18, %v3327_v19  ;;  %v3398_v51 = vld [vmem:[%s4814_s3 + $0xb8] sm:$0xff]  ;;  %v3405_v52 = vld [vmem:[%s4814_s3 + $0xb0] sm:$0xff]  ;;  %v3411_v53 = vld [vmem:[%s4814_s3 + $0xa8] sm:$0xff]  ;;  %vm2570_vm7 = vcmask 257027   ;;  %vm2817_vm8 = vcmask 519168  }
   0xc   :  { %2883 = vmatprep.subr.mxu1 %v4821_v4  ;;  %324 = vmatprep.subr.mxu0 %v3352_v42  ;;  %v3417_v54 = vld [vmem:[%s4814_s3 + $0xa0] sm:$0xff]  ;;  %v3423_v56 = vld [vmem:[%s4814_s3 + $0x98] sm:$0xff]  ;;  %v3430_v57 = vld [vmem:[%s4814_s3 + $0x90] sm:$0xff]  ;;  %vm2808_vm9 = vcmask 1040384   ;;  %vm2810_vm10 = vcmask 1041408   ;;  %vm2812_vm11 = vcmask 1042432  }
   0xd   :  { %2884 = vmatpush3.msra.mxu1 %v139_v14  ;;  %325 = vmatpush1.msra.mxu0 %v3357_v43  ;;  %v3436_v58 = vld [vmem:[%s4814_s3 + $0x88] sm:$0xff]  ;;  %v3442_v59 = vld [vmem:[%s4814_s3 + $0x80] sm:$0xff]  ;;  %v3448_v60 = vld [vmem:[%s4814_s3 + $0x78] sm:$0xff]  ;;  %vm2814_vm12 = vcmask 1043456  }
   0xe   :  { %2836 = vmatmul.mubr.msk.f32.gmra.mxu0 %vm55_vm0, %v34_v12  ;;  %2886 = vmatmul.mubr.msk.f32.vlgmr.msra.gmra.mxu1 %vm55_vm0, %v34_v12  ;;  %v3456_v61 = vld [vmem:[%s4814_s3 + $0x70] sm:$0xff]  ;;  %v3462_v62 = vld [vmem:[%s4814_s3 + $0x68] sm:$0xff]  ;;  %v3468_v63 = vld [vmem:[%s4814_s3 + $0x60] sm:$0xff] }
   0xf   :  { %388 = vmatprep.mubr.f32.mxu0 %v4821_v4  ;;  %791 = vmatprep.mubr.f32.mxu1 %v4821_v4  ;;  %v3474_v0 = vld [vmem:[%s4814_s3 + $0x58] sm:$0xff]  ;;  %v3480_v1 = vld [vmem:[%s4814_s3 + $0x50] sm:$0xff]  ;;  %v3486_v2 = vld [vmem:[%s4814_s3 + $0x48] sm:$0xff] }
  0x10   :  { %326 = vmatprep.subr.mxu0 %v3362_v44  ;;  %v3492_v3 = vld [vmem:[%s4814_s3 + $0x40] sm:$0xff]  ;;  %v3498_v5 = vld [vmem:[%s4814_s3 + $0x38] sm:$0xff]  ;;  %v3504_v6 = vld [vmem:[%s4814_s3 + $0x30] sm:$0xff] }
  0x11   :  { %327 = vmatpush1.msra.mxu0 %v3368_v45  ;;  %v3510_v7 = vld [vmem:[%s4814_s3 + $0x28] sm:$0xff]  ;;  %v3518_v8 = vld [vmem:[%s4814_s3 + $0x20] sm:$0xff]  ;;  %v3524_v9 = vld [vmem:[%s4814_s3 + $0x18] sm:$0xff] }
  0x12   :  { %328 = vmatprep.subr.mxu0 %v3374_v46  ;;  %v3529_v10 = vld [vmem:[%s4814_s3 + $0x10] sm:$0xff]  ;;  %v3534_v11 = vld [vmem:[%s4814_s3 + $0x8] sm:$0xff]  ;;  %v3542_v12 = vld [vmem:[%s4814_s3] sm:$0xff] }
  0x13   :  { %329 = vmatpush1.msra.mxu0 %v3380_v47  ;;  %v3664_v16 = vld [vmem:[%s4813_s2 + $0x40] sm:$0xff] }
  0x14   :  { %330 = vmatprep.subr.mxu0 %v3386_v48  ;;  %4882 = vst [vmem:[#allocation23_spill] sm:$0xff] %v3664_v16 }
  0x15   :  { %331 = vmatpush1.msra.mxu0 %v3392_v49 }
  0x16   :  { %332 = vmatprep.subr.mxu0 %v3398_v51 }
  0x17   :  { %333 = vmatpush1.msra.mxu0 %v3405_v52 }
  0x18   :  { %334 = vmatprep.subr.mxu0 %v3411_v53 }
  0x19   :  { %335 = vmatpush1.msra.mxu0 %v3417_v54 }
  0x1a   :  { %336 = vmatprep.subr.mxu0 %v3423_v56 }
  0x1b   :  { %337 = vmatpush1.msra.mxu0 %v3430_v57 }
  0x1c   :  { %338 = vmatprep.subr.mxu0 %v3436_v58 }
  0x1d   :  { %339 = vmatpush1.msra.mxu0 %v3442_v59 }
  0x1e   :  { %340 = vmatprep.subr.mxu0 %v3448_v60 }
  0x1f   :  { %341 = vmatpush1.msra.mxu0 %v3456_v61 }
  0x20   :  { %342 = vmatprep.subr.mxu0 %v3462_v62 }
  0x21   :  { %343 = vmatpush1.msra.mxu0 %v3468_v63 }
  0x22   :  { %344 = vmatprep.subr.mxu0 %v3474_v0 }
  0x23   :  { %345 = vmatpush1.msra.mxu0 %v3480_v1 }
  0x24   :  { %346 = vmatprep.subr.mxu0 %v3486_v2 }
  0x25   :  { %347 = vmatpush1.msra.mxu0 %v3492_v3 }
  0x26   :  { %348 = vmatprep.subr.mxu0 %v3498_v5 }
  0x27   :  { %349 = vmatpush1.msra.mxu0 %v3504_v6 }
  0x28   :  { %350 = vmatprep.subr.mxu0 %v3510_v7 }
  0x29   :  { %351 = vmatpush1.msra.mxu0 %v3518_v8 }
  0x2a   :  { %352 = vmatprep.subr.mxu0 %v3524_v9 }
  0x2b   :  { %353 = vmatpush1.msra.mxu0 %v3529_v10 }
  0x2c   :  { %354 = vmatprep.subr.mxu0 %v3534_v11 }
  0x2d   :  { %355 = vmatpush1.msra.mxu0 %v3542_v12 }
  0xca   :  { %v128_v21 = vpop.f32.mrf.mxu0 }
  0xcb   :  { %v129_v25 = vadd.f32 %v128_v21, %v3333_v22  ;;  %v3553_v21 = vld [vmem:[%s4818_s7 + $0x2] sm:$0x1] }
  0xcc   :  { %v130_v23 = vpop.f32.mrf.mxu0 }
  0xcd   :  { %v131_v24 = vadd.f32 %v130_v23, %v3330_v20  ;;  %v2839_v31 = vmul.f32 -1.442695, %v129_v25 }
  0xce   :  { %v3339_v28 = vpop.f32.mrf.mxu1 }
  0xcf   :  { %2916 = vtanh.f32 %v131_v24  ;;  %4868 = vst [vmem:[#allocation9_spill] sm:$0xff] %v3339_v28  ;;  %v2840_v29 = vmul.f32 -1.442695, %v131_v24  ;;  %v521_v24 = vmul.f32 0.0, %v3553_v21 }
  0xd0   :  { %2918 = vtanh.f32 %v129_v25  ;;  %v2887_v30 = vpop.f32.mrf.mxu1 }
  0xd1   :  { %2920 = vpow2.f32 %v2840_v29 }
  0xd2   :  { %2922 = vpow2.f32 %v2839_v31 }
  0xdc   :  { %v2917_v26 = vpop.eup %2916 }
  0xdd   :  { %257 = vrot.lane.b32.xlu0 %v2917_v26, %s3208_s6  ;;  %v2919_v27 = vpop.eup %2918  ;;  %v3562_v26 = vld [vmem:[%s4818_s7] sm:$0x1] }
  0xde   :  { %v2921_v32 = vpop.eup %2920  ;;  %4870 = vst [vmem:[#allocation11_spill] sm:$0xff] %v3562_v26  ;;  %v519_v31 = vmul.f32 0.0, %v3562_v26 }
  0xdf   :  { %v252_v33 = vadd.f32 1.0, %v2921_v32  ;;  %v2923_v34 = vpop.eup %2922 }
  0xe0   :  { %v228_v35 = vadd.f32 1.0, %v2923_v34 }
  0xe1   :  { %233 = vrot.lane.b32.xlu0 %v2919_v27, %s3208_s6  ;;  %2924 = vrcp.f32 %v252_v33  ;;  %v3572_v33 = vld [vmem:[%s4816_s5 + $0x2] ss:$0 sm:$0xff] }
  0xe2   :  { %2926 = vrcp.f32 %v228_v35  ;;  %4871 = vst [vmem:[#allocation12_spill] sm:$0xff] %v3572_v33 }
  0xee   :  { %v3341_v36 = vpop.eup %2924 }
  0xef   :  { %v3345_v39 = vpop.eup %2926 }
 0x14f   :  { %v258_v37 = vpop.permute.xlu0 %257 }
 0x150   :  { %v260_v38 = vmul.f32 %v3341_v36, %v258_v37 }
 0x152   :  { %2928 = vtanh.f32 %v260_v38  ;;  %274 = vst.msk [vmem:[#allocation3 + $0x10] sm:$0xff] %vm55_vm0, %v260_v38  ;;  %v3584_v38 = vld [vmem:[%s4816_s5] ss:$0 sm:$0xff] }
 0x153   :  { %v234_v40 = vpop.permute.xlu0 %233  ;;  %4872 = vst [vmem:[#allocation13_spill] sm:$0xff] %v3584_v38 }
 0x154   :  { %v236_v41 = vmul.f32 %v3345_v39, %v234_v40 }
 0x156   :  { %2930 = vtanh.f32 %v236_v41  ;;  %248 = vst.msk [vmem:[#allocation3] sm:$0xff] %vm55_vm0, %v236_v41 }
 0x15f   :  { %v2929_v50 = vpop.eup %2928 }
 0x160   :  { %263 = vrot.lane.b32.xlu1 %v2929_v50, %s3209_s12 }
 0x163   :  { %v2931_v55 = vpop.eup %2930 }
 0x164   :  { %239 = vrot.lane.b32.xlu1 %v2931_v55, %s3209_s12 }
 0x168   :  { %217 = vrot.lane.b32.xlu1 %v3339_v28, %s3208_s6 }
 0x1d2   :  { %v264_v13 = vpop.permute.xlu1 %263 }
 0x1d3   :  { %v266_v14 = vmul.f32 %v3341_v36, %v264_v13  ;;  %v523_v36 = vadd.f32 %v519_v31, %v3339_v28  ;;  %v3594_v13 = vld [vmem:[%s4819_s8 + $0x2] ss:$0 sm:$0xff] }
 0x1d4   :  { %4873 = vst [vmem:[#allocation14_spill] sm:$0xff] %v3594_v13 }
 0x1d5   :  { %268 = vrot.lane.b32.xlu0 %v266_v14, %s3210_s0  ;;  %275 = vrot.lane.b32.xlu1 %v266_v14, %s3208_s6  ;;  %v534_v41 = vrot.slane %v523_v36, %v3327_v19 }
 0x1d6   :  { %v240_v15 = vpop.permute.xlu1 %239 }
 0x1d7   :  { %v242_v18 = vmul.f32 %v3345_v39, %v240_v15 }
 0x1d9   :  { %244 = vrot.lane.b32.xlu0 %v242_v18, %s3210_s0  ;;  %v3600_v18 = vld [vmem:[%s4819_s8] ss:$0 sm:$0xff] }
 0x1da   :  { %v3555_v23 = vpop.permute.xlu1 %217  ;;  %4874 = vst [vmem:[#allocation15_spill] sm:$0xff] %v3600_v18 }
 0x1db   :  { %4869 = vst [vmem:[#allocation10_spill] sm:$0xff] %v3555_v23  ;;  %v525_v27 = vadd.f32 %v521_v24, %v3555_v23 }
 0x1dd   :  { %v542_v34 = vrot.slane %v525_v27, %v3327_v19 }
 0x247   :  { %v269_v25 = vpop.permute.xlu0 %268  ;;  %v276_v29 = vpop.permute.xlu1 %275 }
 0x248   :  { %272 = vst.msk [vmem:[#allocation2 + $0x10] sm:$0xff] %vm55_vm0, %v269_v25 }
 0x24b   :  { %v245_v30 = vpop.permute.xlu0 %244 }
 0x24c   :  { %247 = vst.msk [vmem:[#allocation2] sm:$0xff] %vm55_vm0, %v245_v30  ;;  %v278_v32 = vsel %vm55_vm0, %v245_v30, %v276_v29 }
 0x24d   :  { %2841 = vmatmul.mubr.msk.f32.vlgmr.msra.gmra.mxu0 %vm279_vm2, %v278_v32 }
 0x24e   :  { %1560 = vmatprep.mubr.f32.mxu0 %v4821_v4  ;;  %v3659_v4 = vld [vmem:[%s4813_s2 + $0x48] sm:$0xff] }
 0x24f   :  { %v3576_v35 = vld [vmem:[#allocation2 + $0x10] sm:$0xff]  ;;  %4881 = vst [vmem:[#allocation22_spill] sm:$0xff] %v3659_v4 }
 0x250   :  { %v529_v37 = vmul.f32 %v3572_v33, %v3576_v35 }
 0x252   :  { %v549_v39 = vadd.f32 %v542_v34, %v529_v37 }
 0x253   :  { %v3586_v40 = vld [vmem:[#allocation2] sm:$0xff] }
 0x254   :  { %2932 = vtanh.f32 %v549_v39  ;;  %v527_v50 = vmul.f32 %v3584_v38, %v3586_v40 }
 0x256   :  { %v547_v55 = vadd.f32 %v534_v41, %v527_v50 }
 0x258   :  { %2934 = vtanh.f32 %v547_v55  ;;  %v3605_v55 = vpop.f32.mrf.mxu0 }
 0x261   :  { %v2933_v14 = vpop.eup %2932 }
 0x262   :  { %v557_v15 = vmul.f32 %v2933_v14, %v3594_v13  ;;  %v2838_v14 = vld [vmem:[%s4815_s4 + $0x1] ss:$2 sm:$0x3] }
 0x264   :  { %v565_v24 = vsel %vm55_vm0, %v557_v15, 0.0  ;;  %v3610_v15 = vpop.f32.mrf.mxu0 }
 0x265   :  { %v2935_v25 = vpop.eup %2934  ;;  %566 = vadd.xlane.f32.xlu0 %v565_v24  ;;  %v3613_v24 = vrot.slane %v2838_v14, %v3327_v19 }
 0x266   :  { %v555_v27 = vmul.f32 %v2935_v25, %v3600_v18 }
 0x267   :  { %4875 = vst [vmem:[#allocation16_spill] sm:$0xff] %v3613_v24 }
 0x268   :  { %v559_v29 = vsel %vm55_vm0, %v555_v27, 0.0 }
 0x269   :  { %560 = vadd.xlane.f32.xlu1 %v559_v29 }
 0x2ee   :  { %v567_v30 = vpop.xlane.xlu0 %566 }
 0x2ef   :  { %v583_v31 = vrot.slane %v567_v30, 4 }
 0x2f1   :  { %v584_v32 = vmax.f32 %v567_v30, %v583_v31 }
 0x2f3   :  { %v585_v34 = vrot.slane %v584_v32, 2 }
 0x2f5   :  { %v586_v36 = vmax.f32 %v584_v32, %v585_v34 }
 0x2f7   :  { %v587_v37 = vrot.slane %v586_v36, 1 }
 0x2f9   :  { %v588_v39 = vmax.f32 %v586_v36, %v587_v37  ;;  %v3622_v36 = vld [vmem:[%s4813_s2 + $0x78] sm:$0xff]  ;;  %v3627_v37 = vld [vmem:[%s4813_s2 + $0x70] sm:$0xff] }
 0x2fa   :  { %4876 = vst [vmem:[#allocation17_spill] sm:$0xff] %v3627_v37  ;;  %743 = vmatprep.subr.mxu1 %v3622_v36 }
 0x2fb   :  { %v597_v41 = vsub.f32 %v567_v30, %v588_v39  ;;  %v3632_v39 = vld [vmem:[%s4813_s2 + $0x68] sm:$0xff]  ;;  %744 = vmatpush1.msra.mxu1 %v3627_v37 }
 0x2fc   :  { %4877 = vst [vmem:[#allocation18_spill] sm:$0xff] %v3632_v39  ;;  %745 = vmatprep.subr.mxu1 %v3632_v39 }
 0x2fd   :  { %v603_v50 = vmul.f32 1.442695, %v597_v41  ;;  %v3638_v41 = vld [vmem:[%s4813_s2 + $0x60] sm:$0xff] }
 0x2fe   :  { %4878 = vst [vmem:[#allocation19_spill] sm:$0xff] %v3638_v41  ;;  %746 = vmatpush1.msra.mxu1 %v3638_v41 }
 0x2ff   :  { %2936 = vpow2.f32 %v603_v50 }
 0x30c   :  { %v2937_v25 = vpop.eup %2936 }
 0x30d   :  { %v390_v27 = vpop.f32.mrf.mxu0  ;;  %v619_v29 = vrot.slane %v2937_v25, 4 }
 0x30e   :  { %v3616_v31 = vadd.f32 %v390_v27, %v3613_v24  ;;  %v3644_v27 = vld [vmem:[%s4813_s2 + $0x58] sm:$0xff] }
 0x30f   :  { %v620_v30 = vadd.f32 %v2937_v25, %v619_v29  ;;  %4879 = vst [vmem:[#allocation20_spill] sm:$0xff] %v3644_v27  ;;  %v3650_v29 = vld [vmem:[%s4813_s2 + $0x50] sm:$0xff]  ;;  %747 = vmatprep.subr.mxu1 %v3644_v27  ;;  %v3693_v24 = vld [vmem:[%s4813_s2 + $0x18] sm:$0xff] }
 0x310   :  { %2938 = vtanh.f32 %v3616_v31  ;;  %4880 = vst [vmem:[#allocation21_spill] sm:$0xff] %v3650_v29  ;;  %748 = vmatpush1.msra.mxu1 %v3650_v29  ;;  %4887 = vst [vmem:[#allocation28_spill] sm:$0xff] %v3693_v24 }
 0x311   :  { %v621_v32 = vrot.slane %v620_v30, 2  ;;  %749 = vmatprep.subr.mxu1 %v3659_v4  ;;  %v392_v4 = vpop.f32.mrf.mxu0 }
 0x312   :  { %750 = vmatpush1.msra.mxu1 %v3664_v16  ;;  %v3696_v16 = vrot.slane %v2838_v14, %v3321_v17 }
 0x313   :  { %v622_v34 = vadd.f32 %v621_v32, %v620_v30 }
 0x314   :  { %4888 = vst [vmem:[#allocation29_spill] sm:$0xff] %v3696_v16 }
 0x315   :  { %v623_v50 = vrot.slane %v622_v34, 1 }
 0x317   :  { %v624_v30 = vadd.f32 %v623_v50, %v622_v34  ;;  %v3669_v34 = vld [vmem:[%s4813_s2 + $0x38] sm:$0xff]  ;;  %v3675_v50 = vld [vmem:[%s4813_s2 + $0x30] sm:$0xff] }
 0x318   :  { %4883 = vst [vmem:[#allocation24_spill] sm:$0xff] %v3669_v34  ;;  %4884 = vst [vmem:[#allocation25_spill] sm:$0xff] %v3675_v50  ;;  %751 = vmatprep.subr.mxu1 %v3669_v34  ;;  %v3702_v34 = vld [vmem:[%s4813_s2 + $0x10] sm:$0xff] }
 0x319   :  { %2940 = vrcp.f32 %v624_v30  ;;  %v3681_v30 = vld [vmem:[%s4813_s2 + $0x28] sm:$0xff]  ;;  %752 = vmatpush1.msra.mxu1 %v3675_v50  ;;  %4889 = vst [vmem:[#allocation30_spill] sm:$0xff] %v3702_v34 }
 0x31a   :  { %4885 = vst [vmem:[#allocation26_spill] sm:$0xff] %v3681_v30  ;;  %753 = vmatprep.subr.mxu1 %v3681_v30  ;;  %v3710_v50 = vld [vmem:[%s4813_s2 + $0x8] sm:$0xff]  ;;  %v393_v30 = vadd.f32 %v392_v4, %v3696_v16 }
 0x31b   :  { %4890 = vst [vmem:[#allocation31_spill] sm:$0xff] %v3710_v50 }
 0x31c   :  { %2942 = vtanh.f32 %v393_v30 }
 0x31d   :  { %v2939_v32 = vpop.eup %2938 }
 0x31e   :  { %403 = vrot.lane.b32.xlu1 %v2939_v32, %s3208_s6  ;;  %v3687_v32 = vld [vmem:[%s4813_s2 + $0x20] sm:$0xff] }
 0x31f   :  { %4886 = vst [vmem:[#allocation27_spill] sm:$0xff] %v3687_v32  ;;  %754 = vmatpush1.msra.mxu1 %v3687_v32 }
 0x320   :  { %755 = vmatprep.subr.mxu1 %v3693_v24  ;;  %v561_v24 = vpop.xlane.xlu1 %560 }
 0x321   :  { %756 = vmatpush1.msra.mxu1 %v3702_v34  ;;  %v571_v27 = vrot.slane %v561_v24, 4 }
 0x322   :  { %757 = vmatprep.subr.mxu1 %v3710_v50 }
 0x323   :  { %v572_v50 = vmax.f32 %v561_v24, %v571_v27 }
 0x326   :  { %v2941_v18 = vpop.eup %2940 }
 0x327   :  { %v3704_v29 = vmul.f32 %v2941_v18, %v2937_v25  ;;  %v3722_v25 = vld [vmem:[%s4813_s2] sm:$0xff] }
 0x328   :  { %4891 = vst [vmem:[#allocation32_spill] sm:$0xff] %v3722_v25  ;;  %758 = vmatpush1.msra.mxu1 %v3722_v25 }
 0x329   :  { %v641_v14 = vmul.f32 %v3704_v29, %v3576_v35  ;;  %916 = vmatprep.subr.mxu1 %v3352_v42  ;;  %v2943_v38 = vpop.eup %2942 }
 0x32b   :  { %v657_v18 = vsel %vm55_vm0, %v641_v14, 0.0  ;;  %v573_v14 = vrot.slane %v572_v50, 2 }
 0x32c   :  { %v658_v32 = vrot.slane %v657_v18, 4 }
 0x32d   :  { %v574_v25 = vmax.f32 %v572_v50, %v573_v14  ;;  %v2843_v50 = vmul.f32 -1.442695, %v393_v30 }
 0x32e   :  { %v659_v35 = vadd.f32 %v658_v32, %v657_v18 }
 0x32f   :  { %v575_v39 = vrot.slane %v574_v25, 1 }
 0x330   :  { %v660_v34 = vrot.slane %v659_v35, 2 }
 0x331   :  { %v576_v42 = vmax.f32 %v574_v25, %v575_v39 }
 0x332   :  { %v661_v4 = vadd.f32 %v660_v34, %v659_v35 }
 0x333   :  { %v595_v37 = vsub.f32 %v561_v24, %v576_v42 }
 0x334   :  { %v662_v16 = vrot.slane %v661_v4, 1 }
 0x335   :  { %v599_v32 = vmul.f32 1.442695, %v595_v37 }
 0x336   :  { %v3726_v41 = vadd.f32 %v662_v16, %v661_v4  ;;  %v2842_v16 = vmul.f32 -1.442695, %v3616_v31 }
 0x337   :  { %2944 = vpow2.f32 %v599_v32 }
 0x338   :  { %704 = vrot.lane.b32.xlu0 %v3726_v41, %s3210_s0  ;;  %2946 = vpow2.f32 %v2842_v16  ;;  %v4892_v16 = vmov 0.0  }
 0x339   :  { %2818 = vst.msk [vmem:[#allocation4 + $0x8] sm:$0xf] %vm2817_vm8, %v4892_v16 }
 0x33c   :  { %429 = vrot.lane.b32.xlu0 %v2943_v38, %s3208_s6 }
 0x344   :  { %v2945_v18 = vpop.eup %2944 }
 0x345   :  { %v607_v13 = vrot.slane %v2945_v18, 4  ;;  %v2947_v33 = vpop.eup %2946 }
 0x346   :  { %v398_v17 = vadd.f32 1.0, %v2947_v33 }
 0x347   :  { %v608_v34 = vadd.f32 %v2945_v18, %v607_v13 }
 0x349   :  { %v609_v35 = vrot.slane %v608_v34, 2 }
 0x34b   :  { %v610_v27 = vadd.f32 %v609_v35, %v608_v34 }
 0x34d   :  { %v611_v4 = vrot.slane %v610_v27, 1 }
 0x34f   :  { %v612_v26 = vadd.f32 %v611_v4, %v610_v27 }
 0x351   :  { %2948 = vrcp.f32 %v612_v26 }
 0x352   :  { %2950 = vrcp.f32 %v398_v17 }
 0x353   :  { %2952 = vpow2.f32 %v2843_v50  ;;  %v3826_v50 = vld [vmem:[%s4816_s5 + $0x1] ss:$0 sm:$0xff] }
 0x35e   :  { %v2949_v38 = vpop.eup %2948 }
 0x35f   :  { %v3732_v39 = vmul.f32 %v2949_v38, %v2945_v18  ;;  %v3736_v13 = vpop.eup %2950 }
 0x360   :  { %v2953_v33 = vpop.eup %2952 }
 0x361   :  { %v639_v24 = vmul.f32 %v3732_v39, %v3586_v40  ;;  %v424_v30 = vadd.f32 1.0, %v2953_v33 }
 0x363   :  { %v643_v25 = vsel %vm55_vm0, %v639_v24, 0.0 }
 0x364   :  { %v644_v26 = vrot.slane %v643_v25, 4 }
 0x366   :  { %v645_v17 = vadd.f32 %v644_v26, %v643_v25  ;;  %v3836_v25 = vld [vmem:[%s4819_s8 + $0x1] ss:$0 sm:$0xff] }
 0x368   :  { %v646_v14 = vrot.slane %v645_v17, 2 }
 0x36a   :  { %v647_v40 = vadd.f32 %v646_v14, %v645_v17 }
 0x36c   :  { %v648_v32 = vrot.slane %v647_v40, 1 }
 0x36e   :  { %v3742_v18 = vadd.f32 %v648_v32, %v647_v40 }
 0x390   :  { %v404_v37 = vpop.permute.xlu1 %403 }
 0x391   :  { %v406_v31 = vmul.f32 %v3736_v13, %v404_v37 }
 0x393   :  { %2954 = vtanh.f32 %v406_v31  ;;  %420 = vst.msk [vmem:[#allocation3 + $0x8] sm:$0xff] %vm55_vm0, %v406_v31 }
 0x394   :  { %2956 = vrcp.f32 %v424_v30  ;;  %v3842_v30 = vld [vmem:[%s4818_s7 + $0x3] sm:$0x1] }
 0x395   :  { %v522_v40 = vmul.f32 0.0, %v3842_v30 }
 0x3a0   :  { %v2955_v42 = vpop.eup %2954 }
 0x3a1   :  { %409 = vrot.lane.b32.xlu1 %v2955_v42, %s3209_s12  ;;  %v2957_v27 = vpop.eup %2956 }
 0x3aa   :  { %v705_v34 = vpop.permute.xlu0 %704 }
 0x3ab   :  { %v707_v35 = vsel %vm55_vm0, %v3742_v18, %v705_v34 }
 0x3ac   :  { %2852 = vmatmul.mubr.msk.f32.vlgmr.msra.gmra.mxu1 %vm279_vm2, %v707_v35  ;;  %v3853_v35 = vld [vmem:[%s4816_s5 + $0x3] ss:$0 sm:$0xff] }
 0x3ad   :  { %917 = vmatpush1.msra.mxu1 %v3357_v43  ;;  %980 = vmatprep.mubr.f32.mxu1 %v4892_v16 }
 0x3ae   :  { %v430_v4 = vpop.permute.xlu0 %429  ;;  %918 = vmatprep.subr.mxu1 %v3362_v44  ;;  %v517_v44 = vld [vmem:[#allocation3 + $0x10] sm:$0xff] }
 0x3af   :  { %v432_v38 = vmul.f32 %v2957_v27, %v430_v4  ;;  %919 = vmatpush1.msra.mxu1 %v3368_v45  ;;  %v673_v45 = vmul.f32 %v3704_v29, %v517_v44 }
 0x3b0   :  { %920 = vmatprep.subr.mxu1 %v3374_v46 }
 0x3b1   :  { %2958 = vtanh.f32 %v432_v38  ;;  %446 = vst.msk [vmem:[#allocation3 + $0x18] sm:$0xff] %vm55_vm0, %v432_v38  ;;  %921 = vmatpush1.msra.mxu1 %v3380_v47  ;;  %v689_v46 = vsel %vm55_vm0, %v673_v45, 0.0 }
 0x3b2   :  { %922 = vmatprep.subr.mxu1 %v3386_v48  ;;  %v690_v47 = vrot.slane %v689_v46, 4 }
 0x3b3   :  { %923 = vmatpush1.msra.mxu1 %v3392_v49 }
 0x3b4   :  { %924 = vmatprep.subr.mxu1 %v3398_v51  ;;  %v691_v48 = vadd.f32 %v690_v47, %v689_v46 }
 0x3b5   :  { %925 = vmatpush1.msra.mxu1 %v3405_v52 }
 0x3b6   :  { %926 = vmatprep.subr.mxu1 %v3411_v53  ;;  %v692_v49 = vrot.slane %v691_v48, 2 }
 0x3b7   :  { %927 = vmatpush1.msra.mxu1 %v3417_v54 }
 0x3b8   :  { %928 = vmatprep.subr.mxu1 %v3423_v56  ;;  %v693_v53 = vadd.f32 %v692_v49, %v691_v48  ;;  %v3867_v48 = vld [vmem:[%s4819_s8 + $0x3] ss:$0 sm:$0xff] }
 0x3b9   :  { %929 = vmatpush1.msra.mxu1 %v3430_v57  ;;  %v515_v57 = vld [vmem:[#allocation3] sm:$0xff] }
 0x3ba   :  { %930 = vmatprep.subr.mxu1 %v3436_v58  ;;  %v694_v54 = vrot.slane %v693_v53, 1  ;;  %v671_v58 = vmul.f32 %v3732_v39, %v515_v57 }
 0x3bb   :  { %931 = vmatpush1.msra.mxu1 %v3442_v59 }
 0x3bc   :  { %932 = vmatprep.subr.mxu1 %v3448_v60  ;;  %v695_v56 = vadd.f32 %v694_v54, %v693_v53  ;;  %v675_v59 = vsel %vm55_vm0, %v671_v58, 0.0 }
 0x3bd   :  { %933 = vmatpush1.msra.mxu1 %v3456_v61  ;;  %v676_v60 = vrot.slane %v675_v59, 4 }
 0x3be   :  { %v2959_v43 = vpop.eup %2958  ;;  %934 = vmatprep.subr.mxu1 %v3462_v62 }
 0x3bf   :  { %435 = vrot.lane.b32.xlu0 %v2959_v43, %s3209_s12  ;;  %935 = vmatpush1.msra.mxu1 %v3468_v63  ;;  %v677_v61 = vadd.f32 %v676_v60, %v675_v59 }
 0x3c0   :  { %936 = vmatprep.subr.mxu1 %v3474_v0 }
 0x3c1   :  { %937 = vmatpush1.msra.mxu1 %v3480_v1  ;;  %v678_v62 = vrot.slane %v677_v61, 2 }
 0x3c2   :  { %938 = vmatprep.subr.mxu1 %v3486_v2 }
 0x3c3   :  { %939 = vmatpush1.msra.mxu1 %v3492_v3  ;;  %v679_v1 = vadd.f32 %v678_v62, %v677_v61 }
 0x3c4   :  { %940 = vmatprep.subr.mxu1 %v3498_v5  ;;  %v3800_v5 = vadd.f32 %v3605_v55, %v3333_v22  ;;  %v3813_v22 = vld [vmem:[%s4818_s7 + $0x1] sm:$0x1] }
 0x3c5   :  { %941 = vmatpush1.msra.mxu1 %v3504_v6  ;;  %v680_v2 = vrot.slane %v679_v1, 1  ;;  %v520_v55 = vmul.f32 0.0, %v3813_v22 }
 0x3c6   :  { %942 = vmatprep.subr.mxu1 %v3510_v7  ;;  %v3804_v7 = vadd.f32 %v3610_v15, %v3330_v20 }
 0x3c7   :  { %943 = vmatpush1.msra.mxu1 %v3518_v8  ;;  %v681_v3 = vadd.f32 %v680_v2, %v679_v1 }
 0x3c8   :  { %944 = vmatprep.subr.mxu1 %v3524_v9 }
 0x3c9   :  { %945 = vmatpush1.msra.mxu1 %v3529_v10 }
 0x3ca   :  { %946 = vmatprep.subr.mxu1 %v3534_v11 }
 0x3cb   :  { %947 = vmatpush1.msra.mxu1 %v3542_v12 }
 0x3cc   :  { %1315 = vmatprep.subr.mxu1 %v3622_v36 }
 0x413   :  { %v410_v51 = vpop.permute.xlu1 %409 }
 0x414   :  { %v412_v52 = vmul.f32 %v3736_v13, %v410_v51 }
 0x416   :  { %414 = vrot.lane.b32.xlu1 %v412_v52, %s3210_s0 }
 0x41a   :  { %214 = vrot.lane.b32.xlu1 %v3339_v28, %s3209_s12 }
 0x41e   :  { %848 = vrot.lane.b32.xlu1 %v695_v56, %s3210_s0 }
 0x431   :  { %v436_v63 = vpop.permute.xlu0 %435 }
 0x432   :  { %v3791_v0 = vmul.f32 %v2957_v27, %v436_v63 }
 0x434   :  { %4893 = vst [vmem:[#allocation33_spill] sm:$0xff] %v3791_v0  ;;  %440 = vrot.lane.b32.xlu0 %v3791_v0, %s3210_s0 }
 0x438   :  { %220 = vrot.lane.b32.xlu0 %v3339_v28, %s3210_s0 }
 0x43c   :  { %813 = vrot.lane.b32.xlu0 %v681_v3, %s3210_s0 }
 0x46c   :  { %v793_v6 = vpop.f32.mrf.mxu1 }
 0x46d   :  { %v798_v8 = vadd.f32 %v793_v6, %v3800_v5 }
 0x46e   :  { %v795_v9 = vpop.f32.mrf.mxu1 }
 0x46f   :  { %2960 = vtanh.f32 %v798_v8  ;;  %v799_v10 = vadd.f32 %v795_v9, %v3804_v7  ;;  %v2853_v45 = vmul.f32 -1.442695, %v798_v8 }
 0x471   :  { %2962 = vtanh.f32 %v799_v10  ;;  %v2854_v36 = vmul.f32 -1.442695, %v799_v10 }
 0x473   :  { %2964 = vpow2.f32 %v2854_v36 }
 0x47c   :  { %v2961_v11 = vpop.eup %2960 }
 0x47d   :  { %808 = vrot.lane.b32.xlu1 %v2961_v11, %s3208_s6 }
 0x47e   :  { %v2963_v12 = vpop.eup %2962 }
 0x47f   :  { %843 = vrot.lane.b32.xlu0 %v2963_v12, %s3208_s6 }
 0x480   :  { %v2965_v31 = vpop.eup %2964 }
 0x481   :  { %v838_v26 = vadd.f32 1.0, %v2965_v31 }
 0x488   :  { %v3815_v20 = vpop.permute.xlu1 %414 }
 0x489   :  { %4894 = vst [vmem:[#allocation34_spill] sm:$0xff] %v3815_v20  ;;  %418 = vst.msk [vmem:[#allocation2 + $0x8] sm:$0xff] %vm55_vm0, %v3815_v20 }
 0x48c   :  { %v3820_v15 = vpop.permute.xlu1 %214 }
 0x48d   :  { %v524_v29 = vadd.f32 %v520_v55, %v3820_v15 }
 0x48f   :  { %v538_v13 = vrot.slane %v524_v29, %v3327_v19 }
 0x490   :  { %v3828_v39 = vld [vmem:[#allocation2 + $0x8] sm:$0xff]  ;;  %v849_v46 = vpop.permute.xlu1 %848 }
 0x491   :  { %v528_v24 = vmul.f32 %v3826_v50, %v3828_v39 }
 0x493   :  { %v548_v37 = vadd.f32 %v538_v13, %v528_v24 }
 0x495   :  { %2966 = vtanh.f32 %v548_v37 }
 0x496   :  { %2968 = vrcp.f32 %v838_v26 }
 0x4a2   :  { %v2967_v17 = vpop.eup %2966 }
 0x4a3   :  { %v556_v33 = vmul.f32 %v2967_v17, %v3836_v25  ;;  %v3860_v44 = vpop.eup %2968 }
 0x4a4   :  { %v851_v47 = vmul.f32 %v3860_v44, %v849_v46 }
 0x4a5   :  { %v562_v14 = vsel %vm55_vm0, %v556_v33, 0.0 }
 0x4a6   :  { %v441_v42 = vpop.permute.xlu0 %440  ;;  %563 = vadd.xlane.f32.xlu1 %v562_v14 }
 0x4a7   :  { %444 = vst.msk [vmem:[#allocation2 + $0x18] sm:$0xff] %vm55_vm0, %v441_v42 }
 0x4aa   :  { %v3847_v32 = vpop.permute.xlu0 %220 }
 0x4ab   :  { %4895 = vst [vmem:[#allocation35_spill] sm:$0xff] %v3847_v32  ;;  %v526_v34 = vadd.f32 %v522_v40, %v3847_v32 }
 0x4ad   :  { %v546_v38 = vrot.slane %v526_v34, %v3327_v19 }
 0x4ae   :  { %v3855_v27 = vld [vmem:[#allocation2 + $0x18] sm:$0xff]  ;;  %v814_v56 = vpop.permute.xlu0 %813 }
 0x4af   :  { %v530_v4 = vmul.f32 %v3853_v35, %v3855_v27 }
 0x4b1   :  { %v550_v43 = vadd.f32 %v546_v38, %v530_v4 }
 0x4b3   :  { %2970 = vtanh.f32 %v550_v43 }
 0x4b4   :  { %2972 = vpow2.f32 %v2853_v45 }
 0x4b7   :  { %853 = vrot.lane.b32.xlu1 %v851_v47, %s3209_s12 }
 0x4c0   :  { %v2971_v49 = vpop.eup %2970 }
 0x4c1   :  { %v558_v51 = vmul.f32 %v2971_v49, %v3867_v48  ;;  %v2973_v52 = vpop.eup %2972 }
 0x4c2   :  { %v803_v54 = vadd.f32 1.0, %v2973_v52 }
 0x4c3   :  { %v568_v53 = vsel %vm55_vm0, %v558_v51, 0.0 }
 0x4c4   :  { %569 = vadd.xlane.f32.xlu0 %v568_v53  ;;  %2974 = vrcp.f32 %v803_v54 }
 0x4d1   :  { %v3871_v57 = vpop.eup %2974 }
 0x4d2   :  { %v816_v58 = vmul.f32 %v3871_v57, %v814_v56 }
 0x4da   :  { %818 = vrot.lane.b32.xlu0 %v816_v58, %s3209_s12 }
 0x4ef   :  { %v809_v59 = vpop.permute.xlu1 %808 }
 0x4f0   :  { %v811_v11 = vmul.f32 %v3871_v57, %v809_v59 }
 0x4f1   :  { %v844_v60 = vpop.permute.xlu0 %843 }
 0x4f2   :  { %v846_v62 = vmul.f32 %v3860_v44, %v844_v60 }
 0x52f   :  { %v564_v61 = vpop.xlane.xlu1 %563 }
 0x530   :  { %v577_v2 = vrot.slane %v564_v61, 4 }
 0x532   :  { %v578_v6 = vmax.f32 %v564_v61, %v577_v2 }
 0x533   :  { %v854_v63 = vpop.permute.xlu1 %853 }
 0x534   :  { %v856_v1 = vadd.f32 %v854_v63, %v846_v62  ;;  %v579_v8 = vrot.slane %v578_v6, 2 }
 0x536   :  { %2976 = vtanh.f32 %v856_v1  ;;  %868 = vst.msk [vmem:[#allocation3 + $0x10] sm:$0x1] %vm832_vm3, %v856_v1  ;;  %v580_v10 = vmax.f32 %v578_v6, %v579_v8 }
 0x538   :  { %v581_v55 = vrot.slane %v580_v10, 1 }
 0x53a   :  { %v582_v29 = vmax.f32 %v580_v10, %v581_v55 }
 0x53c   :  { %v596_v24 = vsub.f32 %v564_v61, %v582_v29 }
 0x53e   :  { %v601_v13 = vmul.f32 1.442695, %v596_v24 }
 0x543   :  { %v2977_v3 = vpop.eup %2976 }
 0x544   :  { %859 = vrot.lane.b32.xlu1 %v2977_v3, %s3209_s12 }
 0x54d   :  { %v570_v9 = vpop.xlane.xlu0 %569 }
 0x54e   :  { %v589_v31 = vrot.slane %v570_v9, 4 }
 0x550   :  { %v590_v26 = vmax.f32 %v570_v9, %v589_v31 }
 0x551   :  { %v819_v12 = vpop.permute.xlu0 %818 }
 0x552   :  { %v821_v36 = vadd.f32 %v819_v12, %v811_v11  ;;  %v591_v17 = vrot.slane %v590_v26, 2 }
 0x554   :  { %2978 = vtanh.f32 %v821_v36  ;;  %834 = vst.msk [vmem:[#allocation3] sm:$0x1] %vm832_vm3, %v821_v36  ;;  %v592_v33 = vmax.f32 %v590_v26, %v591_v17 }
 0x555   :  { %2980 = vpow2.f32 %v601_v13 }
 0x556   :  { %v593_v42 = vrot.slane %v592_v33, 1 }
 0x558   :  { %v594_v34 = vmax.f32 %v592_v33, %v593_v42 }
 0x55a   :  { %v598_v38 = vsub.f32 %v570_v9, %v594_v34 }
 0x55c   :  { %v605_v45 = vmul.f32 1.442695, %v598_v38  ;;  %v4897_v38 = vld [vmem:[#allocation12_spill] sm:$0xff] }
 0x55e   :  { %2982 = vpow2.f32 %v605_v45 }
 0x561   :  { %v2979_v37 = vpop.eup %2978 }
 0x562   :  { %824 = vrot.lane.b32.xlu0 %v2979_v37, %s3209_s12  ;;  %v2981_v14 = vpop.eup %2980 }
 0x563   :  { %v613_v40 = vrot.slane %v2981_v14, 4 }
 0x565   :  { %v614_v4 = vadd.f32 %v2981_v14, %v613_v40 }
 0x567   :  { %v615_v43 = vrot.slane %v614_v4, 2 }
 0x569   :  { %v616_v46 = vadd.f32 %v615_v43, %v614_v4 }
 0x56b   :  { %v617_v47 = vrot.slane %v616_v46, 1  ;;  %v2983_v51 = vpop.eup %2982 }
 0x56c   :  { %v625_v52 = vrot.slane %v2983_v51, 4 }
 0x56d   :  { %v618_v49 = vadd.f32 %v617_v47, %v616_v46  ;;  %v516_v46 = vld [vmem:[#allocation3 + $0x8] sm:$0xff] }
 0x56e   :  { %v626_v53 = vadd.f32 %v2983_v51, %v625_v52 }
 0x56f   :  { %2984 = vrcp.f32 %v618_v49  ;;  %v518_v49 = vld [vmem:[#allocation3 + $0x18] sm:$0xff] }
 0x570   :  { %v627_v58 = vrot.slane %v626_v53, 2 }
 0x572   :  { %v628_v60 = vadd.f32 %v627_v58, %v626_v53  ;;  %v4898_v58 = vld [vmem:[#allocation11_spill] sm:$0xff] }
 0x574   :  { %v629_v62 = vrot.slane %v628_v60, 1 }
 0x576   :  { %v630_v1 = vadd.f32 %v629_v62, %v628_v60  ;;  %v4899_v60 = vld [vmem:[#allocation14_spill] sm:$0xff] }
 0x578   :  { %2986 = vrcp.f32 %v630_v1 }
 0x57c   :  { %v2985_v54 = vpop.eup %2984 }
 0x57d   :  { %v636_v56 = vmul.f32 %v2985_v54, %v2981_v14 }
 0x57f   :  { %v640_v59 = vmul.f32 %v636_v56, %v3828_v39  ;;  %v672_v47 = vmul.f32 %v636_v56, %v516_v46 }
 0x581   :  { %v650_v61 = vsel %vm55_vm0, %v640_v59, 0.0  ;;  %v1067_v59 = vmul.f32 %v3742_v18, %v4898_v58  ;;  %v4915_v58 = vld [vmem:[#allocation32_spill] sm:$0xff] }
 0x582   :  { %v651_v63 = vrot.slane %v650_v61, 4 }
 0x584   :  { %v652_v2 = vadd.f32 %v651_v63, %v650_v61 }
 0x585   :  { %v2987_v10 = vpop.eup %2986 }
 0x586   :  { %v653_v3 = vrot.slane %v652_v2, 2  ;;  %v638_v39 = vmul.f32 %v2987_v10, %v2983_v51 }
 0x588   :  { %v654_v6 = vadd.f32 %v653_v3, %v652_v2  ;;  %v642_v36 = vmul.f32 %v638_v39, %v3855_v27  ;;  %v1069_v27 = vmul.f32 %v3726_v41, %v3553_v21  ;;  %v682_v21 = vsel %vm55_vm0, %v672_v47, 0.0 }
 0x589   :  { %v674_v41 = vmul.f32 %v638_v39, %v518_v49  ;;  %v683_v51 = vrot.slane %v682_v21, 4  ;;  %v1078_v3 = vrot.slane %v1067_v59, %v3327_v19  ;;  %v4909_v49 = vld [vmem:[#allocation25_spill] sm:$0xff] }
 0x58a   :  { %v655_v8 = vrot.slane %v654_v6, 1  ;;  %v664_v29 = vsel %vm55_vm0, %v642_v36, 0.0  ;;  %v1086_v42 = vrot.slane %v1069_v27, %v3327_v19  ;;  %v4904_v27 = vld [vmem:[#allocation20_spill] sm:$0xff] }
 0x58b   :  { %v665_v24 = vrot.slane %v664_v29, 4  ;;  %v696_v54 = vsel %vm55_vm0, %v674_v41, 0.0  ;;  %v684_v1 = vadd.f32 %v683_v51, %v682_v21  ;;  %v1095_v39 = vadd.f32 %v1078_v3, %v3339_v28  ;;  %v4910_v21 = vld [vmem:[#allocation26_spill] sm:$0xff]  ;;  %v4911_v41 = vld [vmem:[#allocation27_spill] sm:$0xff]  ;;  %v4912_v51 = vld [vmem:[#allocation28_spill] sm:$0xff] }
 0x58c   :  { %v3884_v12 = vadd.f32 %v655_v8, %v654_v6  ;;  %v1097_v40 = vadd.f32 %v1086_v42, %v3555_v23  ;;  %v697_v2 = vrot.slane %v696_v54, 4 }
 0x58d   :  { %v666_v13 = vadd.f32 %v665_v24, %v664_v29  ;;  %v4900_v24 = vld [vmem:[#allocation17_spill] sm:$0xff] }
 0x58e   :  { %v698_v10 = vadd.f32 %v697_v2, %v696_v54  ;;  %v4914_v54 = vld [vmem:[#allocation31_spill] sm:$0xff] }
 0x58f   :  { %v667_v37 = vrot.slane %v666_v13, 2 }
 0x590   :  { %v699_v29 = vrot.slane %v698_v10, 2 }
 0x591   :  { %v668_v31 = vadd.f32 %v667_v37, %v666_v13  ;;  %v4901_v37 = vld [vmem:[#allocation18_spill] sm:$0xff] }
 0x592   :  { %v700_v42 = vadd.f32 %v699_v29, %v698_v10 }
 0x593   :  { %v669_v17 = vrot.slane %v668_v31, 1 }
 0x594   :  { %v701_v47 = vrot.slane %v700_v42, 1 }
 0x595   :  { %v3893_v33 = vadd.f32 %v669_v17, %v668_v31  ;;  %v4903_v17 = vld [vmem:[#allocation19_spill] sm:$0xff] }
 0x5b6   :  { %v860_v9 = vpop.permute.xlu1 %859 }
 0x5b7   :  { %v862_v11 = vmul.f32 %v3860_v44, %v860_v9  ;;  %v685_v9 = vrot.slane %v684_v1, 2 }
 0x5b9   :  { %864 = vrot.lane.b32.xlu1 %v862_v11, %s3210_s0  ;;  %v2896_v55 = vpack.i.bf16 %v3884_v12, %v862_v11  ;;  %v686_v36 = vadd.f32 %v685_v9, %v684_v1 }
 0x5bd   :  { %2897 = vrot.lane.b32.xlu1 %v2896_v55, %s3208_s6 }
 0x5d4   :  { %v825_v26 = vpop.permute.xlu0 %824 }
 0x5d5   :  { %v827_v44 = vmul.f32 %v3871_v57, %v825_v26  ;;  %v4896_v57 = vld [vmem:[#allocation8_spill] sm:$0xff]  ;;  %v4902_v26 = vld [vmem:[#allocation13_spill] sm:$0xff] }
 0x5d6   :  { %v1114_v4 = vrot.slane %v1097_v40, %v4896_v57  ;;  %v1106_v31 = vrot.slane %v1095_v39, %v4896_v57 }
 0x5d7   :  { %829 = vrot.lane.b32.xlu0 %v827_v44, %s3210_s0 }
 0x5db   :  { %878 = vrot.lane.b32.xlu0 %v3893_v33, %s3209_s12 }
 0x62b   :  { %v865_v14 = vpop.permute.xlu1 %864 }
 0x62c   :  { %867 = vst.msk [vmem:[#allocation2 + $0x10] sm:$0x1] %vm832_vm3, %v865_v14  ;;  %v687_v14 = vrot.slane %v686_v36, 1 }
 0x62e   :  { %v688_v46 = vadd.f32 %v687_v14, %v686_v36 }
 0x62f   :  { %v2898_v53 = vpop.permute.xlu1 %2897 }
 0x630   :  { %v2899_v62 = vunpack.i.l.bf16 %v2898_v53  ;;  %v2900_v8 = vunpack.i.h.bf16 %v2898_v53  ;;  %v4913_v53 = vld [vmem:[#allocation30_spill] sm:$0xff] }
 0x633   :  { %v3902_v34 = vld [vmem:[#allocation2 + $0x10] sm:$0xff] }
 0x634   :  { %v1101_v43 = vmul.f32 %v4897_v38, %v3902_v34  ;;  %v4906_v38 = vld [vmem:[#allocation22_spill] sm:$0xff] }
 0x636   :  { %v1121_v45 = vadd.f32 %v1114_v4, %v1101_v43  ;;  %v4905_v4 = vld [vmem:[#allocation21_spill] sm:$0xff]  ;;  %v4907_v43 = vld [vmem:[#allocation23_spill] sm:$0xff] }
 0x638   :  { %2988 = vtanh.f32 %v1121_v45  ;;  %v4908_v45 = vld [vmem:[#allocation24_spill] sm:$0xff] }
 0x645   :  { %v2989_v52 = vpop.eup %2988 }
 0x646   :  { %v1129_v61 = vmul.f32 %v2989_v52, %v4899_v60  ;;  %v702_v52 = vadd.f32 %v701_v47, %v700_v42  ;;  %v4916_v60 = vld [vmem:[#allocation15_spill] sm:$0xff] }
 0x648   :  { %v1137_v63 = vsel %vm55_vm0, %v1129_v61, 0.0 }
 0x649   :  { %v830_v56 = vpop.permute.xlu0 %829  ;;  %1138 = vadd.xlane.f32.xlu1 %v1137_v63 }
 0x64a   :  { %833 = vst.msk [vmem:[#allocation2] sm:$0x1] %vm832_vm3, %v830_v56  ;;  %v872_v6 = vsel %vm55_vm0, %v830_v56, %v2899_v62 }
 0x64b   :  { %v881_v11 = vsel %vm279_vm2, %v872_v6, %v2900_v8 }
 0x64d   :  { %v879_v18 = vpop.permute.xlu0 %878 }
 0x64e   :  { %v883_v55 = vsel %vm882_vm4, %v881_v11, %v879_v18 }
 0x64f   :  { %981 = vmatmul.mubr.f32.vlgmr.msra.gmra.mxu1 %v883_v55 }
 0x650   :  { %1316 = vmatpush1.msra.mxu1 %v4900_v24  ;;  %1363 = vmatprep.mubr.f32.mxu1 %v4892_v16 }
 0x651   :  { %v3921_v13 = vld [vmem:[#allocation2] sm:$0xff]  ;;  %1317 = vmatprep.subr.mxu1 %v4901_v37 }
 0x652   :  { %v1099_v44 = vmul.f32 %v4902_v26, %v3921_v13  ;;  %1318 = vmatpush1.msra.mxu1 %v4903_v17 }
 0x653   :  { %1319 = vmatprep.subr.mxu1 %v4904_v27  ;;  %v4917_v27 = vld [vmem:[#allocation16_spill] sm:$0xff] }
 0x654   :  { %v1119_v40 = vadd.f32 %v1106_v31, %v1099_v44  ;;  %1320 = vmatpush1.msra.mxu1 %v4905_v4 }
 0x655   :  { %1321 = vmatprep.subr.mxu1 %v4906_v38  ;;  %v4918_v38 = vld [vmem:[#allocation29_spill] sm:$0xff] }
 0x656   :  { %2990 = vtanh.f32 %v1119_v40  ;;  %1322 = vmatpush1.msra.mxu1 %v4907_v43 }
 0x657   :  { %1323 = vmatprep.subr.mxu1 %v4908_v45 }
 0x658   :  { %1324 = vmatpush1.msra.mxu1 %v4909_v49 }
 0x659   :  { %1325 = vmatprep.subr.mxu1 %v4910_v21 }
 0x65a   :  { %1000 = vrot.lane.b32.xlu1 %v688_v46, %s3210_s0  ;;  %1326 = vmatpush1.msra.mxu1 %v4911_v41 }
 0x65b   :  { %1327 = vmatprep.subr.mxu1 %v4912_v51 }
 0x65c   :  { %1328 = vmatpush1.msra.mxu1 %v4913_v53 }
 0x65d   :  { %1329 = vmatprep.subr.mxu1 %v4914_v54 }
 0x65e   :  { %1034 = vrot.lane.b32.xlu1 %v702_v52, %s3210_s0  ;;  %1330 = vmatpush1.msra.mxu1 %v4915_v58 }
 0x663   :  { %v2991_v59 = vpop.eup %2990 }
 0x664   :  { %v1127_v61 = vmul.f32 %v2991_v59, %v4916_v60 }
 0x666   :  { %v1131_v62 = vsel %vm55_vm0, %v1127_v61, 0.0 }
 0x667   :  { %1132 = vadd.xlane.f32.xlu0 %v1131_v62 }
 0x6d2   :  { %v1139_v63 = vpop.xlane.xlu1 %1138 }
 0x6d3   :  { %v1155_v1 = vrot.slane %v1139_v63, 4 }
 0x6d5   :  { %v1156_v2 = vmax.f32 %v1139_v63, %v1155_v1 }
 0x6d7   :  { %v1157_v56 = vrot.slane %v1156_v2, 2 }
 0x6d9   :  { %v1158_v3 = vmax.f32 %v1156_v2, %v1157_v56  ;;  %v1001_v56 = vpop.permute.xlu1 %1000 }
 0x6db   :  { %v1159_v6 = vrot.slane %v1158_v3, 1 }
 0x6dd   :  { %v1160_v8 = vmax.f32 %v1158_v3, %v1159_v6 }
 0x6df   :  { %v1169_v9 = vsub.f32 %v1139_v63, %v1160_v8 }
 0x6e1   :  { %v1175_v10 = vmul.f32 1.442695, %v1169_v9 }
 0x6e3   :  { %2992 = vpow2.f32 %v1175_v10 }
 0x6f0   :  { %v2993_v18 = vpop.eup %2992  ;;  %v1133_v46 = vpop.xlane.xlu0 %1132 }
 0x6f1   :  { %v1191_v11 = vrot.slane %v2993_v18, 4  ;;  %v1143_v21 = vrot.slane %v1133_v46, 4 }
 0x6f3   :  { %v1192_v39 = vadd.f32 %v2993_v18, %v1191_v11  ;;  %v1144_v51 = vmax.f32 %v1133_v46, %v1143_v21 }
 0x6f5   :  { %v1193_v55 = vrot.slane %v1192_v39, 2  ;;  %v1145_v53 = vrot.slane %v1144_v51, 2 }
 0x6f7   :  { %v1194_v36 = vadd.f32 %v1193_v55, %v1192_v39  ;;  %v1146_v60 = vmax.f32 %v1144_v51, %v1145_v53 }
 0x6f9   :  { %v1195_v29 = vrot.slane %v1194_v36, 1  ;;  %v1147_v1 = vrot.slane %v1146_v60, 1 }
 0x6fb   :  { %v1196_v24 = vadd.f32 %v1195_v29, %v1194_v36  ;;  %v1148_v2 = vmax.f32 %v1146_v60, %v1147_v1  ;;  %v1065_v1 = vld [vmem:[#allocation3 + $0x10] sm:$0xff] }
 0x6fd   :  { %2994 = vrcp.f32 %v1196_v24  ;;  %v1167_v3 = vsub.f32 %v1133_v46, %v1148_v2 }
 0x6ff   :  { %v1171_v8 = vmul.f32 1.442695, %v1167_v3 }
 0x70a   :  { %v2995_v37 = vpop.eup %2994 }
 0x70b   :  { %v3944_v31 = vmul.f32 %v2995_v37, %v2993_v18  ;;  %v1035_v18 = vpop.permute.xlu1 %1034 }
 0x70d   :  { %v1213_v26 = vmul.f32 %v3944_v31, %v3902_v34  ;;  %v1245_v2 = vmul.f32 %v3944_v31, %v1065_v1 }
 0x70f   :  { %v982_v44 = vpop.f32.mrf.mxu1  ;;  %v1229_v17 = vsel %vm55_vm0, %v1213_v26, 0.0  ;;  %v1261_v3 = vsel %vm55_vm0, %v1245_v2, 0.0 }
 0x710   :  { %v983_v14 = vadd.f32 %v982_v44, %v4917_v27  ;;  %v1230_v42 = vrot.slane %v1229_v17, 4 }
 0x711   :  { %v984_v40 = vpop.f32.mrf.mxu1 }
 0x712   :  { %v2855_v4 = vmul.f32 -1.442695, %v983_v14  ;;  %2996 = vtanh.f32 %v983_v14  ;;  %v985_v43 = vadd.f32 %v984_v40, %v4918_v38  ;;  %v1231_v45 = vadd.f32 %v1230_v42, %v1229_v17 }
 0x714   :  { %2998 = vpow2.f32 %v2855_v4  ;;  %v2856_v47 = vmul.f32 -1.442695, %v985_v43  ;;  %v1232_v49 = vrot.slane %v1231_v45, 2 }
 0x715   :  { %3000 = vtanh.f32 %v985_v43 }
 0x716   :  { %3002 = vpow2.f32 %v2856_v47  ;;  %v1233_v34 = vadd.f32 %v1232_v49, %v1231_v45 }
 0x718   :  { %v1234_v41 = vrot.slane %v1233_v34, 1 }
 0x71a   :  { %v3951_v52 = vadd.f32 %v1234_v41, %v1233_v34 }
 0x71c   :  { %1276 = vrot.lane.b32.xlu0 %v3951_v52, %s3210_s0 }
 0x71f   :  { %v2997_v54 = vpop.eup %2996 }
 0x720   :  { %995 = vrot.lane.b32.xlu0 %v2997_v54, %s3208_s6 }
 0x721   :  { %v2999_v58 = vpop.eup %2998 }
 0x722   :  { %v3001_v59 = vpop.eup %3000  ;;  %v990_v61 = vadd.f32 1.0, %v2999_v58 }
 0x723   :  { %v3003_v62 = vpop.eup %3002  ;;  %1029 = vrot.lane.b32.xlu1 %v3001_v59, %s3208_s6 }
 0x724   :  { %3004 = vrcp.f32 %v990_v61  ;;  %v1024_v63 = vadd.f32 1.0, %v3003_v62  ;;  %v1063_v62 = vld [vmem:[#allocation3] sm:$0xff] }
 0x726   :  { %3006 = vrcp.f32 %v1024_v63 }
 0x727   :  { %3008 = vpow2.f32 %v1171_v8 }
 0x731   :  { %v3005_v6 = vpop.eup %3004 }
 0x732   :  { %v1003_v9 = vmul.f32 %v3005_v6, %v1001_v56 }
 0x733   :  { %v3007_v10 = vpop.eup %3006 }
 0x734   :  { %1005 = vrot.lane.b32.xlu0 %v1003_v9, %s3209_s12  ;;  %v1037_v11 = vmul.f32 %v3007_v10, %v1035_v18  ;;  %v3009_v39 = vpop.eup %3008  ;;  %v1262_v9 = vrot.slane %v1261_v3, 4 }
 0x735   :  { %v1179_v55 = vrot.slane %v3009_v39, 4 }
 0x736   :  { %1039 = vrot.lane.b32.xlu1 %v1037_v11, %s3209_s12  ;;  %v1263_v11 = vadd.f32 %v1262_v9, %v1261_v3 }
 0x737   :  { %v1180_v36 = vadd.f32 %v3009_v39, %v1179_v55 }
 0x738   :  { %v1264_v55 = vrot.slane %v1263_v11, 2 }
 0x739   :  { %v1181_v29 = vrot.slane %v1180_v36, 2 }
 0x73b   :  { %v1182_v24 = vadd.f32 %v1181_v29, %v1180_v36  ;;  %v1265_v29 = vadd.f32 %v1264_v55, %v1263_v11 }
 0x73d   :  { %v1183_v37 = vrot.slane %v1182_v24, 1  ;;  %v1266_v31 = vrot.slane %v1265_v29, 1 }
 0x73f   :  { %v1184_v26 = vadd.f32 %v1183_v37, %v1182_v24 }
 0x741   :  { %3010 = vrcp.f32 %v1184_v26 }
 0x74e   :  { %v3011_v44 = vpop.eup %3010 }
 0x74f   :  { %v1207_v17 = vmul.f32 %v3011_v44, %v3009_v39 }
 0x751   :  { %v1211_v14 = vmul.f32 %v1207_v17, %v3921_v13  ;;  %v1243_v63 = vmul.f32 %v1207_v17, %v1063_v62 }
 0x753   :  { %v1215_v42 = vsel %vm55_vm0, %v1211_v14, 0.0  ;;  %v1247_v56 = vsel %vm55_vm0, %v1243_v63, 0.0 }
 0x754   :  { %v1216_v40 = vrot.slane %v1215_v42, 4  ;;  %v1248_v8 = vrot.slane %v1247_v56, 4 }
 0x756   :  { %v1217_v4 = vadd.f32 %v1216_v40, %v1215_v42  ;;  %v1249_v18 = vadd.f32 %v1248_v8, %v1247_v56  ;;  %v1267_v42 = vadd.f32 %v1266_v31, %v1265_v29 }
 0x758   :  { %v1218_v43 = vrot.slane %v1217_v4, 2  ;;  %v1250_v39 = vrot.slane %v1249_v18, 2 }
 0x75a   :  { %v1219_v45 = vadd.f32 %v1218_v43, %v1217_v4  ;;  %v1251_v36 = vadd.f32 %v1250_v39, %v1249_v18 }
 0x75c   :  { %v1220_v46 = vrot.slane %v1219_v45, 1  ;;  %v1252_v26 = vrot.slane %v1251_v36, 1 }
 0x75e   :  { %v3961_v47 = vadd.f32 %v1220_v46, %v1219_v45  ;;  %v1253_v14 = vadd.f32 %v1252_v26, %v1251_v36 }
 0x78e   :  { %v1277_v49 = vpop.permute.xlu0 %1276 }
 0x78f   :  { %v1279_v21 = vsel %vm55_vm0, %v3961_v47, %v1277_v49 }
 0x790   :  { %2857 = vmatmul.mubr.msk.f32.vlgmr.msra.gmra.mxu1 %vm279_vm2, %v1279_v21  ;;  %v1068_v21 = vmul.f32 %v3884_v12, %v3813_v22 }
 0x791   :  { %1943 = vmatprep.mubr.f32.mxu1 %v4892_v16 }
 0x792   :  { %v996_v34 = vpop.permute.xlu0 %995 }
 0x793   :  { %v998_v13 = vmul.f32 %v3005_v6, %v996_v34  ;;  %v1070_v34 = vmul.f32 %v3893_v33, %v3842_v30 }
 0x795   :  { %v1030_v41 = vpop.permute.xlu1 %1029 }
 0x796   :  { %v1032_v53 = vmul.f32 %v3007_v10, %v1030_v41 }
 0x7a6   :  { %v1006_v51 = vpop.permute.xlu0 %1005 }
 0x7a7   :  { %v1008_v54 = vadd.f32 %v1006_v51, %v998_v13  ;;  %v1082_v13 = vrot.slane %v1068_v21, %v3327_v19 }
 0x7a8   :  { %v1040_v58 = vpop.permute.xlu1 %1039 }
 0x7a9   :  { %3012 = vtanh.f32 %v1008_v54  ;;  %1020 = vst.msk [vmem:[#allocation3 + $0x8] sm:$0x1] %vm832_vm3, %v1008_v54  ;;  %v1042_v59 = vadd.f32 %v1040_v58, %v1032_v53  ;;  %v1090_v53 = vrot.slane %v1070_v34, %v3327_v19  ;;  %v1096_v54 = vadd.f32 %v1082_v13, %v3820_v15  ;;  %v4060_v34 = vld [vmem:[%s4814_s3 + $0xd0] sm:$0xff] }
 0x7ab   :  { %3014 = vtanh.f32 %v1042_v59  ;;  %1054 = vst.msk [vmem:[#allocation3 + $0x18] sm:$0x1] %vm832_vm3, %v1042_v59  ;;  %v1098_v58 = vadd.f32 %v1090_v53, %v3847_v32  ;;  %v1110_v30 = vrot.slane %v1096_v54, %v4896_v57  ;;  %v4073_v53 = vld [vmem:[%s4814_s3 + $0xc0] sm:$0xff] }
 0x7b6   :  { %v3013_v60 = vpop.eup %3012 }
 0x7b7   :  { %1011 = vrot.lane.b32.xlu0 %v3013_v60, %s3209_s12  ;;  %v1118_v60 = vrot.slane %v1098_v58, %v4896_v57  ;;  %v4079_v58 = vld [vmem:[%s4814_s3 + $0xb8] sm:$0xff] }
 0x7b8   :  { %v3015_v61 = vpop.eup %3014 }
 0x7b9   :  { %1045 = vrot.lane.b32.xlu1 %v3015_v61, %s3209_s12 }
 0x829   :  { %v1012_v24 = vpop.permute.xlu0 %1011 }
 0x82a   :  { %v1014_v37 = vmul.f32 %v3005_v6, %v1012_v24 }
 0x82b   :  { %v1046_v44 = vpop.permute.xlu1 %1045 }
 0x82c   :  { %v3974_v17 = vmul.f32 %v3007_v10, %v1046_v44  ;;  %1016 = vrot.lane.b32.xlu0 %v1014_v37, %s3210_s0 }
 0x82e   :  { %4919 = vst [vmem:[#allocation8_spill] sm:$0xff] %v3974_v17  ;;  %1050 = vrot.lane.b32.xlu1 %v3974_v17, %s3210_s0 }
 0x830   :  { %1391 = vrot.lane.b32.xlu0 %v1253_v14, %s3210_s0 }
 0x832   :  { %1426 = vrot.lane.b32.xlu1 %v1267_v42, %s3210_s0 }
 0x850   :  { %v1365_v40 = vpop.f32.mrf.mxu1 }
 0x851   :  { %v1372_v4 = vrot.slane %v1365_v40, 7 }
 0x852   :  { %v1367_v43 = vpop.f32.mrf.mxu1 }
 0x853   :  { %v1376_v6 = vadd.f32 %v1372_v4, %v3800_v5  ;;  %v1373_v45 = vrot.slane %v1367_v43, 7 }
 0x855   :  { %3016 = vtanh.f32 %v1376_v6  ;;  %v1377_v10 = vadd.f32 %v1373_v45, %v3804_v7  ;;  %v2858_v63 = vmul.f32 -1.442695, %v1376_v6  ;;  %v4031_v6 = vld [vmem:[%s4814_s3 + $0xf8] sm:$0xff]  ;;  %v4036_v45 = vld [vmem:[%s4814_s3 + $0xf0] sm:$0xff] }
 0x856   :  { %1496 = vmatprep.subr.mxu0 %v4031_v6 }
 0x857   :  { %3018 = vtanh.f32 %v1377_v10  ;;  %v2859_v22 = vmul.f32 -1.442695, %v1377_v10  ;;  %v4041_v10 = vld [vmem:[%s4814_s3 + $0xe8] sm:$0xff]  ;;  %1497 = vmatpush1.msra.mxu0 %v4036_v45 }
 0x858   :  { %1498 = vmatprep.subr.mxu0 %v4041_v10 }
 0x859   :  { %3020 = vpow2.f32 %v2859_v22 }
 0x862   :  { %v3017_v46 = vpop.eup %3016 }
 0x863   :  { %1386 = vrot.lane.b32.xlu0 %v3017_v46, %s3208_s6  ;;  %v4047_v46 = vld [vmem:[%s4814_s3 + $0xe0] sm:$0xff] }
 0x864   :  { %v3019_v49 = vpop.eup %3018  ;;  %1499 = vmatpush1.msra.mxu0 %v4047_v46 }
 0x865   :  { %1421 = vrot.lane.b32.xlu1 %v3019_v49, %s3208_s6  ;;  %v4053_v49 = vld [vmem:[%s4814_s3 + $0xd8] sm:$0xff] }
 0x866   :  { %v3021_v2 = vpop.eup %3020  ;;  %1500 = vmatprep.subr.mxu0 %v4053_v49 }
 0x867   :  { %v1416_v9 = vadd.f32 1.0, %v3021_v2  ;;  %1501 = vmatpush1.msra.mxu0 %v4060_v34  ;;  %v4113_v2 = vld [vmem:[%s4814_s3 + $0x90] sm:$0xff] }
 0x89e   :  { %v3989_v41 = vpop.permute.xlu0 %1016 }
 0x89f   :  { %4920 = vst [vmem:[#allocation12_spill] sm:$0xff] %v3989_v41  ;;  %1019 = vst.msk [vmem:[#allocation2 + $0x8] sm:$0x1] %vm832_vm3, %v3989_v41 }
 0x8a0   :  { %v1051_v51 = vpop.permute.xlu1 %1050 }
 0x8a1   :  { %1053 = vst.msk [vmem:[#allocation2 + $0x18] sm:$0x1] %vm832_vm3, %v1051_v51  ;;  %v4066_v51 = vld [vmem:[%s4814_s3 + $0xc8] sm:$0xff] }
 0x8a2   :  { %v1392_v36 = vpop.permute.xlu0 %1391  ;;  %1502 = vmatprep.subr.mxu0 %v4066_v51 }
 0x8a3   :  { %1503 = vmatpush1.msra.mxu0 %v4073_v53 }
 0x8a4   :  { %v1427_v39 = vpop.permute.xlu1 %1426  ;;  %1504 = vmatprep.subr.mxu0 %v4079_v58 }
 0x8a6   :  { %v3998_v12 = vld [vmem:[#allocation2 + $0x8] sm:$0xff] }
 0x8a7   :  { %v1100_v33 = vmul.f32 %v3826_v50, %v3998_v12 }
 0x8a8   :  { %v4003_v59 = vld [vmem:[#allocation2 + $0x18] sm:$0xff] }
 0x8a9   :  { %v1120_v61 = vadd.f32 %v1110_v30, %v1100_v33  ;;  %v1102_v62 = vmul.f32 %v3853_v35, %v4003_v59  ;;  %v4088_v33 = vld [vmem:[%s4814_s3 + $0xb0] sm:$0xff] }
 0x8aa   :  { %1505 = vmatpush1.msra.mxu0 %v4088_v33 }
 0x8ab   :  { %3022 = vtanh.f32 %v1120_v61  ;;  %v1122_v1 = vadd.f32 %v1118_v60, %v1102_v62  ;;  %v4094_v60 = vld [vmem:[%s4814_s3 + $0xa8] sm:$0xff]  ;;  %v4100_v61 = vld [vmem:[%s4814_s3 + $0xa0] sm:$0xff]  ;;  %v4106_v62 = vld [vmem:[%s4814_s3 + $0x98] sm:$0xff] }
 0x8ac   :  { %1506 = vmatprep.subr.mxu0 %v4094_v60 }
 0x8ad   :  { %3024 = vtanh.f32 %v1122_v1  ;;  %1507 = vmatpush1.msra.mxu0 %v4100_v61 }
 0x8ae   :  { %3026 = vpow2.f32 %v2858_v63  ;;  %1508 = vmatprep.subr.mxu0 %v4106_v62 }
 0x8af   :  { %3028 = vrcp.f32 %v1416_v9  ;;  %1509 = vmatpush1.msra.mxu0 %v4113_v2 }
 0x8b8   :  { %v3023_v56 = vpop.eup %3022 }
 0x8b9   :  { %v1128_v3 = vmul.f32 %v3023_v56, %v3836_v25  ;;  %v4119_v56 = vld [vmem:[%s4814_s3 + $0x88] sm:$0xff] }
 0x8ba   :  { %v3025_v8 = vpop.eup %3024  ;;  %1510 = vmatprep.subr.mxu0 %v4119_v56 }
 0x8bb   :  { %v3027_v50 = vpop.eup %3026  ;;  %v1134_v18 = vsel %vm55_vm0, %v1128_v3, 0.0  ;;  %v1130_v57 = vmul.f32 %v3025_v8, %v3867_v48  ;;  %v4125_v3 = vld [vmem:[%s4814_s3 + $0x80] sm:$0xff]  ;;  %v4131_v8 = vld [vmem:[%s4814_s3 + $0x78] sm:$0xff] }
 0x8bc   :  { %1135 = vadd.xlane.f32.xlu0 %v1134_v18  ;;  %v1381_v11 = vadd.f32 1.0, %v3027_v50  ;;  %v4012_v55 = vpop.eup %3028  ;;  %v4137_v18 = vld [vmem:[%s4814_s3 + $0x70] sm:$0xff]  ;;  %1511 = vmatpush1.msra.mxu0 %v4125_v3 }
 0x8bd   :  { %v1140_v35 = vsel %vm55_vm0, %v1130_v57, 0.0  ;;  %v1429_v25 = vmul.f32 %v4012_v55, %v1427_v39  ;;  %v4143_v57 = vld [vmem:[%s4814_s3 + $0x68] sm:$0xff]  ;;  %1512 = vmatprep.subr.mxu0 %v4131_v8 }
 0x8be   :  { %1141 = vadd.xlane.f32.xlu1 %v1140_v35  ;;  %3030 = vrcp.f32 %v1381_v11  ;;  %v4149_v35 = vld [vmem:[%s4814_s3 + $0x60] sm:$0xff]  ;;  %1513 = vmatpush1.msra.mxu0 %v4137_v18  ;;  %v4155_v11 = vld [vmem:[%s4814_s3 + $0x58] sm:$0xff] }
 0x8bf   :  { %1514 = vmatprep.subr.mxu0 %v4143_v57 }
 0x8c0   :  { %1515 = vmatpush1.msra.mxu0 %v4149_v35 }
 0x8c1   :  { %1516 = vmatprep.subr.mxu0 %v4155_v11 }
 0x8cb   :  { %v4015_v29 = vpop.eup %3030 }
 0x8cc   :  { %v1394_v24 = vmul.f32 %v4015_v29, %v1392_v36 }
 0x8cf   :  { %1431 = vrot.lane.b32.xlu1 %v1429_v25, %s3209_s12 }
 0x8d2   :  { %1396 = vrot.lane.b32.xlu0 %v1394_v24, %s3209_s12 }
 0x8d5   :  { %v1387_v48 = vpop.permute.xlu0 %1386 }
 0x8d6   :  { %v1389_v31 = vmul.f32 %v4015_v29, %v1387_v48 }
 0x8d7   :  { %v1422_v37 = vpop.permute.xlu1 %1421 }
 0x8d8   :  { %v1424_v42 = vmul.f32 %v4012_v55, %v1422_v37 }
 0x945   :  { %v4020_v26 = vpop.xlane.xlu0 %1135 }
 0x946   :  { %v1149_v21 = vrot.slane %v4020_v26, 4 }
 0x947   :  { %v4022_v44 = vpop.xlane.xlu1 %1141 }
 0x948   :  { %v1150_v22 = vmax.f32 %v4020_v26, %v1149_v21  ;;  %v1161_v30 = vrot.slane %v4022_v44, 4 }
 0x949   :  { %v1397_v14 = vpop.permute.xlu0 %1396 }
 0x94a   :  { %v1399_v40 = vadd.f32 %v1397_v14, %v1389_v31  ;;  %v1151_v63 = vrot.slane %v1150_v22, 2  ;;  %v1162_v1 = vmax.f32 %v4022_v44, %v1161_v30 }
 0x94b   :  { %v1432_v4 = vpop.permute.xlu1 %1431 }
 0x94c   :  { %3032 = vtanh.f32 %v1399_v40  ;;  %v1434_v43 = vadd.f32 %v1432_v4, %v1424_v42  ;;  %1412 = vst.msk [vmem:[#allocation3] sm:$0x2] %vm1410_vm5, %v1399_v40  ;;  %v1152_v50 = vmax.f32 %v1150_v22, %v1151_v63  ;;  %v1163_v9 = vrot.slane %v1162_v1, 2 }
 0x94e   :  { %3034 = vtanh.f32 %v1434_v43  ;;  %1446 = vst.msk [vmem:[#allocation3 + $0x10] sm:$0x2] %vm1410_vm5, %v1434_v43  ;;  %v1153_v39 = vrot.slane %v1152_v50, 1  ;;  %v1164_v36 = vmax.f32 %v1162_v1, %v1163_v9 }
 0x950   :  { %v1154_v25 = vmax.f32 %v1152_v50, %v1153_v39  ;;  %v1165_v24 = vrot.slane %v1164_v36, 1 }
 0x952   :  { %v1168_v48 = vsub.f32 %v4020_v26, %v1154_v25  ;;  %v1166_v37 = vmax.f32 %v1164_v36, %v1165_v24 }
 0x954   :  { %v1173_v31 = vmul.f32 1.442695, %v1168_v48  ;;  %v1170_v14 = vsub.f32 %v4022_v44, %v1166_v37 }
 0x956   :  { %3036 = vpow2.f32 %v1173_v31  ;;  %v1177_v42 = vmul.f32 1.442695, %v1170_v14 }
 0x958   :  { %3038 = vpow2.f32 %v1177_v42 }
 0x959   :  { %v3033_v13 = vpop.eup %3032 }
 0x95a   :  { %1402 = vrot.lane.b32.xlu0 %v3033_v13, %s3209_s12 }
 0x95b   :  { %v3035_v54 = vpop.eup %3034 }
 0x95c   :  { %1437 = vrot.lane.b32.xlu1 %v3035_v54, %s3209_s12 }
 0x963   :  { %v3037_v40 = vpop.eup %3036 }
 0x964   :  { %v1185_v4 = vrot.slane %v3037_v40, 4 }
 0x965   :  { %v3039_v43 = vpop.eup %3038 }
 0x966   :  { %v1186_v21 = vadd.f32 %v3037_v40, %v1185_v4  ;;  %v1197_v13 = vrot.slane %v3039_v43, 4 }
 0x968   :  { %v1187_v54 = vrot.slane %v1186_v21, 2  ;;  %v1198_v22 = vadd.f32 %v3039_v43, %v1197_v13 }
 0x96a   :  { %v1188_v30 = vadd.f32 %v1187_v54, %v1186_v21  ;;  %v1199_v63 = vrot.slane %v1198_v22, 2  ;;  %v4192_v54 = vld [vmem:[%s4814_s3 + $0x38] sm:$0xff] }
 0x96c   :  { %v1189_v1 = vrot.slane %v1188_v30, 1  ;;  %v1200_v50 = vadd.f32 %v1199_v63, %v1198_v22  ;;  %v4199_v22 = vld [vmem:[%s4814_s3 + $0x30] sm:$0xff] }
 0x96e   :  { %v1190_v9 = vadd.f32 %v1189_v1, %v1188_v30  ;;  %v1201_v26 = vrot.slane %v1200_v50, 1  ;;  %v4204_v30 = vld [vmem:[%s4814_s3 + $0x28] sm:$0xff] }
 0x970   :  { %3040 = vrcp.f32 %v1190_v9  ;;  %v1202_v39 = vadd.f32 %v1201_v26, %v1200_v50  ;;  %v4211_v26 = vld [vmem:[%s4814_s3 + $0x20] sm:$0xff] }
 0x972   :  { %3042 = vrcp.f32 %v1202_v39  ;;  %v4216_v39 = vld [vmem:[%s4814_s3 + $0x18] sm:$0xff] }
 0x97d   :  { %v3041_v44 = vpop.eup %3040 }
 0x97e   :  { %v4162_v36 = vmul.f32 %v3041_v44, %v3037_v40  ;;  %v4175_v40 = vld [vmem:[%s4814_s3 + $0x50] sm:$0xff] }
 0x97f   :  { %v3043_v25 = vpop.eup %3042  ;;  %1517 = vmatpush1.msra.mxu0 %v4175_v40  ;;  %v4221_v44 = vld [vmem:[%s4814_s3 + $0x10] sm:$0xff] }
 0x980   :  { %v1212_v24 = vmul.f32 %v4162_v36, %v3998_v12  ;;  %v4166_v48 = vmul.f32 %v3043_v25, %v3039_v43  ;;  %v4180_v12 = vld [vmem:[%s4814_s3 + $0x48] sm:$0xff] }
 0x981   :  { %1518 = vmatprep.subr.mxu0 %v4180_v12 }
 0x982   :  { %v1222_v37 = vsel %vm55_vm0, %v1212_v24, 0.0  ;;  %v1214_v31 = vmul.f32 %v4166_v48, %v4003_v59  ;;  %v4187_v59 = vld [vmem:[%s4814_s3 + $0x40] sm:$0xff]  ;;  %v4227_v24 = vld [vmem:[%s4814_s3 + $0x8] sm:$0xff] }
 0x983   :  { %v1223_v14 = vrot.slane %v1222_v37, 4  ;;  %1519 = vmatpush1.msra.mxu0 %v4187_v59 }
 0x984   :  { %v1236_v42 = vsel %vm55_vm0, %v1214_v31, 0.0  ;;  %1520 = vmatprep.subr.mxu0 %v4192_v54  ;;  %v4234_v31 = vld [vmem:[%s4814_s3] sm:$0xff] }
 0x985   :  { %v1224_v4 = vadd.f32 %v1223_v14, %v1222_v37  ;;  %v1237_v21 = vrot.slane %v1236_v42, 4  ;;  %1521 = vmatpush1.msra.mxu0 %v4199_v22 }
 0x986   :  { %1522 = vmatprep.subr.mxu0 %v4204_v30 }
 0x987   :  { %v1225_v43 = vrot.slane %v1224_v4, 2  ;;  %v1238_v13 = vadd.f32 %v1237_v21, %v1236_v42  ;;  %1523 = vmatpush1.msra.mxu0 %v4211_v26 }
 0x988   :  { %1524 = vmatprep.subr.mxu0 %v4216_v39 }
 0x989   :  { %v1226_v63 = vadd.f32 %v1225_v43, %v1224_v4  ;;  %v1239_v1 = vrot.slane %v1238_v13, 2  ;;  %1525 = vmatpush1.msra.mxu0 %v4221_v44 }
 0x98a   :  { %1526 = vmatprep.subr.mxu0 %v4227_v24 }
 0x98b   :  { %v1227_v50 = vrot.slane %v1226_v63, 1  ;;  %v1240_v9 = vadd.f32 %v1239_v1, %v1238_v13  ;;  %1527 = vmatpush1.msra.mxu0 %v4234_v31 }
 0x98d   :  { %v4237_v42 = vadd.f32 %v1227_v50, %v1226_v63  ;;  %v1241_v21 = vrot.slane %v1240_v9, 1  ;;  %v4260_v63 = vld [vmem:[%s4818_s7 + $0x2] sm:$0x1] }
 0x98e   :  { %4923 = vst [vmem:[#allocation17_spill] sm:$0xff] %v4260_v63  ;;  %v1649_v1 = vmul.f32 %v4260_v63, %v3951_v52 }
 0x98f   :  { %v4246_v43 = vadd.f32 %v1241_v21, %v1240_v9 }
 0x991   :  { %4921 = vst [vmem:[#allocation11_spill] sm:$0xff] %v4246_v43 }
 0x9cc   :  { %v1403_v25 = vpop.permute.xlu0 %1402 }
 0x9cd   :  { %v1405_v37 = vmul.f32 %v4015_v29, %v1403_v25 }
 0x9ce   :  { %v1438_v14 = vpop.permute.xlu1 %1437 }
 0x9cf   :  { %v1440_v4 = vmul.f32 %v4012_v55, %v1438_v14  ;;  %1407 = vrot.lane.b32.xlu0 %v1405_v37, %s3210_s0  ;;  %v4253_v55 = vld [vmem:[%s4818_s7] sm:$0x1]  ;;  %v1666_v37 = vrot.slane %v1649_v1, %v3327_v19 }
 0x9d0   :  { %4922 = vst [vmem:[#allocation14_spill] sm:$0xff] %v4253_v55  ;;  %v1647_v13 = vmul.f32 %v4253_v55, %v3961_v47 }
 0x9d1   :  { %v2901_v29 = vpack.i.bf16 %v4237_v42, %v1440_v4  ;;  %1442 = vrot.lane.b32.xlu1 %v1440_v4, %s3210_s0  ;;  %v1677_v52 = vadd.f32 %v1666_v37, %v3555_v23 }
 0x9d2   :  { %v1658_v9 = vrot.slane %v1647_v13, %v3327_v19 }
 0x9d3   :  { %2902 = vrot.lane.b32.xlu0 %v2901_v29, %s3208_s6  ;;  %v4924_v29 = vld [vmem:[#allocation7_spill] sm:$0xff] }
 0x9d4   :  { %v1675_v47 = vadd.f32 %v1658_v9, %v3339_v28  ;;  %v4270_v20 = vsub.s32 2, %v4924_v29  ;;  %v4282_v9 = vld [vmem:[%s4816_s5] ss:$0 sm:$0xff] }
 0x9d5   :  { %1456 = vrot.lane.b32.xlu1 %v4246_v43, %s3209_s12  ;;  %4925 = vst [vmem:[#allocation18_spill] sm:$0xff] %v4282_v9 }
 0x9d6   :  { %v1686_v1 = vrot.slane %v1675_v47, %v4270_v20  ;;  %v4292_v47 = vld [vmem:[%s4816_s5 + $0x2] ss:$0 sm:$0xff] }
 0x9d7   :  { %4926 = vst [vmem:[#allocation13_spill] sm:$0xff] %v4292_v47 }
 0xa41   :  { %v1408_v50 = vpop.permute.xlu0 %1407 }
 0xa42   :  { %1411 = vst.msk [vmem:[#allocation2] sm:$0x2] %vm1410_vm5, %v1408_v50 }
 0xa43   :  { %v1443_v25 = vpop.permute.xlu1 %1442 }
 0xa44   :  { %1445 = vst.msk [vmem:[#allocation2 + $0x10] sm:$0x2] %vm1410_vm5, %v1443_v25 }
 0xa45   :  { %v2903_v14 = vpop.permute.xlu0 %2902 }
 0xa46   :  { %v2905_v4 = vunpack.i.h.bf16 %v2903_v14  ;;  %v2904_v21 = vunpack.i.l.bf16 %v2903_v14 }
 0xa47   :  { %v1457_v13 = vpop.permute.xlu1 %1456 }
 0xa48   :  { %v1450_v41 = vsel %vm55_vm0, %v1408_v50, %v2904_v21  ;;  %v1694_v50 = vrot.slane %v1677_v52, %v4270_v20  ;;  %v1064_v21 = vld [vmem:[#allocation3 + $0x8] sm:$0xff] }
 0xa49   :  { %v1459_v0 = vsel %vm279_vm2, %v1450_v41, %v2905_v4  ;;  %v4275_v17 = vld [vmem:[#allocation2] sm:$0xff] }
 0xa4a   :  { %v1460_v25 = vsel %vm882_vm4, %v1459_v0, %v1457_v13  ;;  %v1679_v14 = vmul.f32 %v4282_v9, %v4275_v17  ;;  %v1244_v13 = vmul.f32 %v4162_v36, %v1064_v21 }
 0xa4b   :  { %v1494_v37 = vrot.slane %v1460_v25, 1  ;;  %v4286_v23 = vld [vmem:[#allocation2 + $0x10] sm:$0xff] }
 0xa4c   :  { %v1699_v41 = vadd.f32 %v1686_v1, %v1679_v14  ;;  %v1681_v0 = vmul.f32 %v4292_v47, %v4286_v23  ;;  %v1254_v52 = vsel %vm55_vm0, %v1244_v13, 0.0  ;;  %v4302_v14 = vld [vmem:[%s4819_s8] ss:$0 sm:$0xff] }
 0xa4d   :  { %1561 = vmatmul.mubr.f32.vlgmr.msra.gmra.mxu0 %v1494_v37  ;;  %v1255_v1 = vrot.slane %v1254_v52, 4  ;;  %4927 = vst [vmem:[#allocation19_spill] sm:$0xff] %v4302_v14 }
 0xa4e   :  { %3044 = vtanh.f32 %v1699_v41  ;;  %v1701_v4 = vadd.f32 %v1694_v50, %v1681_v0  ;;  %2523 = vmatprep.mubr.f32.mxu0 %v4892_v16  ;;  %v4309_v41 = vld [vmem:[%s4819_s8 + $0x2] ss:$0 sm:$0xff] }
 0xa4f   :  { %v1256_v0 = vadd.f32 %v1255_v1, %v1254_v52 }
 0xa50   :  { %3046 = vtanh.f32 %v1701_v4 }
 0xa51   :  { %v1257_v21 = vrot.slane %v1256_v0, 2 }
 0xa53   :  { %v1258_v13 = vadd.f32 %v1257_v21, %v1256_v0 }
 0xa55   :  { %v1259_v63 = vrot.slane %v1258_v13, 1 }
 0xa57   :  { %v1260_v9 = vadd.f32 %v1259_v63, %v1258_v13  ;;  %v1870_v13 = vld [vmem:[%s4813_s2 + $0x50] sm:$0xff] }
 0xa5b   :  { %v3045_v25 = vpop.eup %3044 }
 0xa5c   :  { %v1707_v47 = vmul.f32 %v4302_v14, %v3045_v25 }
 0xa5d   :  { %v3047_v37 = vpop.eup %3046 }
 0xa5e   :  { %v1711_v50 = vsel %vm55_vm0, %v1707_v47, 0.0  ;;  %v1709_v36 = vmul.f32 %v4309_v41, %v3047_v37 }
 0xa5f   :  { %1712 = vadd.xlane.f32.xlu1 %v1711_v50 }
 0xa60   :  { %v1717_v4 = vsel %vm55_vm0, %v1709_v36, 0.0 }
 0xa61   :  { %1718 = vadd.xlane.f32.xlu0 %v1717_v4 }
 0xa70   :  { %1580 = vrot.lane.b32.xlu1 %v1260_v9, %s3210_s0 }
 0xaea   :  { %v1719_v25 = vpop.xlane.xlu0 %1718 }
 0xaeb   :  { %v1735_v47 = vrot.slane %v1719_v25, 4 }
 0xaed   :  { %v1736_v14 = vmax.f32 %v1719_v25, %v1735_v47  ;;  %v1868_v47 = vld [vmem:[%s4813_s2 + $0x40] sm:$0xff] }
 0xaef   :  { %v1737_v28 = vrot.slane %v1736_v14, 2 }
 0xaf1   :  { %v1738_v29 = vmax.f32 %v1736_v14, %v1737_v28  ;;  %v1875_v28 = vld [vmem:[%s4813_s2 + $0x78] sm:$0xff] }
 0xaf2   :  { %1895 = vmatprep.subr.mxu1 %v1875_v28  ;;  %2475 = vmatprep.subr.mxu0 %v1875_v28  ;;  %v1871_v14 = vld [vmem:[%s4813_s2 + $0x58] sm:$0xff] }
 0xaf3   :  { %v1739_v55 = vrot.slane %v1738_v29, 1 }
 0xaf5   :  { %v1740_v32 = vmax.f32 %v1738_v29, %v1739_v55  ;;  %v1872_v55 = vld [vmem:[%s4813_s2 + $0x60] sm:$0xff] }
 0xaf7   :  { %v1749_v43 = vsub.f32 %v1719_v25, %v1740_v32  ;;  %v1874_v32 = vld [vmem:[%s4813_s2 + $0x70] sm:$0xff]  ;;  %v1869_v25 = vld [vmem:[%s4813_s2 + $0x48] sm:$0xff] }
 0xaf8   :  { %1896 = vmatpush1.msra.mxu1 %v1874_v32  ;;  %2476 = vmatpush1.msra.mxu0 %v1874_v32 }
 0xaf9   :  { %v1755_v37 = vmul.f32 1.442695, %v1749_v43  ;;  %v1873_v43 = vld [vmem:[%s4813_s2 + $0x68] sm:$0xff] }
 0xafa   :  { %1897 = vmatprep.subr.mxu1 %v1873_v43  ;;  %2477 = vmatprep.subr.mxu0 %v1873_v43 }
 0xafb   :  { %3048 = vpow2.f32 %v1755_v37  ;;  %1898 = vmatpush1.msra.mxu1 %v1872_v55  ;;  %2478 = vmatpush1.msra.mxu0 %v1872_v55  ;;  %v1867_v37 = vld [vmem:[%s4813_s2 + $0x38] sm:$0xff] }
 0xafc   :  { %1899 = vmatprep.subr.mxu1 %v1871_v14  ;;  %2479 = vmatprep.subr.mxu0 %v1871_v14 }
 0xafd   :  { %1900 = vmatpush1.msra.mxu1 %v1870_v13  ;;  %2480 = vmatpush1.msra.mxu0 %v1870_v13 }
 0xafe   :  { %1901 = vmatprep.subr.mxu1 %v1869_v25  ;;  %2481 = vmatprep.subr.mxu0 %v1869_v25 }
 0xaff   :  { %1902 = vmatpush1.msra.mxu1 %v1868_v47  ;;  %2482 = vmatpush1.msra.mxu0 %v1868_v47  ;;  %v1862_v47 = vld [vmem:[%s4813_s2 + $0x10] sm:$0xff] }
 0xb00   :  { %1903 = vmatprep.subr.mxu1 %v1867_v37  ;;  %2483 = vmatprep.subr.mxu0 %v1867_v37  ;;  %v1861_v37 = vld [vmem:[%s4813_s2 + $0x8] sm:$0xff] }
 0xb08   :  { %v3049_v52 = vpop.eup %3048 }
 0xb09   :  { %v1771_v1 = vrot.slane %v3049_v52, 4 }
 0xb0b   :  { %v1772_v50 = vadd.f32 %v3049_v52, %v1771_v1  ;;  %v1866_v1 = vld [vmem:[%s4813_s2 + $0x30] sm:$0xff] }
 0xb0c   :  { %1904 = vmatpush1.msra.mxu1 %v1866_v1  ;;  %2484 = vmatpush1.msra.mxu0 %v1866_v1 }
 0xb0d   :  { %v1562_v36 = vpop.f32.mrf.mxu0  ;;  %v1773_v4 = vrot.slane %v1772_v50, 2 }
 0xb0e   :  { %v1563_v0 = vadd.f32 %v1562_v36, %v4917_v27  ;;  %v1066_v36 = vld [vmem:[#allocation3 + $0x18] sm:$0xff] }
 0xb0f   :  { %v1774_v63 = vadd.f32 %v1773_v4, %v1772_v50  ;;  %v1865_v50 = vld [vmem:[%s4813_s2 + $0x28] sm:$0xff]  ;;  %v1864_v4 = vld [vmem:[%s4813_s2 + $0x20] sm:$0xff]  ;;  %v1564_v13 = vpop.f32.mrf.mxu0 }
 0xb10   :  { %v2860_v21 = vmul.f32 -1.442695, %v1563_v0  ;;  %3050 = vtanh.f32 %v1563_v0  ;;  %v1246_v0 = vmul.f32 %v4166_v48, %v1066_v36  ;;  %1905 = vmatprep.subr.mxu1 %v1865_v50  ;;  %2485 = vmatprep.subr.mxu0 %v1865_v50  ;;  %v1565_v50 = vadd.f32 %v1564_v13, %v4918_v38 }
 0xb11   :  { %v1775_v9 = vrot.slane %v1774_v63, 1  ;;  %1906 = vmatpush1.msra.mxu1 %v1864_v4  ;;  %2486 = vmatpush1.msra.mxu0 %v1864_v4 }
 0xb12   :  { %3052 = vpow2.f32 %v2860_v21  ;;  %v1268_v28 = vsel %vm55_vm0, %v1246_v0, 0.0 }
 0xb13   :  { %v1776_v29 = vadd.f32 %v1775_v9, %v1774_v63  ;;  %v1863_v63 = vld [vmem:[%s4813_s2 + $0x18] sm:$0xff]  ;;  %v1269_v43 = vrot.slane %v1268_v28, 4 }
 0xb14   :  { %1907 = vmatprep.subr.mxu1 %v1863_v63  ;;  %2487 = vmatprep.subr.mxu0 %v1863_v63 }
 0xb15   :  { %3054 = vrcp.f32 %v1776_v29  ;;  %v1270_v14 = vadd.f32 %v1269_v43, %v1268_v28  ;;  %1908 = vmatpush1.msra.mxu1 %v1862_v47  ;;  %2488 = vmatpush1.msra.mxu0 %v1862_v47 }
 0xb16   :  { %1909 = vmatprep.subr.mxu1 %v1861_v37  ;;  %2489 = vmatprep.subr.mxu0 %v1861_v37 }
 0xb17   :  { %v1271_v4 = vrot.slane %v1270_v14, 2 }
 0xb1d   :  { %v3051_v21 = vpop.eup %3050 }
 0xb1e   :  { %1575 = vrot.lane.b32.xlu1 %v3051_v21, %s3208_s6 }
 0xb1f   :  { %v3053_v9 = vpop.eup %3052 }
 0xb20   :  { %v1570_v32 = vadd.f32 1.0, %v3053_v9  ;;  %v1272_v9 = vadd.f32 %v1271_v4, %v1270_v14 }
 0xb22   :  { %v3055_v48 = vpop.eup %3054  ;;  %3056 = vrcp.f32 %v1570_v32 }
 0xb23   :  { %v4357_v55 = vmul.f32 %v3055_v48, %v3049_v52  ;;  %v1860_v52 = vld [vmem:[%s4813_s2] sm:$0xff]  ;;  %3058 = vtanh.f32 %v1565_v50 }
 0xb24   :  { %1910 = vmatpush1.msra.mxu1 %v1860_v52  ;;  %2490 = vmatpush1.msra.mxu0 %v1860_v52 }
 0xb25   :  { %v1793_v29 = vmul.f32 %v4357_v55, %v4286_v23  ;;  %v1713_v23 = vpop.xlane.xlu1 %1712  ;;  %2076 = vmatprep.subr.mxu1 %v4031_v6 }
 0xb26   :  { %v1723_v63 = vrot.slane %v1713_v23, 4 }
 0xb27   :  { %v1809_v25 = vsel %vm55_vm0, %v1793_v29, 0.0 }
 0xb28   :  { %v1810_v1 = vrot.slane %v1809_v25, 4  ;;  %v1724_v29 = vmax.f32 %v1713_v23, %v1723_v63 }
 0xb29   :  { %v1581_v32 = vpop.permute.xlu1 %1580 }
 0xb2a   :  { %v1811_v36 = vadd.f32 %v1810_v1, %v1809_v25  ;;  %v1273_v25 = vrot.slane %v1272_v9, 1  ;;  %v1725_v6 = vrot.slane %v1724_v29, 2 }
 0xb2c   :  { %v1812_v0 = vrot.slane %v1811_v36, 2  ;;  %v1274_v47 = vadd.f32 %v1273_v25, %v1272_v9  ;;  %v1726_v14 = vmax.f32 %v1724_v29, %v1725_v6  ;;  %v2861_v25 = vmul.f32 -1.442695, %v1565_v50 }
 0xb2e   :  { %v1813_v21 = vadd.f32 %v1812_v0, %v1811_v36  ;;  %v1727_v52 = vrot.slane %v1726_v14, 1 }
 0xb2f   :  { %v4373_v28 = vpop.eup %3056 }
 0xb30   :  { %v1583_v48 = vmul.f32 %v4373_v28, %v1581_v32  ;;  %v1814_v43 = vrot.slane %v1813_v21, 1  ;;  %v3059_v37 = vpop.eup %3058  ;;  %v1728_v1 = vmax.f32 %v1726_v14, %v1727_v52 }
 0xb32   :  { %1585 = vrot.lane.b32.xlu1 %v1583_v48, %s3209_s12  ;;  %v4377_v13 = vadd.f32 %v1814_v43, %v1813_v21  ;;  %v1747_v36 = vsub.f32 %v1713_v23, %v1728_v1 }
 0xb34   :  { %1856 = vrot.lane.b32.xlu0 %v4377_v13, %s3210_s0  ;;  %v1751_v4 = vmul.f32 1.442695, %v1747_v36 }
 0xb36   :  { %3060 = vpow2.f32 %v1751_v4 }
 0xb38   :  { %1614 = vrot.lane.b32.xlu0 %v1274_v47, %s3210_s0 }
 0xb3c   :  { %1609 = vrot.lane.b32.xlu0 %v3059_v37, %s3208_s6 }
 0xb43   :  { %v3061_v0 = vpop.eup %3060 }
 0xb44   :  { %v1759_v63 = vrot.slane %v3061_v0, 4 }
 0xb46   :  { %v1760_v21 = vadd.f32 %v3061_v0, %v1759_v63 }
 0xb48   :  { %v1761_v32 = vrot.slane %v1760_v21, 2 }
 0xb4a   :  { %v1762_v48 = vadd.f32 %v1761_v32, %v1760_v21 }
 0xb4c   :  { %v1763_v43 = vrot.slane %v1762_v48, 1 }
 0xb4e   :  { %v1764_v38 = vadd.f32 %v1763_v43, %v1762_v48 }
 0xb50   :  { %3062 = vrcp.f32 %v1764_v38 }
 0xb51   :  { %3064 = vpow2.f32 %v2861_v25 }
 0xb5d   :  { %v3063_v9 = vpop.eup %3062 }
 0xb5e   :  { %v1787_v47 = vmul.f32 %v3063_v9, %v3061_v0  ;;  %v3065_v37 = vpop.eup %3064 }
 0xb5f   :  { %v1604_v52 = vadd.f32 1.0, %v3065_v37 }
 0xb60   :  { %v1791_v29 = vmul.f32 %v1787_v47, %v4275_v17 }
 0xb61   :  { %3066 = vrcp.f32 %v1604_v52 }
 0xb62   :  { %v1795_v6 = vsel %vm55_vm0, %v1791_v29, 0.0 }
 0xb63   :  { %v1796_v14 = vrot.slane %v1795_v6, 4 }
 0xb65   :  { %v1797_v23 = vadd.f32 %v1796_v14, %v1795_v6 }
 0xb67   :  { %v1798_v1 = vrot.slane %v1797_v23, 2 }
 0xb69   :  { %v1799_v36 = vadd.f32 %v1798_v1, %v1797_v23  ;;  %v4465_v1 = vld [vmem:[%s4816_s5 + $0x1] ss:$0 sm:$0xff] }
 0xb6b   :  { %v1800_v63 = vrot.slane %v1799_v36, 1 }
 0xb6d   :  { %v4386_v50 = vadd.f32 %v1800_v63, %v1799_v36 }
 0xb6e   :  { %v4394_v48 = vpop.eup %3066 }
 0xb90   :  { %v1576_v4 = vpop.permute.xlu1 %1575 }
 0xb91   :  { %v1578_v21 = vmul.f32 %v4373_v28, %v1576_v4 }
 0xba4   :  { %v1586_v38 = vpop.permute.xlu1 %1585 }
 0xba5   :  { %v1588_v32 = vadd.f32 %v1586_v38, %v1578_v21 }
 0xba6   :  { %v1857_v0 = vpop.permute.xlu0 %1856 }
 0xba7   :  { %3068 = vtanh.f32 %v1588_v32  ;;  %1600 = vst.msk [vmem:[#allocation3 + $0x9] sm:$0x1] %vm832_vm3, %v1588_v32  ;;  %v1859_v17 = vsel %vm55_vm0, %v4386_v50, %v1857_v0 }
 0xba8   :  { %2862 = vmatmul.mubr.msk.f32.vlgmr.msra.gmra.mxu1 %vm279_vm2, %v1859_v17  ;;  %v4474_v17 = vld [vmem:[%s4819_s8 + $0x1] ss:$0 sm:$0xff] }
 0xba9   :  { %2077 = vmatpush1.msra.mxu1 %v4036_v45  ;;  %2140 = vmatprep.mubr.f32.mxu1 %v4892_v16 }
 0xbaa   :  { %v1615_v43 = vpop.permute.xlu0 %1614  ;;  %2078 = vmatprep.subr.mxu1 %v4041_v10  ;;  %v1643_v10 = vld [vmem:[#allocation3] sm:$0xff] }
 0xbab   :  { %v1617_v9 = vmul.f32 %v4394_v48, %v1615_v43  ;;  %2079 = vmatpush1.msra.mxu1 %v4047_v46  ;;  %v1823_v46 = vmul.f32 %v1787_v47, %v1643_v10 }
 0xbac   :  { %2080 = vmatprep.subr.mxu1 %v4053_v49 }
 0xbad   :  { %1619 = vrot.lane.b32.xlu0 %v1617_v9, %s3209_s12  ;;  %2081 = vmatpush1.msra.mxu1 %v4060_v34  ;;  %v1827_v49 = vsel %vm55_vm0, %v1823_v46, 0.0  ;;  %v4482_v46 = vld [vmem:[%s4818_s7 + $0x3] sm:$0x1] }
 0xbae   :  { %2082 = vmatprep.subr.mxu1 %v4066_v51  ;;  %v1828_v34 = vrot.slane %v1827_v49, 4  ;;  %v1610_v51 = vpop.permute.xlu0 %1609 }
 0xbaf   :  { %2083 = vmatpush1.msra.mxu1 %v4073_v53 }
 0xbb0   :  { %2084 = vmatprep.subr.mxu1 %v4079_v58  ;;  %v1829_v53 = vadd.f32 %v1828_v34, %v1827_v49  ;;  %v1612_v58 = vmul.f32 %v4394_v48, %v1610_v51  ;;  %v4928_v49 = vld [vmem:[#allocation11_spill] sm:$0xff] }
 0xbb1   :  { %2085 = vmatpush1.msra.mxu1 %v4088_v33  ;;  %v1650_v34 = vmul.f32 %v4482_v46, %v4928_v49 }
 0xbb2   :  { %2086 = vmatprep.subr.mxu1 %v4094_v60 }
 0xbb3   :  { %2087 = vmatpush1.msra.mxu1 %v4100_v61  ;;  %v1830_v61 = vrot.slane %v1829_v53, 2 }
 0xbb4   :  { %v3069_v45 = vpop.eup %3068  ;;  %2088 = vmatprep.subr.mxu1 %v4106_v62 }
 0xbb5   :  { %1591 = vrot.lane.b32.xlu1 %v3069_v45, %s3209_s12  ;;  %2089 = vmatpush1.msra.mxu1 %v4113_v2  ;;  %v1831_v62 = vadd.f32 %v1830_v61, %v1829_v53  ;;  %v1670_v53 = vrot.slane %v1650_v34, %v3327_v19 }
 0xbb6   :  { %2090 = vmatprep.subr.mxu1 %v4119_v56 }
 0xbb7   :  { %2091 = vmatpush1.msra.mxu1 %v4125_v3  ;;  %v1832_v3 = vrot.slane %v1831_v62, 1 }
 0xbb8   :  { %2092 = vmatprep.subr.mxu1 %v4131_v8 }
 0xbb9   :  { %2093 = vmatpush1.msra.mxu1 %v4137_v18  ;;  %v1833_v8 = vadd.f32 %v1832_v3, %v1831_v62  ;;  %v4495_v62 = vld [vmem:[%s4816_s5 + $0x3] ss:$0 sm:$0xff] }
 0xbba   :  { %2094 = vmatprep.subr.mxu1 %v4143_v57 }
 0xbbb   :  { %2095 = vmatpush1.msra.mxu1 %v4149_v35 }
 0xbbc   :  { %2096 = vmatprep.subr.mxu1 %v4155_v11 }
 0xbbd   :  { %2097 = vmatpush1.msra.mxu1 %v4175_v40 }
 0xbbe   :  { %2098 = vmatprep.subr.mxu1 %v4180_v12 }
 0xbbf   :  { %2099 = vmatpush1.msra.mxu1 %v4187_v59  ;;  %v1645_v59 = vld [vmem:[#allocation3 + $0x10] sm:$0xff] }
 0xbc0   :  { %2100 = vmatprep.subr.mxu1 %v4192_v54  ;;  %v1825_v54 = vmul.f32 %v4357_v55, %v1645_v59 }
 0xbc1   :  { %2101 = vmatpush1.msra.mxu1 %v4199_v22 }
 0xbc2   :  { %2102 = vmatprep.subr.mxu1 %v4204_v30  ;;  %v1841_v22 = vsel %vm55_vm0, %v1825_v54, 0.0 }
 0xbc3   :  { %2103 = vmatpush1.msra.mxu1 %v4211_v26  ;;  %v1842_v30 = vrot.slane %v1841_v22, 4 }
 0xbc4   :  { %2104 = vmatprep.subr.mxu1 %v4216_v39 }
 0xbc5   :  { %2105 = vmatpush1.msra.mxu1 %v4221_v44  ;;  %v1843_v39 = vadd.f32 %v1842_v30, %v1841_v22  ;;  %v4443_v44 = vld [vmem:[%s4818_s7 + $0x1] sm:$0x1] }
 0xbc6   :  { %2106 = vmatprep.subr.mxu1 %v4227_v24  ;;  %v1648_v24 = vmul.f32 %v4443_v44, %v4237_v42 }
 0xbc7   :  { %2107 = vmatpush1.msra.mxu1 %v4234_v31 }
 0xbc8   :  { %v1662_v55 = vrot.slane %v1648_v24, %v3327_v19 }
 0xbca   :  { %v1676_v29 = vadd.f32 %v1662_v55, %v3820_v15 }
 0xbcc   :  { %v1690_v52 = vrot.slane %v1676_v29, %v4270_v20 }
 0xc1f   :  { %v1620_v33 = vpop.permute.xlu0 %1619 }
 0xc20   :  { %v1622_v60 = vadd.f32 %v1620_v33, %v1612_v58  ;;  %v4929_v58 = vld [vmem:[#allocation35_spill] sm:$0xff] }
 0xc21   :  { %v1678_v33 = vadd.f32 %v1670_v53, %v4929_v58 }
 0xc22   :  { %3070 = vtanh.f32 %v1622_v60  ;;  %1634 = vst.msk [vmem:[#allocation3 + $0x19] sm:$0x1] %vm832_vm3, %v1622_v60 }
 0xc23   :  { %v1698_v61 = vrot.slane %v1678_v33, %v4270_v20 }
 0xc27   :  { %v1592_v2 = vpop.permute.xlu1 %1591 }
 0xc28   :  { %v1594_v56 = vmul.f32 %v4373_v28, %v1592_v2  ;;  %v1844_v28 = vrot.slane %v1843_v39, 2 }
 0xc2a   :  { %1596 = vrot.lane.b32.xlu1 %v1594_v56, %s3210_s0  ;;  %v1845_v47 = vadd.f32 %v1844_v28, %v1843_v39 }
 0xc2c   :  { %v1846_v42 = vrot.slane %v1845_v47, 1 }
 0xc2e   :  { %1971 = vrot.lane.b32.xlu1 %v1833_v8, %s3210_s0  ;;  %v1847_v4 = vadd.f32 %v1846_v42, %v1845_v47 }
 0xc2f   :  { %v3071_v18 = vpop.eup %3070 }
 0xc30   :  { %1625 = vrot.lane.b32.xlu0 %v3071_v18, %s3209_s12  ;;  %v4502_v18 = vld [vmem:[%s4819_s8 + $0x3] ss:$0 sm:$0xff] }
 0xc68   :  { %v1945_v57 = vpop.f32.mrf.mxu1 }
 0xc69   :  { %v1952_v26 = vrot.slane %v1945_v57, 6 }
 0xc6a   :  { %v1947_v35 = vpop.f32.mrf.mxu1 }
 0xc6b   :  { %v1953_v11 = vrot.slane %v1947_v35, 6  ;;  %v1956_v31 = vadd.f32 %v1952_v26, %v3800_v5 }
 0xc6d   :  { %v1957_v40 = vadd.f32 %v1953_v11, %v3804_v7  ;;  %v2863_v14 = vmul.f32 -1.442695, %v1956_v31 }
 0xc6f   :  { %3072 = vtanh.f32 %v1957_v40  ;;  %v2864_v3 = vmul.f32 -1.442695, %v1957_v40 }
 0xc70   :  { %3074 = vtanh.f32 %v1956_v31 }
 0xc71   :  { %3076 = vpow2.f32 %v2863_v14 }
 0xc7c   :  { %v3073_v12 = vpop.eup %3072 }
 0xc7d   :  { %2001 = vrot.lane.b32.xlu1 %v3073_v12, %s3208_s6  ;;  %v3075_v21 = vpop.eup %3074 }
 0xc7e   :  { %v3077_v38 = vpop.eup %3076 }
 0xc7f   :  { %v1961_v0 = vadd.f32 1.0, %v3077_v38 }
 0xc9c   :  { %v4448_v25 = vpop.permute.xlu1 %1596 }
 0xc9d   :  { %1599 = vst.msk [vmem:[#allocation2 + $0x9] sm:$0x1] %vm832_vm3, %v4448_v25 }
 0xca0   :  { %v1972_v9 = vpop.permute.xlu1 %1971 }
 0xca2   :  { %v1626_v6 = vpop.permute.xlu0 %1625 }
 0xca3   :  { %v4455_v23 = vmul.f32 %v4394_v48, %v1626_v6 }
 0xca4   :  { %v4457_v37 = vld [vmem:[#allocation2 + $0x8] sm:$0xff] }
 0xca5   :  { %1630 = vrot.lane.b32.xlu0 %v4455_v23, %s3210_s0  ;;  %v1680_v36 = vmul.f32 %v4465_v1, %v4457_v37 }
 0xca7   :  { %v1700_v63 = vadd.f32 %v1690_v52, %v1680_v36 }
 0xca9   :  { %2006 = vrot.lane.b32.xlu0 %v1847_v4, %s3210_s0  ;;  %3078 = vtanh.f32 %v1700_v63 }
 0xcaa   :  { %3080 = vrcp.f32 %v1961_v0 }
 0xcad   :  { %1966 = vrot.lane.b32.xlu0 %v3075_v21, %s3208_s6 }
 0xcb6   :  { %v3079_v32 = vpop.eup %3078 }
 0xcb7   :  { %v1708_v48 = vmul.f32 %v4474_v17, %v3079_v32  ;;  %v3081_v45 = vpop.eup %3080 }
 0xcb8   :  { %v1974_v10 = vmul.f32 %v3081_v45, %v1972_v9 }
 0xcb9   :  { %v1714_v43 = vsel %vm55_vm0, %v1708_v48, 0.0 }
 0xcba   :  { %1715 = vadd.xlane.f32.xlu1 %v1714_v43 }
 0xccb   :  { %1976 = vrot.lane.b32.xlu1 %v1974_v10, %s3209_s12 }
 0xcef   :  { %v2002_v59 = vpop.permute.xlu1 %2001 }
 0xd17   :  { %v1631_v51 = vpop.permute.xlu0 %1630 }
 0xd18   :  { %1633 = vst.msk [vmem:[#allocation2 + $0x19] sm:$0x1] %vm832_vm3, %v1631_v51 }
 0xd1b   :  { %v2007_v12 = vpop.permute.xlu0 %2006 }
 0xd1f   :  { %v4489_v60 = vld [vmem:[#allocation2 + $0x18] sm:$0xff]  ;;  %v1967_v54 = vpop.permute.xlu0 %1966 }
 0xd20   :  { %v1682_v2 = vmul.f32 %v4495_v62, %v4489_v60  ;;  %v1969_v22 = vmul.f32 %v3081_v45, %v1967_v54 }
 0xd22   :  { %v1702_v56 = vadd.f32 %v1698_v61, %v1682_v2 }
 0xd24   :  { %3082 = vtanh.f32 %v1702_v56 }
 0xd25   :  { %3084 = vpow2.f32 %v2864_v3 }
 0xd31   :  { %v3083_v8 = vpop.eup %3082 }
 0xd32   :  { %v1710_v20 = vmul.f32 %v4502_v18, %v3083_v8  ;;  %v3085_v57 = vpop.eup %3084 }
 0xd33   :  { %v1996_v11 = vadd.f32 1.0, %v3085_v57 }
 0xd34   :  { %v1720_v35 = vsel %vm55_vm0, %v1710_v20, 0.0 }
 0xd35   :  { %1721 = vadd.xlane.f32.xlu0 %v1720_v35  ;;  %3086 = vrcp.f32 %v1996_v11 }
 0xd42   :  { %v4506_v26 = vpop.eup %3086 }
 0xd43   :  { %v1716_v40 = vpop.xlane.xlu1 %1715  ;;  %v2009_v24 = vmul.f32 %v4506_v26, %v2007_v12  ;;  %v2004_v55 = vmul.f32 %v4506_v26, %v2002_v59 }
 0xd44   :  { %v1729_v42 = vrot.slane %v1716_v40, 4 }
 0xd46   :  { %v1730_v36 = vmax.f32 %v1716_v40, %v1729_v42 }
 0xd47   :  { %v1977_v30 = vpop.permute.xlu1 %1976 }
 0xd48   :  { %v1979_v39 = vadd.f32 %v1977_v30, %v1969_v22  ;;  %v1731_v63 = vrot.slane %v1730_v36, 2 }
 0xd4a   :  { %3088 = vtanh.f32 %v1979_v39  ;;  %1992 = vst.msk [vmem:[#allocation3] sm:$0x4] %vm1990_vm6, %v1979_v39  ;;  %v1732_v38 = vmax.f32 %v1730_v36, %v1731_v63 }
 0xd4b   :  { %2011 = vrot.lane.b32.xlu0 %v2009_v24, %s3209_s12 }
 0xd4c   :  { %v1733_v0 = vrot.slane %v1732_v38, 1 }
 0xd4e   :  { %v1734_v43 = vmax.f32 %v1732_v38, %v1733_v0 }
 0xd50   :  { %v1748_v10 = vsub.f32 %v1716_v40, %v1734_v43 }
 0xd52   :  { %v1753_v34 = vmul.f32 1.442695, %v1748_v10 }
 0xd57   :  { %v3089_v31 = vpop.eup %3088 }
 0xd58   :  { %1982 = vrot.lane.b32.xlu1 %v3089_v31, %s3209_s12 }
 0xdbe   :  { %v1722_v28 = vpop.xlane.xlu0 %1721 }
 0xdbf   :  { %v1741_v4 = vrot.slane %v1722_v28, 4 }
 0xdc1   :  { %v1742_v21 = vmax.f32 %v1722_v28, %v1741_v4 }
 0xdc2   :  { %v2012_v47 = vpop.permute.xlu0 %2011 }
 0xdc3   :  { %v2014_v29 = vadd.f32 %v2012_v47, %v2004_v55  ;;  %v1743_v32 = vrot.slane %v1742_v21, 2 }
 0xdc5   :  { %3090 = vtanh.f32 %v2014_v29  ;;  %2026 = vst.msk [vmem:[#allocation3 + $0x10] sm:$0x4] %vm1990_vm6, %v2014_v29  ;;  %v1744_v48 = vmax.f32 %v1742_v21, %v1743_v32 }
 0xdc6   :  { %3092 = vpow2.f32 %v1753_v34  ;;  %v4931_v34 = vld [vmem:[#allocation7_spill] sm:$0xff] }
 0xdc7   :  { %v1745_v9 = vrot.slane %v1744_v48, 1 }
 0xdc9   :  { %v1746_v49 = vmax.f32 %v1744_v48, %v1745_v9 }
 0xdca   :  { %v1983_v6 = vpop.permute.xlu1 %1982 }
 0xdcb   :  { %v1985_v14 = vmul.f32 %v3081_v45, %v1983_v6  ;;  %v1750_v45 = vsub.f32 %v1722_v28, %v1746_v49 }
 0xdcd   :  { %1987 = vrot.lane.b32.xlu1 %v1985_v14, %s3210_s0  ;;  %v1757_v51 = vmul.f32 1.442695, %v1750_v45  ;;  %v4932_v45 = vld [vmem:[#allocation9_spill] sm:$0xff] }
 0xdcf   :  { %3094 = vpow2.f32 %v1757_v51 }
 0xdd2   :  { %v3091_v52 = vpop.eup %3090 }
 0xdd3   :  { %2017 = vrot.lane.b32.xlu0 %v3091_v52, %s3209_s12  ;;  %v3093_v53 = vpop.eup %3092 }
 0xdd4   :  { %v1765_v33 = vrot.slane %v3093_v53, 4 }
 0xdd6   :  { %v1766_v2 = vadd.f32 %v3093_v53, %v1765_v33 }
 0xdd8   :  { %v1767_v3 = vrot.slane %v1766_v2, 2 }
 0xdda   :  { %v1768_v20 = vadd.f32 %v1767_v3, %v1766_v2 }
 0xddc   :  { %v3095_v61 = vpop.eup %3094  ;;  %v1769_v35 = vrot.slane %v1768_v20, 1 }
 0xddd   :  { %v1777_v56 = vrot.slane %v3095_v61, 4 }
 0xdde   :  { %v1770_v12 = vadd.f32 %v1769_v35, %v1768_v20  ;;  %v4935_v20 = vld [vmem:[#allocation17_spill] sm:$0xff] }
 0xddf   :  { %v1778_v8 = vadd.f32 %v3095_v61, %v1777_v56  ;;  %v4934_v56 = vld [vmem:[#allocation19_spill] sm:$0xff] }
 0xde0   :  { %3096 = vrcp.f32 %v1770_v12 }
 0xde1   :  { %v1779_v57 = vrot.slane %v1778_v8, 2 }
 0xde3   :  { %v1780_v11 = vadd.f32 %v1779_v57, %v1778_v8  ;;  %v2229_v57 = vmul.f32 %v4935_v20, %v4377_v13 }
 0xde5   :  { %v1781_v59 = vrot.slane %v1780_v11, 1 }
 0xde7   :  { %v1782_v54 = vadd.f32 %v1781_v59, %v1780_v11  ;;  %v2246_v11 = vrot.slane %v2229_v57, %v3327_v19 }
 0xde9   :  { %3098 = vrcp.f32 %v1782_v54 }
 0xded   :  { %v3097_v40 = vpop.eup %3096 }
 0xdee   :  { %v1788_v22 = vmul.f32 %v3097_v40, %v3093_v53  ;;  %v4936_v40 = vld [vmem:[#allocation10_spill] sm:$0xff] }
 0xdf0   :  { %v1792_v39 = vmul.f32 %v1788_v22, %v4457_v37  ;;  %v4930_v37 = vld [vmem:[#allocation14_spill] sm:$0xff] }
 0xdf1   :  { %v2227_v38 = vmul.f32 %v4930_v37, %v4386_v50  ;;  %v4535_v50 = vsub.s32 3, %v4931_v34 }
 0xdf2   :  { %v1802_v31 = vsel %vm55_vm0, %v1792_v39, 0.0 }
 0xdf3   :  { %v1803_v55 = vrot.slane %v1802_v31, 4  ;;  %v2238_v43 = vrot.slane %v2227_v38, %v3327_v19 }
 0xdf5   :  { %v1804_v29 = vadd.f32 %v1803_v55, %v1802_v31  ;;  %v2255_v51 = vadd.f32 %v2238_v43, %v4932_v45 }
 0xdf6   :  { %v3099_v30 = vpop.eup %3098 }
 0xdf7   :  { %v1790_v24 = vmul.f32 %v3099_v30, %v3095_v61  ;;  %v1805_v14 = vrot.slane %v1804_v29, 2  ;;  %v2266_v33 = vrot.slane %v2255_v51, %v4535_v50  ;;  %v2257_v30 = vadd.f32 %v2246_v11, %v4936_v40 }
 0xdf9   :  { %v1794_v28 = vmul.f32 %v1790_v24, %v4489_v60  ;;  %v1806_v52 = vadd.f32 %v1805_v14, %v1804_v29  ;;  %v2274_v13 = vrot.slane %v2257_v30, %v4535_v50 }
 0xdfb   :  { %v1816_v47 = vsel %vm55_vm0, %v1794_v28, 0.0  ;;  %v1807_v63 = vrot.slane %v1806_v52, 1 }
 0xdfc   :  { %v1817_v6 = vrot.slane %v1816_v47, 4 }
 0xdfd   :  { %v4523_v0 = vadd.f32 %v1807_v63, %v1806_v52  ;;  %v1644_v52 = vld [vmem:[#allocation3 + $0x8] sm:$0xff]  ;;  %v1646_v63 = vld [vmem:[#allocation3 + $0x18] sm:$0xff] }
 0xdfe   :  { %v1818_v42 = vadd.f32 %v1817_v6, %v1816_v47  ;;  %v4937_v6 = vld [vmem:[#allocation13_spill] sm:$0xff] }
 0xe00   :  { %v1819_v36 = vrot.slane %v1818_v42, 2 }
 0xe02   :  { %v1820_v21 = vadd.f32 %v1819_v36, %v1818_v42  ;;  %v1824_v36 = vmul.f32 %v1788_v22, %v1644_v52 }
 0xe04   :  { %v1821_v48 = vrot.slane %v1820_v21, 1 }
 0xe06   :  { %v4530_v10 = vadd.f32 %v1821_v48, %v1820_v21  ;;  %v1826_v21 = vmul.f32 %v1790_v24, %v1646_v63 }
 0xe3f   :  { %v1988_v4 = vpop.permute.xlu1 %1987 }
 0xe40   :  { %1991 = vst.msk [vmem:[#allocation2] sm:$0x4] %vm1990_vm6, %v1988_v4 }
 0xe45   :  { %v2018_v32 = vpop.permute.xlu0 %2017 }
 0xe46   :  { %v2020_v60 = vmul.f32 %v4506_v26, %v2018_v32  ;;  %v4933_v26 = vld [vmem:[#allocation18_spill] sm:$0xff]  ;;  %v1848_v32 = vsel %vm55_vm0, %v1826_v21, 0.0 }
 0xe47   :  { %v4532_v49 = vld [vmem:[#allocation2] sm:$0xff] }
 0xe48   :  { %v2906_v9 = vpack.i.bf16 %v4523_v0, %v2020_v60  ;;  %2022 = vrot.lane.b32.xlu0 %v2020_v60, %s3210_s0  ;;  %v2259_v53 = vmul.f32 %v4933_v26, %v4532_v49 }
 0xe4a   :  { %2907 = vrot.lane.b32.xlu1 %v2906_v9, %s3208_s6  ;;  %v2279_v61 = vadd.f32 %v2266_v33, %v2259_v53  ;;  %v1849_v9 = vrot.slane %v1848_v32, 4 }
 0xe4c   :  { %2036 = vrot.lane.b32.xlu0 %v4530_v10, %s3209_s12  ;;  %3100 = vtanh.f32 %v2279_v61  ;;  %v1850_v45 = vadd.f32 %v1849_v9, %v1848_v32 }
 0xe4e   :  { %v1851_v26 = vrot.slane %v1850_v45, 2 }
 0xe50   :  { %v1852_v53 = vadd.f32 %v1851_v26, %v1850_v45 }
 0xe52   :  { %v1853_v61 = vrot.slane %v1852_v53, 1 }
 0xe54   :  { %v1854_v24 = vadd.f32 %v1853_v61, %v1852_v53 }
 0xe59   :  { %v3101_v2 = vpop.eup %3100 }
 0xe5a   :  { %v2287_v3 = vmul.f32 %v4934_v56, %v3101_v2 }
 0xe5c   :  { %v2291_v8 = vsel %vm55_vm0, %v2287_v3, 0.0 }
 0xe6b   :  { %2292 = vadd.xlane.f32.xlu0 %v2291_v8 }
 0xeba   :  { %v2023_v35 = vpop.permute.xlu0 %2022 }
 0xebb   :  { %2025 = vst.msk [vmem:[#allocation2 + $0x10] sm:$0x4] %vm1990_vm6, %v2023_v35 }
 0xebc   :  { %v2908_v12 = vpop.permute.xlu1 %2907 }
 0xebd   :  { %v2910_v59 = vunpack.i.h.bf16 %v2908_v12  ;;  %v2909_v54 = vunpack.i.l.bf16 %v2908_v12 }
 0xebe   :  { %v2037_v31 = vpop.permute.xlu0 %2036 }
 0xebf   :  { %v2030_v39 = vsel %vm55_vm0, %v1988_v4, %v2909_v54  ;;  %v1834_v4 = vsel %vm55_vm0, %v1824_v36, 0.0 }
 0xec0   :  { %v2039_v28 = vsel %vm279_vm2, %v2030_v39, %v2910_v59  ;;  %v1835_v37 = vrot.slane %v1834_v4, 4 }
 0xec1   :  { %v2040_v55 = vsel %vm882_vm4, %v2039_v28, %v2037_v31 }
 0xec2   :  { %v2074_v47 = vrot.slane %v2040_v55, 2  ;;  %v4553_v29 = vld [vmem:[#allocation2 + $0x10] sm:$0xff]  ;;  %v1836_v43 = vadd.f32 %v1835_v37, %v1834_v4  ;;  %v4938_v55 = vld [vmem:[#allocation29_spill] sm:$0xff] }
 0xec3   :  { %v2261_v14 = vmul.f32 %v4937_v6, %v4553_v29 }
 0xec4   :  { %2141 = vmatmul.mubr.f32.vlgmr.msra.gmra.mxu1 %v2074_v47  ;;  %v1837_v34 = vrot.slane %v1836_v43, 2 }
 0xec5   :  { %v2281_v42 = vadd.f32 %v2274_v13, %v2261_v14 }
 0xec6   :  { %v1838_v51 = vadd.f32 %v1837_v34, %v1836_v43 }
 0xec7   :  { %3102 = vtanh.f32 %v2281_v42 }
 0xec8   :  { %v1839_v22 = vrot.slane %v1838_v51, 1 }
 0xeca   :  { %v1840_v33 = vadd.f32 %v1839_v22, %v1838_v51 }
 0xed4   :  { %v3103_v38 = vpop.eup %3102 }
 0xed5   :  { %v2289_v60 = vmul.f32 %v4309_v41, %v3103_v38 }
 0xed7   :  { %v2297_v48 = vsel %vm55_vm0, %v2289_v60, 0.0 }
 0xed8   :  { %2298 = vadd.xlane.f32.xlu1 %v2297_v48 }
 0xee9   :  { %2160 = vrot.lane.b32.xlu1 %v1840_v33, %s3210_s0 }
 0xeed   :  { %2194 = vrot.lane.b32.xlu1 %v1854_v24, %s3210_s0 }
 0xef4   :  { %v2293_v9 = vpop.xlane.xlu0 %2292 }
 0xef5   :  { %v2303_v51 = vrot.slane %v2293_v9, 4 }
 0xef7   :  { %v2304_v61 = vmax.f32 %v2293_v9, %v2303_v51 }
 0xf61   :  { %v2299_v2 = vpop.xlane.xlu1 %2298 }
 0xf62   :  { %v2315_v41 = vrot.slane %v2299_v2, 4 }
 0xf64   :  { %v2316_v56 = vmax.f32 %v2299_v2, %v2315_v41  ;;  %v2305_v41 = vrot.slane %v2304_v61, 2 }
 0xf65   :  { %v2161_v34 = vpop.permute.xlu1 %2160 }
 0xf66   :  { %v2317_v3 = vrot.slane %v2316_v56, 2 }
 0xf68   :  { %v2318_v8 = vmax.f32 %v2316_v56, %v2317_v3  ;;  %v2306_v3 = vmax.f32 %v2304_v61, %v2305_v41 }
 0xf69   :  { %v2195_v33 = vpop.permute.xlu1 %2194 }
 0xf6a   :  { %v2319_v20 = vrot.slane %v2318_v8, 1 }
 0xf6c   :  { %v2320_v57 = vmax.f32 %v2318_v8, %v2319_v20  ;;  %v2307_v20 = vrot.slane %v2306_v3, 1 }
 0xf6e   :  { %v2329_v35 = vsub.f32 %v2299_v2, %v2320_v57  ;;  %v2308_v57 = vmax.f32 %v2306_v3, %v2307_v20 }
 0xf70   :  { %v2335_v11 = vmul.f32 1.442695, %v2329_v35  ;;  %v2327_v35 = vsub.f32 %v2293_v9, %v2308_v57 }
 0xf72   :  { %3104 = vpow2.f32 %v2335_v11  ;;  %v2331_v11 = vmul.f32 1.442695, %v2327_v35 }
 0xf7f   :  { %v3105_v12 = vpop.eup %3104 }
 0xf80   :  { %v2351_v59 = vrot.slane %v3105_v12, 4 }
 0xf82   :  { %v2352_v54 = vadd.f32 %v3105_v12, %v2351_v59 }
 0xf84   :  { %v2142_v40 = vpop.f32.mrf.mxu1  ;;  %v2353_v30 = vrot.slane %v2352_v54, 2 }
 0xf85   :  { %v2143_v39 = vadd.f32 %v2142_v40, %v4917_v27 }
 0xf86   :  { %v2144_v31 = vpop.f32.mrf.mxu1  ;;  %v2354_v28 = vadd.f32 %v2353_v30, %v2352_v54 }
 0xf87   :  { %v2145_v47 = vadd.f32 %v2144_v31, %v4938_v55  ;;  %v2865_v6 = vmul.f32 -1.442695, %v2143_v39 }
 0xf88   :  { %v2355_v13 = vrot.slane %v2354_v28, 1 }
 0xf89   :  { %v2866_v14 = vmul.f32 -1.442695, %v2145_v47  ;;  %3106 = vtanh.f32 %v2145_v47 }
 0xf8a   :  { %v2356_v42 = vadd.f32 %v2355_v13, %v2354_v28 }
 0xf8b   :  { %3108 = vpow2.f32 %v2866_v14 }
 0xf8c   :  { %3110 = vrcp.f32 %v2356_v42 }
 0xf8d   :  { %3112 = vpow2.f32 %v2865_v6 }
 0xf96   :  { %v3107_v52 = vpop.eup %3106 }
 0xf97   :  { %2189 = vrot.lane.b32.xlu1 %v3107_v52, %s3208_s6 }
 0xf98   :  { %v3109_v36 = vpop.eup %3108 }
 0xf99   :  { %v3111_v63 = vpop.eup %3110  ;;  %v2184_v4 = vadd.f32 1.0, %v3109_v36 }
 0xf9a   :  { %v3113_v21 = vpop.eup %3112  ;;  %v4567_v37 = vmul.f32 %v3111_v63, %v3105_v12 }
 0xf9b   :  { %3114 = vrcp.f32 %v2184_v4  ;;  %v2150_v32 = vadd.f32 1.0, %v3113_v21 }
 0xf9c   :  { %v2373_v38 = vmul.f32 %v4567_v37, %v4553_v29  ;;  %3116 = vtanh.f32 %v2143_v39 }
 0xf9d   :  { %3118 = vrcp.f32 %v2150_v32 }
 0xf9e   :  { %v2389_v60 = vsel %vm55_vm0, %v2373_v38, 0.0  ;;  %3120 = vpow2.f32 %v2331_v11 }
 0xf9f   :  { %v2390_v48 = vrot.slane %v2389_v60, 4 }
 0xfa1   :  { %v2391_v43 = vadd.f32 %v2390_v48, %v2389_v60 }
 0xfa3   :  { %v2392_v45 = vrot.slane %v2391_v43, 2 }
 0xfa5   :  { %v2393_v26 = vadd.f32 %v2392_v45, %v2391_v43 }
 0xfa7   :  { %v2394_v22 = vrot.slane %v2393_v26, 1 }
 0xfa8   :  { %v4572_v53 = vpop.eup %3114 }
 0xfa9   :  { %v2395_v24 = vadd.f32 %v2394_v22, %v2393_v26  ;;  %v2197_v29 = vmul.f32 %v4572_v53, %v2195_v33  ;;  %v3117_v2 = vpop.eup %3116  ;;  %v2225_v22 = vld [vmem:[#allocation3 + $0x10] sm:$0xff] }
 0xfaa   :  { %v4577_v56 = vpop.eup %3118  ;;  %v2405_v33 = vmul.f32 %v4567_v37, %v2225_v22 }
 0xfab   :  { %2436 = vrot.lane.b32.xlu0 %v2395_v24, %s3210_s0  ;;  %2199 = vrot.lane.b32.xlu1 %v2197_v29, %s3209_s12  ;;  %v2163_v8 = vmul.f32 %v4577_v56, %v2161_v34  ;;  %v3121_v12 = vpop.eup %3120  ;;  %v2223_v29 = vld [vmem:[#allocation3] sm:$0xff] }
 0xfac   :  { %v2339_v59 = vrot.slane %v3121_v12, 4  ;;  %v2421_v61 = vsel %vm55_vm0, %v2405_v33, 0.0 }
 0xfad   :  { %v2422_v24 = vrot.slane %v2421_v61, 4 }
 0xfae   :  { %v2340_v54 = vadd.f32 %v3121_v12, %v2339_v59 }
 0xfaf   :  { %2155 = vrot.lane.b32.xlu0 %v3117_v2, %s3208_s6  ;;  %v2423_v41 = vadd.f32 %v2422_v24, %v2421_v61 }
 0xfb0   :  { %v2341_v40 = vrot.slane %v2340_v54, 2 }
 0xfb2   :  { %v2342_v30 = vadd.f32 %v2341_v40, %v2340_v54 }
 0xfb3   :  { %2165 = vrot.lane.b32.xlu0 %v2163_v8, %s3209_s12  ;;  %v2424_v8 = vrot.slane %v2423_v41, 2 }
 0xfb4   :  { %v2343_v39 = vrot.slane %v2342_v30, 1 }
 0xfb5   :  { %v2425_v57 = vadd.f32 %v2424_v8, %v2423_v41 }
 0xfb6   :  { %v2344_v31 = vadd.f32 %v2343_v39, %v2342_v30 }
 0xfb7   :  { %v2426_v59 = vrot.slane %v2425_v57, 1 }
 0xfb8   :  { %3122 = vrcp.f32 %v2344_v31 }
 0xfb9   :  { %v2427_v37 = vadd.f32 %v2426_v59, %v2425_v57 }
 0xfc5   :  { %v3123_v28 = vpop.eup %3122 }
 0xfc6   :  { %v2367_v47 = vmul.f32 %v3123_v28, %v3121_v12 }
 0xfc8   :  { %v2371_v13 = vmul.f32 %v2367_v47, %v4532_v49  ;;  %v2403_v2 = vmul.f32 %v2367_v47, %v2223_v29 }
 0xfca   :  { %v2375_v6 = vsel %vm55_vm0, %v2371_v13, 0.0  ;;  %v2407_v3 = vsel %vm55_vm0, %v2403_v2, 0.0 }
 0xfcb   :  { %v2376_v14 = vrot.slane %v2375_v6, 4  ;;  %v2408_v20 = vrot.slane %v2407_v3, 4 }
 0xfcd   :  { %v2377_v42 = vadd.f32 %v2376_v14, %v2375_v6  ;;  %v2409_v35 = vadd.f32 %v2408_v20, %v2407_v3 }
 0xfcf   :  { %v2378_v52 = vrot.slane %v2377_v42, 2  ;;  %v2410_v54 = vrot.slane %v2409_v35, 2 }
 0xfd1   :  { %v2379_v36 = vadd.f32 %v2378_v52, %v2377_v42  ;;  %v2411_v40 = vadd.f32 %v2410_v54, %v2409_v35 }
 0xfd3   :  { %v2380_v63 = vrot.slane %v2379_v36, 1  ;;  %v2412_v31 = vrot.slane %v2411_v40, 1 }
 0xfd5   :  { %v2381_v38 = vadd.f32 %v2380_v63, %v2379_v36  ;;  %v2413_v28 = vadd.f32 %v2412_v31, %v2411_v40  ;;  %v2230_v36 = vmul.f32 %v4482_v46, %v4530_v10  ;;  %v2652_v31 = vld [vmem:[%s4814_s3 + $0xf8] sm:$0xff] }
 0xfd6   :  { %2656 = vmatprep.subr.mxu0 %v2652_v31 }
0x1009   :  { %v2190_v4 = vpop.permute.xlu1 %2189 }
0x100a   :  { %v2192_v21 = vmul.f32 %v4572_v53, %v2190_v4  ;;  %v2250_v4 = vrot.slane %v2230_v36, %v3327_v19  ;;  %v2645_v36 = vld [vmem:[%s4814_s3 + $0xc0] sm:$0xff] }
0x101d   :  { %v2437_v32 = vpop.permute.xlu0 %2436  ;;  %v2200_v60 = vpop.permute.xlu1 %2199 }
0x101e   :  { %v2439_v48 = vsel %vm55_vm0, %v2381_v38, %v2437_v32  ;;  %v2202_v43 = vadd.f32 %v2200_v60, %v2192_v21 }
0x101f   :  { %2867 = vmatmul.mubr.msk.f32.vlgmr.msra.gmra.mxu0 %vm279_vm2, %v2439_v48 }
0x1020   :  { %3124 = vtanh.f32 %v2202_v43  ;;  %2214 = vst.msk [vmem:[#allocation3 + $0x1a] sm:$0x1] %vm832_vm3, %v2202_v43  ;;  %2720 = vmatprep.mubr.f32.mxu0 %v4892_v16 }
0x1021   :  { %v2156_v49 = vpop.permute.xlu0 %2155 }
0x1022   :  { %v2158_v9 = vmul.f32 %v4577_v56, %v2156_v49 }
0x1025   :  { %v2166_v34 = vpop.permute.xlu0 %2165 }
0x1026   :  { %v2168_v45 = vadd.f32 %v2166_v34, %v2158_v9 }
0x1028   :  { %3126 = vtanh.f32 %v2168_v45  ;;  %2180 = vst.msk [vmem:[#allocation3 + $0xa] sm:$0x1] %vm832_vm3, %v2168_v45 }
0x102d   :  { %v3125_v51 = vpop.eup %3124 }
0x102e   :  { %2205 = vrot.lane.b32.xlu1 %v3125_v51, %s3209_s12 }
0x1035   :  { %v3127_v26 = vpop.eup %3126 }
0x1036   :  { %2171 = vrot.lane.b32.xlu0 %v3127_v26, %s3209_s12 }
0x10a0   :  { %v2206_v11 = vpop.permute.xlu1 %2205 }
0x10a1   :  { %v4597_v12 = vmul.f32 %v4572_v53, %v2206_v11 }
0x10a3   :  { %2210 = vrot.lane.b32.xlu1 %v4597_v12, %s3210_s0 }
0x10a7   :  { %2586 = vrot.lane.b32.xlu1 %v2427_v37, %s3210_s0 }
0x10a8   :  { %v2172_v30 = vpop.permute.xlu0 %2171 }
0x10a9   :  { %v2174_v39 = vmul.f32 %v4577_v56, %v2172_v30 }
0x10ab   :  { %2176 = vrot.lane.b32.xlu0 %v2174_v39, %s3210_s0 }
0x10af   :  { %2551 = vrot.lane.b32.xlu0 %v2413_v28, %s3210_s0  ;;  %v2651_v28 = vld [vmem:[%s4814_s3 + $0xf0] sm:$0xff] }
0x10b0   :  { %2657 = vmatpush1.msra.mxu0 %v2651_v28 }
0x10df   :  { %v2525_v53 = vpop.f32.mrf.mxu0 }
0x10e0   :  { %v2532_v47 = vrot.slane %v2525_v53, 5  ;;  %v2650_v53 = vld [vmem:[%s4814_s3 + $0xe8] sm:$0xff] }
0x10e1   :  { %v2527_v13 = vpop.f32.mrf.mxu0  ;;  %2658 = vmatprep.subr.mxu0 %v2650_v53 }
0x10e2   :  { %v2536_v6 = vadd.f32 %v2532_v47, %v3800_v5  ;;  %v2533_v14 = vrot.slane %v2527_v13, 5  ;;  %v2228_v5 = vmul.f32 %v4443_v44, %v4523_v0  ;;  %v2649_v47 = vld [vmem:[%s4814_s3 + $0xe0] sm:$0xff] }
0x10e3   :  { %2659 = vmatpush1.msra.mxu0 %v2649_v47 }
0x10e4   :  { %3128 = vtanh.f32 %v2536_v6  ;;  %v2537_v42 = vadd.f32 %v2533_v14, %v3804_v7  ;;  %v2258_v7 = vadd.f32 %v2250_v4, %v4929_v58  ;;  %v2242_v60 = vrot.slane %v2228_v5, %v3327_v19 }
0x10e5   :  { %v2868_v49 = vmul.f32 -1.442695, %v2536_v6  ;;  %v2648_v6 = vld [vmem:[%s4814_s3 + $0xd8] sm:$0xff] }
0x10e6   :  { %3130 = vtanh.f32 %v2537_v42  ;;  %v2869_v21 = vmul.f32 -1.442695, %v2537_v42  ;;  %v2278_v48 = vrot.slane %v2258_v7, %v4535_v50  ;;  %v2256_v44 = vadd.f32 %v2242_v60, %v3820_v15  ;;  %2660 = vmatprep.subr.mxu0 %v2648_v6  ;;  %v2643_v7 = vld [vmem:[%s4814_s3 + $0xb0] sm:$0xff]  ;;  %v2641_v60 = vld [vmem:[%s4814_s3 + $0xa0] sm:$0xff] }
0x10e8   :  { %3132 = vpow2.f32 %v2869_v21  ;;  %v2270_v0 = vrot.slane %v2256_v44, %v4535_v50  ;;  %v2642_v21 = vld [vmem:[%s4814_s3 + $0xa8] sm:$0xff]  ;;  %v2639_v44 = vld [vmem:[%s4814_s3 + $0x90] sm:$0xff] }
0x10f1   :  { %v3129_v52 = vpop.eup %3128 }
0x10f2   :  { %2546 = vrot.lane.b32.xlu0 %v3129_v52, %s3208_s6  ;;  %v2647_v52 = vld [vmem:[%s4814_s3 + $0xd0] sm:$0xff] }
0x10f3   :  { %v3131_v56 = vpop.eup %3130  ;;  %2661 = vmatpush1.msra.mxu0 %v2647_v52  ;;  %v2226_v52 = vld [vmem:[#allocation3 + $0x18] sm:$0xff] }
0x10f4   :  { %2581 = vrot.lane.b32.xlu1 %v3131_v56, %s3208_s6  ;;  %v2646_v56 = vld [vmem:[%s4814_s3 + $0xc8] sm:$0xff] }
0x10f5   :  { %v3133_v9 = vpop.eup %3132  ;;  %2662 = vmatprep.subr.mxu0 %v2646_v56 }
0x10f6   :  { %v2576_v45 = vadd.f32 1.0, %v3133_v9  ;;  %2663 = vmatpush1.msra.mxu0 %v2645_v36 }
0x1115   :  { %v2211_v63 = vpop.permute.xlu1 %2210 }
0x1116   :  { %2213 = vst.msk [vmem:[#allocation2 + $0x1a] sm:$0x1] %vm832_vm3, %v2211_v63  ;;  %v2644_v63 = vld [vmem:[%s4814_s3 + $0xb8] sm:$0xff] }
0x1117   :  { %2664 = vmatprep.subr.mxu0 %v2644_v63 }
0x1118   :  { %2665 = vmatpush1.msra.mxu0 %v2643_v7 }
0x1119   :  { %v2587_v33 = vpop.permute.xlu1 %2586  ;;  %2666 = vmatprep.subr.mxu0 %v2642_v21  ;;  %v2630_v21 = vld [vmem:[%s4814_s3 + $0x48] sm:$0xff] }
0x111a   :  { %2667 = vmatpush1.msra.mxu0 %v2641_v60 }
0x111d   :  { %v4616_v38 = vpop.permute.xlu0 %2176  ;;  %v4618_v32 = vld [vmem:[#allocation2 + $0x18] sm:$0xff] }
0x111e   :  { %2179 = vst.msk [vmem:[#allocation2 + $0xa] sm:$0x1] %vm832_vm3, %v4616_v38  ;;  %v2262_v46 = vmul.f32 %v4495_v62, %v4618_v32 }
0x1120   :  { %v2282_v10 = vadd.f32 %v2278_v48, %v2262_v46  ;;  %v2640_v48 = vld [vmem:[%s4814_s3 + $0x98] sm:$0xff] }
0x1121   :  { %2668 = vmatprep.subr.mxu0 %v2640_v48 }
0x1122   :  { %3134 = vtanh.f32 %v2282_v10  ;;  %2669 = vmatpush1.msra.mxu0 %v2639_v44 }
0x1125   :  { %v4627_v58 = vld [vmem:[#allocation2 + $0x8] sm:$0xff] }
0x1126   :  { %v2260_v19 = vmul.f32 %v4465_v1, %v4627_v58 }
0x1128   :  { %v2280_v43 = vadd.f32 %v2270_v0, %v2260_v19  ;;  %v2638_v0 = vld [vmem:[%s4814_s3 + $0x88] sm:$0xff]  ;;  %v2637_v19 = vld [vmem:[%s4814_s3 + $0x80] sm:$0xff] }
0x1129   :  { %2670 = vmatprep.subr.mxu0 %v2638_v0 }
0x112a   :  { %3136 = vtanh.f32 %v2280_v43  ;;  %v2636_v43 = vld [vmem:[%s4814_s3 + $0x78] sm:$0xff]  ;;  %2671 = vmatpush1.msra.mxu0 %v2637_v19 }
0x112b   :  { %3138 = vpow2.f32 %v2868_v49  ;;  %2672 = vmatprep.subr.mxu0 %v2636_v43  ;;  %v2627_v43 = vld [vmem:[%s4814_s3 + $0x30] sm:$0xff] }
0x112c   :  { %3140 = vrcp.f32 %v2576_v45  ;;  %v2634_v45 = vld [vmem:[%s4814_s3 + $0x68] sm:$0xff] }
0x112f   :  { %v3135_v34 = vpop.eup %3134 }
0x1130   :  { %v2290_v62 = vmul.f32 %v4502_v18, %v3135_v34  ;;  %v2552_v18 = vpop.permute.xlu0 %2551  ;;  %v2635_v34 = vld [vmem:[%s4814_s3 + $0x70] sm:$0xff] }
0x1131   :  { %2673 = vmatpush1.msra.mxu0 %v2635_v34 }
0x1132   :  { %v2300_v51 = vsel %vm55_vm0, %v2290_v62, 0.0  ;;  %2674 = vmatprep.subr.mxu0 %v2634_v45  ;;  %v2624_v45 = vld [vmem:[%s4814_s3 + $0x18] sm:$0xff] }
0x1133   :  { %2301 = vadd.xlane.f32.xlu1 %v2300_v51 }
0x1137   :  { %v3137_v15 = vpop.eup %3136 }
0x1138   :  { %v2288_v26 = vmul.f32 %v4474_v17, %v3137_v15  ;;  %v3139_v50 = vpop.eup %3138 }
0x1139   :  { %v2541_v1 = vadd.f32 1.0, %v3139_v50  ;;  %v4636_v61 = vpop.eup %3140 }
0x113a   :  { %v2294_v22 = vsel %vm55_vm0, %v2288_v26, 0.0  ;;  %v2589_v24 = vmul.f32 %v4636_v61, %v2587_v33 }
0x113b   :  { %2295 = vadd.xlane.f32.xlu0 %v2294_v22  ;;  %3142 = vrcp.f32 %v2541_v1 }
0x1144   :  { %2591 = vrot.lane.b32.xlu1 %v2589_v24, %s3209_s12 }
0x1148   :  { %v4640_v29 = vpop.eup %3142 }
0x1149   :  { %v2554_v2 = vmul.f32 %v4640_v29, %v2552_v18 }
0x1151   :  { %2556 = vrot.lane.b32.xlu0 %v2554_v2, %s3209_s12 }
0x1164   :  { %v2547_v8 = vpop.permute.xlu0 %2546 }
0x1165   :  { %v2549_v11 = vmul.f32 %v4640_v29, %v2547_v8 }
0x1166   :  { %v2582_v17 = vpop.permute.xlu1 %2581 }
0x1167   :  { %v2584_v3 = vmul.f32 %v4636_v61, %v2582_v17 }
0x11bc   :  { %v4644_v41 = vpop.xlane.xlu1 %2301 }
0x11bd   :  { %v2321_v14 = vrot.slane %v4644_v41, 4 }
0x11bf   :  { %v2322_v4 = vmax.f32 %v4644_v41, %v2321_v14 }
0x11c0   :  { %v2592_v20 = vpop.permute.xlu1 %2591 }
0x11c1   :  { %v2594_v57 = vadd.f32 %v2592_v20, %v2584_v3  ;;  %v2323_v46 = vrot.slane %v2322_v4, 2 }
0x11c3   :  { %3144 = vtanh.f32 %v2594_v57  ;;  %2606 = vst.msk [vmem:[#allocation3 + $0x10] sm:$0x8] %vm2570_vm7, %v2594_v57  ;;  %v2324_v49 = vmax.f32 %v2322_v4, %v2323_v46  ;;  %v2632_v4 = vld [vmem:[%s4814_s3 + $0x58] sm:$0xff]  ;;  %v2629_v46 = vld [vmem:[%s4814_s3 + $0x40] sm:$0xff] }
0x11c4   :  { %v2296_v35 = vpop.xlane.xlu0 %2295 }
0x11c5   :  { %v2309_v37 = vrot.slane %v2296_v35, 4  ;;  %v2325_v62 = vrot.slane %v2324_v49, 1 }
0x11c7   :  { %v2310_v30 = vmax.f32 %v2296_v35, %v2309_v37  ;;  %v2326_v15 = vmax.f32 %v2324_v49, %v2325_v62  ;;  %v2626_v49 = vld [vmem:[%s4814_s3 + $0x28] sm:$0xff] }
0x11c8   :  { %v2557_v59 = vpop.permute.xlu0 %2556 }
0x11c9   :  { %v2559_v54 = vadd.f32 %v2557_v59, %v2549_v11  ;;  %v2311_v39 = vrot.slane %v2310_v30, 2  ;;  %v2330_v26 = vsub.f32 %v4644_v41, %v2326_v15 }
0x11cb   :  { %3146 = vtanh.f32 %v2559_v54  ;;  %2572 = vst.msk [vmem:[#allocation3] sm:$0x8] %vm2570_vm7, %v2559_v54  ;;  %v2312_v42 = vmax.f32 %v2310_v30, %v2311_v39  ;;  %v2337_v50 = vmul.f32 1.442695, %v2330_v26  ;;  %v2224_v39 = vld [vmem:[#allocation3 + $0x8] sm:$0xff] }
0x11cd   :  { %v2313_v5 = vrot.slane %v2312_v42, 1 }
0x11cf   :  { %v2314_v10 = vmax.f32 %v2312_v42, %v2313_v5  ;;  %v2631_v5 = vld [vmem:[%s4814_s3 + $0x50] sm:$0xff] }
0x11d0   :  { %v3145_v40 = vpop.eup %3144 }
0x11d1   :  { %2597 = vrot.lane.b32.xlu1 %v3145_v40, %s3209_s12  ;;  %v2328_v9 = vsub.f32 %v2296_v35, %v2314_v10  ;;  %v2628_v10 = vld [vmem:[%s4814_s3 + $0x38] sm:$0xff] }
0x11d3   :  { %v2333_v51 = vmul.f32 1.442695, %v2328_v9  ;;  %v2625_v9 = vld [vmem:[%s4814_s3 + $0x20] sm:$0xff] }
0x11d5   :  { %3148 = vpow2.f32 %v2333_v51 }
0x11d6   :  { %3150 = vpow2.f32 %v2337_v50 }
0x11d8   :  { %v3147_v13 = vpop.eup %3146 }
0x11d9   :  { %2562 = vrot.lane.b32.xlu0 %v3147_v13, %s3209_s12 }
0x11e2   :  { %v3149_v22 = vpop.eup %3148 }
0x11e3   :  { %v2345_v1 = vrot.slane %v3149_v22, 4  ;;  %v3151_v18 = vpop.eup %3150 }
0x11e4   :  { %v2357_v2 = vrot.slane %v3151_v18, 4 }
0x11e5   :  { %v2346_v33 = vadd.f32 %v3149_v22, %v2345_v1 }
0x11e6   :  { %v2358_v8 = vadd.f32 %v3151_v18, %v2357_v2 }
0x11e7   :  { %v2347_v24 = vrot.slane %v2346_v33, 2 }
0x11e8   :  { %v2359_v57 = vrot.slane %v2358_v8, 2 }
0x11e9   :  { %v2348_v17 = vadd.f32 %v2347_v24, %v2346_v33  ;;  %v2623_v33 = vld [vmem:[%s4814_s3 + $0x10] sm:$0xff]  ;;  %v2622_v24 = vld [vmem:[%s4814_s3 + $0x8] sm:$0xff] }
0x11ea   :  { %v2360_v35 = vadd.f32 %v2359_v57, %v2358_v8 }
0x11eb   :  { %v2349_v3 = vrot.slane %v2348_v17, 1 }
0x11ec   :  { %v2361_v11 = vrot.slane %v2360_v35, 1 }
0x11ed   :  { %v2350_v20 = vadd.f32 %v2349_v3, %v2348_v17 }
0x11ee   :  { %v2362_v59 = vadd.f32 %v2361_v11, %v2360_v35 }
0x11ef   :  { %3152 = vrcp.f32 %v2350_v20 }
0x11f0   :  { %3154 = vrcp.f32 %v2362_v59 }
0x11fc   :  { %v3153_v54 = vpop.eup %3152 }
0x11fd   :  { %v2368_v41 = vmul.f32 %v3153_v54, %v3149_v22  ;;  %v3155_v30 = vpop.eup %3154 }
0x11fe   :  { %v2370_v53 = vmul.f32 %v3155_v30, %v3151_v18 }
0x11ff   :  { %v2372_v37 = vmul.f32 %v2368_v41, %v4627_v58  ;;  %v2404_v31 = vmul.f32 %v2368_v41, %v2224_v39  ;;  %v2633_v58 = vld [vmem:[%s4814_s3 + $0x60] sm:$0xff] }
0x1200   :  { %v2374_v6 = vmul.f32 %v2370_v53, %v4618_v32  ;;  %v2406_v36 = vmul.f32 %v2370_v53, %v2226_v52  ;;  %2675 = vmatpush1.msra.mxu0 %v2633_v58 }
0x1201   :  { %v2382_v40 = vsel %vm55_vm0, %v2372_v37, 0.0  ;;  %v2414_v47 = vsel %vm55_vm0, %v2404_v31, 0.0  ;;  %2676 = vmatprep.subr.mxu0 %v2632_v4 }
0x1202   :  { %v2383_v28 = vrot.slane %v2382_v40, 4  ;;  %v2415_v14 = vrot.slane %v2414_v47, 4  ;;  %v2396_v56 = vsel %vm55_vm0, %v2374_v6, 0.0  ;;  %v2428_v60 = vsel %vm55_vm0, %v2406_v36, 0.0  ;;  %2677 = vmatpush1.msra.mxu0 %v2631_v5 }
0x1203   :  { %v2397_v7 = vrot.slane %v2396_v56, 4  ;;  %2678 = vmatprep.subr.mxu0 %v2630_v21  ;;  %v2429_v19 = vrot.slane %v2428_v60, 4 }
0x1204   :  { %v2384_v13 = vadd.f32 %v2383_v28, %v2382_v40  ;;  %v2416_v63 = vadd.f32 %v2415_v14, %v2414_v47  ;;  %2679 = vmatpush1.msra.mxu0 %v2629_v46 }
0x1205   :  { %v2398_v0 = vadd.f32 %v2397_v7, %v2396_v56  ;;  %2680 = vmatprep.subr.mxu0 %v2628_v10  ;;  %v2430_v50 = vadd.f32 %v2429_v19, %v2428_v60 }
0x1206   :  { %v2385_v42 = vrot.slane %v2384_v13, 2  ;;  %v2417_v48 = vrot.slane %v2416_v63, 2  ;;  %2681 = vmatpush1.msra.mxu0 %v2627_v43 }
0x1207   :  { %2682 = vmatprep.subr.mxu0 %v2626_v49  ;;  %v2399_v26 = vrot.slane %v2398_v0, 2  ;;  %v2431_v2 = vrot.slane %v2430_v50, 2 }
0x1208   :  { %v2386_v32 = vadd.f32 %v2385_v42, %v2384_v13  ;;  %v2418_v34 = vadd.f32 %v2417_v48, %v2416_v63  ;;  %2683 = vmatpush1.msra.mxu0 %v2625_v9 }
0x1209   :  { %2684 = vmatprep.subr.mxu0 %v2624_v45  ;;  %v2400_v18 = vadd.f32 %v2399_v26, %v2398_v0  ;;  %v2432_v57 = vadd.f32 %v2431_v2, %v2430_v50  ;;  %v4940_v50 = vld [vmem:[#allocation33_spill] sm:$0xff] }
0x120a   :  { %v2387_v44 = vrot.slane %v2386_v32, 1  ;;  %v2419_v1 = vrot.slane %v2418_v34, 1  ;;  %2685 = vmatpush1.msra.mxu0 %v2623_v33  ;;  %v4941_v33 = vld [vmem:[#allocation12_spill] sm:$0xff] }
0x120b   :  { %2686 = vmatprep.subr.mxu0 %v2622_v24  ;;  %v2401_v20 = vrot.slane %v2400_v18, 1  ;;  %v2433_v11 = vrot.slane %v2432_v57, 1 }
0x120c   :  { %v2388_v51 = vadd.f32 %v2387_v44, %v2386_v32  ;;  %v2420_v17 = vadd.f32 %v2419_v1, %v2418_v34  ;;  %v4939_v34 = vld [vmem:[#allocation8_spill] sm:$0xff] }
0x120d   :  { %v2402_v35 = vadd.f32 %v2401_v20, %v2400_v18  ;;  %v2434_v59 = vadd.f32 %v2433_v11, %v2432_v57  ;;  %v4942_v20 = vld [vmem:[#allocation34_spill] sm:$0xff] }
0x1243   :  { %v2598_v62 = vpop.permute.xlu1 %2597 }
0x1244   :  { %v4749_v15 = vmul.f32 %v4636_v61, %v2598_v62  ;;  %v2621_v61 = vld [vmem:[%s4814_s3] sm:$0xff]  ;;  %s3211_s3 = smov [#allocation4]  }
0x1245   :  { %2687 = vmatpush1.msra.mxu0 %v2621_v61 }
0x1246   :  { %v2911_v22 = vpack.i.bf16 %v2388_v51, %v4749_v15 }
0x1248   :  { %2912 = vrot.lane.b32.xlu1 %v2911_v22, %s3208_s6 }
0x124b   :  { %v2563_v3 = vpop.permute.xlu0 %2562 }
0x124c   :  { %v2565_v8 = vmul.f32 %v4640_v29, %v2563_v3  ;;  %2740 = vrot.lane.b32.xlu1 %v2420_v17, %s3210_s0 }
0x124e   :  { %2567 = vrot.lane.b32.xlu0 %v2565_v8, %s3210_s0 }
0x1252   :  { %2616 = vrot.lane.b32.xlu0 %v2402_v35, %s3209_s12 }
0x1256   :  { %2774 = vrot.lane.b32.xlu0 %v2434_v59, %s3210_s0 }
0x12ba   :  { %v2913_v54 = vpop.permute.xlu1 %2912 }
0x12bb   :  { %v2914_v41 = vunpack.i.l.bf16 %v2913_v54  ;;  %v2915_v40 = vunpack.i.h.bf16 %v2913_v54 }
0x12be   :  { %v2741_v5 = vpop.permute.xlu1 %2740 }
0x12c0   :  { %v2568_v37 = vpop.permute.xlu0 %2567 }
0x12c1   :  { %2571 = vst.msk [vmem:[#allocation2] sm:$0x8] %vm2570_vm7, %v2568_v37  ;;  %v2610_v29 = vsel %vm55_vm0, %v2568_v37, %v2914_v41 }
0x12c2   :  { %v2619_v30 = vsel %vm279_vm2, %v2610_v29, %v2915_v40 }
0x12c4   :  { %v2617_v39 = vpop.permute.xlu0 %2616 }
0x12c5   :  { %v2620_v31 = vsel %vm882_vm4, %v2619_v30, %v2617_v39 }
0x12c6   :  { %v2654_v28 = vrot.slane %v2620_v31, 3 }
0x12c8   :  { %2721 = vmatmul.mubr.f32.vlgmr.msra.gmra.mxu0 %v2654_v28  ;;  %v2775_v7 = vpop.permute.xlu0 %2774 }
0x1388   :  { %v2722_v53 = vpop.f32.mrf.mxu0 }
0x1389   :  { %v2723_v47 = vadd.f32 %v2722_v53, %v4917_v27 }
0x138a   :  { %v2724_v13 = vpop.f32.mrf.mxu0 }
0x138b   :  { %v2870_v6 = vmul.f32 -1.442695, %v2723_v47  ;;  %3156 = vtanh.f32 %v2723_v47  ;;  %v2725_v14 = vadd.f32 %v2724_v13, %v4938_v55 }
0x138d   :  { %3158 = vpow2.f32 %v2870_v6  ;;  %v2871_v42 = vmul.f32 -1.442695, %v2725_v14 }
0x138e   :  { %3160 = vtanh.f32 %v2725_v14 }
0x138f   :  { %3162 = vpow2.f32 %v2871_v42 }
0x1398   :  { %v3157_v52 = vpop.eup %3156 }
0x1399   :  { %2735 = vrot.lane.b32.xlu1 %v3157_v52, %s3208_s6 }
0x139a   :  { %v3159_v56 = vpop.eup %3158 }
0x139b   :  { %v3161_v36 = vpop.eup %3160  ;;  %v2730_v63 = vadd.f32 1.0, %v3159_v56 }
0x139c   :  { %v3163_v58 = vpop.eup %3162  ;;  %2769 = vrot.lane.b32.xlu0 %v3161_v36, %s3208_s6 }
0x139d   :  { %3164 = vrcp.f32 %v2730_v63  ;;  %v2764_v27 = vadd.f32 1.0, %v3163_v58 }
0x139f   :  { %3166 = vrcp.f32 %v2764_v27 }
0x13aa   :  { %v3165_v4 = vpop.eup %3164 }
0x13ab   :  { %v2743_v32 = vmul.f32 %v3165_v4, %v2741_v5 }
0x13ac   :  { %v3167_v55 = vpop.eup %3166 }
0x13ad   :  { %2745 = vrot.lane.b32.xlu1 %v2743_v32, %s3209_s12  ;;  %v2777_v21 = vmul.f32 %v3167_v55, %v2775_v7 }
0x13af   :  { %2779 = vrot.lane.b32.xlu0 %v2777_v21, %s3209_s12 }
0x140b   :  { %v2736_v60 = vpop.permute.xlu1 %2735 }
0x140c   :  { %v2738_v46 = vmul.f32 %v3165_v4, %v2736_v60 }
0x140e   :  { %v2770_v48 = vpop.permute.xlu0 %2769 }
0x140f   :  { %v2772_v44 = vmul.f32 %v3167_v55, %v2770_v48 }
0x141f   :  { %v2746_v10 = vpop.permute.xlu1 %2745 }
0x1420   :  { %v2748_v0 = vadd.f32 %v2746_v10, %v2738_v46 }
0x1421   :  { %v2780_v19 = vpop.permute.xlu0 %2779 }
0x1422   :  { %3168 = vtanh.f32 %v2748_v0  ;;  %2760 = vst.msk [vmem:[#allocation3 + $0xb] sm:$0x1] %vm832_vm3, %v2748_v0  ;;  %v2782_v43 = vadd.f32 %v2780_v19, %v2772_v44 }
0x1424   :  { %3170 = vtanh.f32 %v2782_v43  ;;  %2794 = vst.msk [vmem:[#allocation3 + $0x1b] sm:$0x1] %vm832_vm3, %v2782_v43 }
0x142f   :  { %v3169_v49 = vpop.eup %3168 }
0x1430   :  { %2751 = vrot.lane.b32.xlu1 %v3169_v49, %s3209_s12 }
0x1431   :  { %v3171_v9 = vpop.eup %3170 }
0x1432   :  { %2785 = vrot.lane.b32.xlu0 %v3171_v9, %s3209_s12 }
0x1434   :  { %1635 = vrot.lane.b32.xlu1 %v4455_v23, %s3208_s6 }
0x1436   :  { %2215 = vrot.lane.b32.xlu0 %v4597_v12, %s3208_s6 }
0x1438   :  { %1055 = vrot.lane.b32.xlu1 %v4939_v34, %s3208_s6 }
0x14a2   :  { %v2752_v45 = vpop.permute.xlu1 %2751 }
0x14a3   :  { %v2754_v62 = vmul.f32 %v3165_v4, %v2752_v45 }
0x14a4   :  { %v2786_v51 = vpop.permute.xlu0 %2785 }
0x14a5   :  { %v2788_v26 = vmul.f32 %v3167_v55, %v2786_v51  ;;  %2756 = vrot.lane.b32.xlu0 %v2754_v62, %s3210_s0 }
0x14a6   :  { %v1636_v23 = vpop.permute.xlu1 %1635 }
0x14a7   :  { %2795 = vrot.lane.b32.xlu1 %v2788_v26, %s3208_s6  ;;  %v1638_v16 = vsel %vm55_vm0, %v4448_v25, %v1636_v23 }
0x14a8   :  { %v2216_v12 = vpop.permute.xlu0 %2215  ;;  %v2800_v61 = vrot.slane %v1638_v16, 7 }
0x14a9   :  { %447 = vrot.lane.b32.xlu0 %v4940_v50, %s3208_s6  ;;  %v2218_v1 = vsel %vm55_vm0, %v4616_v38, %v2216_v12  ;;  %s2824_s6 = sshll.u32 %s3211_s3, 4  ;;  %s2825_s6 = int_to_ptr.vmem [resolvable:$true] %s2824_s6 }
0x14aa   :  { %v1056_v22 = vpop.permute.xlu1 %1055  ;;  %v2803_v2 = vrot.slane %v2218_v1, 6  ;;  %s3184_s12 = scalar_lea.vmem %s2825_s6, 256  ;;  %p3189_p1 = scmp.lt.s32.totalorder %s2825_s6, %s2825_s6 }
0x14ab   :  { %2602 = vrot.lane.b32.xlu1 %v4749_v15, %s3210_s0  ;;  %v1058_v24 = vsel %vm55_vm0, %v4941_v33, %v1056_v22  ;;  %p3185_p0 = scmp.ne.s32.totalorder %s2825_s6, %s3184_s12  ;;  %p3190_p2 = scmp.lt.s32.totalorder %s3184_s12, %s3184_s12 }
0x14ac   :  { %v2809_v15 = vsel %vm2808_vm9, %v1058_v24, %v2800_v61 }
0x14ad   :  { %2790 = vrot.lane.b32.xlu0 %v2788_v26, %s3210_s0  ;;  %v2811_v8 = vsel %vm2810_vm10, %v2809_v15, %v2803_v2  ;;  %p3191_p3 = por %p3190_p2, %p3189_p1 }
0x14af   :  { %p3192_p4 = pnand %p3191_p3, %p3185_p0 }
0x1517   :  { %v2757_v18 = vpop.permute.xlu0 %2756 }
0x1518   :  { %2759 = vst.msk [vmem:[#allocation2 + $0xb] sm:$0x1] %vm832_vm3, %v2757_v18 }
0x1519   :  { %v2796_v17 = vpop.permute.xlu1 %2795 }
0x151a   :  { %v2798_v3 = vsel %vm55_vm0, %v2757_v18, %v2796_v17 }
0x151b   :  { %v2806_v25 = vrot.slane %v2798_v3, 5  ;;  %v448_v38 = vpop.permute.xlu0 %447 }
0x151c   :  { %v450_v57 = vsel %vm55_vm0, %v4942_v20, %v448_v38 }
0x151d   :  { %v2813_v35 = vsel %vm2812_vm11, %v2811_v8, %v2806_v25  ;;  %v2603_v11 = vpop.permute.xlu1 %2602 }
0x151e   :  { %v2815_v59 = vsel %vm2814_vm12, %v2813_v35, %v450_v57  ;;  %2605 = vst.msk [vmem:[#allocation2 + $0x10] sm:$0x8] %vm2570_vm7, %v2603_v11 }
0x151f   :  { %2816 = vst.msk [vmem:[#allocation4] sm:$0xff] %vm279_vm2, %v2815_v59  ;;  %v2791_v54 = vpop.permute.xlu0 %2790 }
0x1520   :  { %2793 = vst.msk [vmem:[#allocation2 + $0x1b] sm:$0x1] %vm832_vm3, %v2791_v54 }
0x1521   :  { %3195 = shalt.err (!%p3192_p4)
}
0x1522   :  { %s3212_s0 = smov 128   ;;  %s3213_s25 = smov 8  }
0x1523   :  { %2830 = dma.vmem_to_hbm [thread:$0]  %s2825_s6, 256, %s4820_s9, [#allocation5], %s3212_s0, %s3212_s0, %s3213_s25  }
0x1524   :  { %3204 = dma.done.wait [#allocation5], 256  }
0x1525   :  { %3205 = vsyncadd [#allocation5], 4294967040 }
0x1526   :  { %2834 = vsyncpa [#allocation5], 1 }

</bundles_post_ra>
